<compile_context>
chip_gen: v7x
topology: tpu7x:2x2x1
jax: 0.10.0
libtpu: 0.0.40
codegen_flags: <defaults>
</compile_context>

<pallas_src>
import functools

import jax
import jax.numpy as jnp
from jax import lax
from jax.experimental import pallas as pl
from jax.experimental.pallas import tpu as pltpu

XI = 1e-6
EPS = 0.1
IP = 1


def _vat_kernel(x_ref, d0_ref, w1_ref, w1t_ref, b1_ref, w2_ref, b2_ref, loss_ref,
                *, batch, pixels, xi, eps, ip, use_approx_recip):
    x = x_ref[...]            # (C, N)  N = B * H * W  (lane-dense)
    d0 = d0_ref[...]          # (C, N)  rand(x.shape) - 0.5, drawn outside
    w1 = w1_ref[...]          # (F, C)  1x1 conv weight
    w1_t = w1t_ref[...]       # (C, F)  pre-transposed conv weight (backward)
    b1 = b1_ref[...]          # (F, 1)
    w2 = w2_ref[...]          # (F, K)  classifier weight
    b2 = b2_ref[...]          # (1, K)

    cdim, n = x.shape
    kdim = w2.shape[1]
    inv_p = 1.0 / float(pixels)
    inv_bk = 1.0 / float(batch * kdim)

    # ---- call-invariant tables, built once from iota (no HBM pooling matrix) ----
    # seg (B, N): lane-dense per-sample segment one-hot (used by l2_normalize and
    # the VPU pooling backward).
    n_idx = lax.broadcasted_iota(jnp.int32, (batch, n), 1)
    row_lo = lax.broadcasted_iota(jnp.int32, (batch, n), 0) * pixels
    seg = jnp.logical_and(n_idx >= row_lo, n_idx < row_lo + pixels).astype(jnp.float32)
    seg_rows = [seg[b:b + 1, :] for b in range(batch)]           # hoisted (1, N) slices

    # pool_t (N, B): transposed mean-pool matrix so the pooling dot is native
    # (M,K)x(K,N): a1 contracts its last (lane) dim with pool_t's first dim — no
    # relayout of the (F, N) activation on any forward.
    nn_idx = lax.broadcasted_iota(jnp.int32, (n, batch), 0)
    col_lo = lax.broadcasted_iota(jnp.int32, (n, batch), 1) * pixels
    pool_t = jnp.where(jnp.logical_and(nn_idx >= col_lo, nn_idx < col_lo + pixels),
                       inv_p, 0.0).astype(jnp.float32)

    # hoisted conv-weight column slices (JAX does not CSE these across the 3+ forwards)
    w1_cols = [w1[:, c:c + 1] for c in range(cdim)]

    def conv1x1(xc):
        # C -> F "1x1 conv" as C broadcast-FMAs on the VPU; at K = C = 4 the MXU
        # would be ~98% idle and only add push/pop latency.
        z = w1_cols[0] * xc[0:1, :]
        for c in range(1, cdim):
            z = z + w1_cols[c] * xc[c:c + 1, :]
        return z + b1                                            # (F, N)

    def forward(xc):
        z1 = conv1x1(xc)                                         # (F, N)
        a1 = jnp.maximum(z1, 0.0)                                # ReLU
        # global average pool, native MXU form: (F, N) x (N, B) -> (F, B)
        g_t = lax.dot_general(a1, pool_t, (((1,), (0,)), ((), ())),
                              preferred_element_type=jnp.float32)
        g = jnp.transpose(g_t)                                   # (B, F)  tiny (32x2)
        logits = lax.dot_general(g, w2, (((1,), (0,)), ((), ())),
                                 preferred_element_type=jnp.float32) + b2  # (B, K)
        return z1, logits

    def log_softmax(logits):
        m = jnp.max(logits, axis=1, keepdims=True)
        s = logits - m
        return s - jnp.log(jnp.sum(jnp.exp(s), axis=1, keepdims=True))

    def l2_normalize(dv):
        # per-sample L2 norm over all (C, H, W), matching _l2_normalize (+1e-8).
        sq = jnp.sum(dv * dv, axis=0, keepdims=True)             # (1, N)
        ssq = jnp.sum(seg * sq, axis=1, keepdims=True)           # (B, 1)
        denom = jnp.sqrt(ssq) + 1e-8
        if use_approx_recip:
            inv_norm = pl.reciprocal(denom, approx=True)         # EUP slot (otherwise idle)
        else:
            inv_norm = 1.0 / denom                               # interpret / non-TPU path
        inv_lane = jnp.sum(seg * inv_norm, axis=0, keepdims=True)  # (1, N)
        return dv * inv_lane

    # ---- pred = softmax(model(x)), detached (log kept for KL numerics) ----
    _, logits0 = forward(x)
    logpred = log_softmax(logits0)                               # (B, K)
    pred = jnp.exp(logpred)                                      # (B, K)

    # ---- d = _l2_normalize(rand(x.shape) - 0.5) ----
    d = l2_normalize(d0)

    # ---- power iteration: hand-derived d/dx of F.kl_div(log_softmax(model(x+xi*d)), pred) ----
    def power_step(dcur):
        z1, logits = forward(x + xi * dcur)
        sm = jnp.exp(log_softmax(logits))                        # softmax(model(x + xi*d))
        # softmax rows sum to 1  =>  dL/dlogits = (sm - pred) / (B*K)
        dlogits = (sm - pred) * inv_bk                           # (B, K)
        # dL/dg, kept feature-major, native form: (F, K) x (K, B) -> (F, B)
        dg_t = lax.dot_general(w2, jnp.transpose(dlogits), (((1,), (0,)), ((), ())),
                               preferred_element_type=jnp.float32)
        dgp = dg_t * inv_p                                       # fold 1/P into the tiny (F, B)
        # pooling backward on the VPU: B broadcast-FMAs over contiguous P-lane segments
        da1 = seg_rows[0] * dgp[:, 0:1]
        for b in range(1, batch):
            da1 = da1 + seg_rows[b] * dgp[:, b:b + 1]            # (F, N)
        dz1 = jnp.where(z1 > 0.0, da1, 0.0)                      # ReLU backward
        # conv backward, native form: (C, F) x (F, N) -> (C, N)
        dx = lax.dot_general(w1_t, dz1, (((1,), (0,)), ((), ())),
                             preferred_element_type=jnp.float32)
        # d.grad = xi * dL/du of the mean-reduced loss; normalise exactly as PyTorch
        return l2_normalize(xi * dx)

    for _ in range(ip):                                          # ip is static -> fully unrolled
        d = power_step(d)

    # ---- lds = F.kl_div(log_softmax(model(x + eps*d)), pred), reduction='mean' ----
    _, logits_adv = forward(x + eps * d)
    logp_hat = log_softmax(logits_adv)
    kl = pred * (logpred - logp_hat)                             # (B, K)
    tot = jnp.sum(jnp.sum(kl, axis=1, keepdims=True), axis=0, keepdims=True)  # (1, 1)
    # TODO(synk): a (1,1) VMEM output is a masked, tile-padded store; it is the only
    # HBM writeback of the kernel, so the cost is a few hundred ns at most.
    loss_ref[...] = tot * inv_bk


def vat_loss(params, x, key, xi=XI, eps=EPS, ip=IP):
    B, C, H, W = x.shape
    P = H * W
    N = B * P
    # feature-major, lane-dense layout: (C, B*H*W); lane dim N is a multiple of 128.
    x_cn = jnp.transpose(x, (1, 0, 2, 3)).reshape(C, N).astype(jnp.float32)
    # d = rand(x.shape) - 0.5 (drawn outside the kernel: the on-chip PRNG has no
    # interpret/CPU lowering, and this is a tiny (C, N) array).
    d0 = jax.random.uniform(key, (C, N), dtype=jnp.float32) - 0.5

    w1 = params["w1"].astype(jnp.float32)
    on_tpu = jax.devices()[0].platform == "tpu"

    kernel = functools.partial(
        _vat_kernel, batch=B, pixels=P, xi=float(xi), eps=float(eps), ip=int(ip),
        use_approx_recip=on_tpu)

    vmem = pl.BlockSpec(memory_space=pltpu.MemorySpace.VMEM)

    lds = pl.pallas_call(
        kernel,
        out_shape=jax.ShapeDtypeStruct((1, 1), jnp.float32),
        in_specs=[vmem] * 7,
        out_specs=vmem,
    )(x_cn, d0, w1, jnp.transpose(w1),
      params["b1"].astype(jnp.float32),
      params["w2"].astype(jnp.float32),
      params["b2"].astype(jnp.float32))
    return lds[0, 0]


if __name__ == "__main__":
    key = jax.random.PRNGKey(0)
    B, C, H, W = 2, 4, 16, 16
    F_, K_ = 32, 2

    kx, kd, k1, k2, k3, k4 = jax.random.split(key, 6)
    x = jax.random.normal(kx, (B, C, H, W), dtype=jnp.float32)

    # deterministic synthetic model parameters
    params = dict(
        w1=jax.random.normal(k1, (F_, C), dtype=jnp.float32) * 0.3,   # 1x1 conv weight (F, C)
        b1=jax.random.normal(k2, (F_, 1), dtype=jnp.float32) * 0.1,
        w2=jax.random.normal(k3, (F_, K_), dtype=jnp.float32) * 0.3,  # classifier (F -> 2)
        b2=jax.random.normal(k4, (1, K_), dtype=jnp.float32) * 0.1,
    )

    lds = vat_loss(params, x, kd)
    jax.block_until_ready(lds)
    print("KERNEL_OK")
</pallas_src>

<mosaic_0001>
module attributes {stable_mosaic.version = 11 : i64} {
  func.func @_vat_kernel(%arg0: memref<4x512xf32, #tpu.memory_space<vmem>>, %arg1: memref<4x512xf32, #tpu.memory_space<vmem>>, %arg2: memref<32x4xf32, #tpu.memory_space<vmem>>, %arg3: memref<4x32xf32, #tpu.memory_space<vmem>>, %arg4: memref<32x1xf32, #tpu.memory_space<vmem>>, %arg5: memref<32x2xf32, #tpu.memory_space<vmem>>, %arg6: memref<1x2xf32, #tpu.memory_space<vmem>>, %arg7: memref<1x1xf32, #tpu.memory_space<vmem>>) attributes {dimension_semantics = [], scalar_prefetch = 0 : i64, scratch_operands = 0 : i64, tpu.core_type = #tpu.core_type<tc>} {
    %c0 = arith.constant 0 : index
    %c0_0 = arith.constant 0 : index
    %0 = vector.load %arg0[%c0, %c0_0] : memref<4x512xf32, #tpu.memory_space<vmem>>, vector<4x512xf32>
    %c0_1 = arith.constant 0 : index
    %c0_2 = arith.constant 0 : index
    %1 = vector.load %arg1[%c0_1, %c0_2] : memref<4x512xf32, #tpu.memory_space<vmem>>, vector<4x512xf32>
    %c0_3 = arith.constant 0 : index
    %c0_4 = arith.constant 0 : index
    %2 = vector.load %arg2[%c0_3, %c0_4] : memref<32x4xf32, #tpu.memory_space<vmem>>, vector<32x4xf32>
    %c0_5 = arith.constant 0 : index
    %c0_6 = arith.constant 0 : index
    %3 = vector.load %arg3[%c0_5, %c0_6] : memref<4x32xf32, #tpu.memory_space<vmem>>, vector<4x32xf32>
    %c0_7 = arith.constant 0 : index
    %c0_8 = arith.constant 0 : index
    %4 = vector.load %arg4[%c0_7, %c0_8] : memref<32x1xf32, #tpu.memory_space<vmem>>, vector<32x1xf32>
    %c0_9 = arith.constant 0 : index
    %c0_10 = arith.constant 0 : index
    %5 = vector.load %arg5[%c0_9, %c0_10] : memref<32x2xf32, #tpu.memory_space<vmem>>, vector<32x2xf32>
    %c0_11 = arith.constant 0 : index
    %c0_12 = arith.constant 0 : index
    %6 = vector.load %arg6[%c0_11, %c0_12] : memref<1x2xf32, #tpu.memory_space<vmem>>, vector<1x2xf32>
    %7 = tpu.iota {dimensions = array<i32: 1>} : vector<2x512xi32>
    %8 = tpu.iota {dimensions = array<i32: 0>} : vector<2x512xi32>
    %c256_i32 = arith.constant 256 : i32
    %9 = vector.broadcast %c256_i32 : i32 to vector<2x512xi32>
    %10 = arith.muli %8, %9 : vector<2x512xi32>
    %11 = arith.cmpi sge, %7, %10 : vector<2x512xi32>
    %c256_i32_13 = arith.constant 256 : i32
    %12 = vector.broadcast %c256_i32_13 : i32 to vector<2x512xi32>
    %13 = arith.addi %10, %12 : vector<2x512xi32>
    %14 = arith.cmpi slt, %7, %13 : vector<2x512xi32>
    %15 = arith.andi %11, %14 : vector<2x512xi1>
    %16 = arith.extui %15 : vector<2x512xi1> to vector<2x512xi32>
    %17 = arith.sitofp %16 : vector<2x512xi32> to vector<2x512xf32>
    %18 = vector.extract_strided_slice %17 {offsets = [0, 0], sizes = [1, 512], strides = [1, 1]} : vector<2x512xf32> to vector<1x512xf32>
    %19 = vector.extract_strided_slice %17 {offsets = [1, 0], sizes = [1, 512], strides = [1, 1]} : vector<2x512xf32> to vector<1x512xf32>
    %20 = tpu.iota {dimensions = array<i32: 0>} : vector<512x2xi32>
    %21 = tpu.iota {dimensions = array<i32: 1>} : vector<512x2xi32>
    %c256_i32_14 = arith.constant 256 : i32
    %22 = vector.broadcast %c256_i32_14 : i32 to vector<512x2xi32>
    %23 = arith.muli %21, %22 : vector<512x2xi32>
    %24 = arith.cmpi sge, %20, %23 : vector<512x2xi32>
    %c256_i32_15 = arith.constant 256 : i32
    %25 = vector.broadcast %c256_i32_15 : i32 to vector<512x2xi32>
    %26 = arith.addi %23, %25 : vector<512x2xi32>
    %27 = arith.cmpi slt, %20, %26 : vector<512x2xi32>
    %28 = arith.andi %24, %27 : vector<512x2xi1>
    %cst = arith.constant 3.906250e-03 : f32
    %cst_16 = arith.constant 0.000000e+00 : f32
    %29 = vector.broadcast %cst : f32 to vector<512x2xf32>
    %30 = vector.broadcast %cst_16 : f32 to vector<512x2xf32>
    %31 = arith.select %28, %29, %30 : vector<512x2xi1>, vector<512x2xf32>
    %32 = vector.extract_strided_slice %2 {offsets = [0, 0], sizes = [32, 1], strides = [1, 1]} : vector<32x4xf32> to vector<32x1xf32>
    %33 = vector.extract_strided_slice %2 {offsets = [0, 1], sizes = [32, 1], strides = [1, 1]} : vector<32x4xf32> to vector<32x1xf32>
    %34 = vector.extract_strided_slice %2 {offsets = [0, 2], sizes = [32, 1], strides = [1, 1]} : vector<32x4xf32> to vector<32x1xf32>
    %35 = vector.extract_strided_slice %2 {offsets = [0, 3], sizes = [32, 1], strides = [1, 1]} : vector<32x4xf32> to vector<32x1xf32>
    %36 = vector.extract_strided_slice %0 {offsets = [0, 0], sizes = [1, 512], strides = [1, 1]} : vector<4x512xf32> to vector<1x512xf32>
    %37 = vector.broadcast %32 : vector<32x1xf32> to vector<32x512xf32>
    %38 = vector.broadcast %36 : vector<1x512xf32> to vector<32x512xf32>
    %39 = arith.mulf %37, %38 : vector<32x512xf32>
    %40 = vector.extract_strided_slice %0 {offsets = [1, 0], sizes = [1, 512], strides = [1, 1]} : vector<4x512xf32> to vector<1x512xf32>
    %41 = vector.broadcast %33 : vector<32x1xf32> to vector<32x512xf32>
    %42 = vector.broadcast %40 : vector<1x512xf32> to vector<32x512xf32>
    %43 = arith.mulf %41, %42 : vector<32x512xf32>
    %44 = arith.addf %39, %43 : vector<32x512xf32>
    %45 = vector.extract_strided_slice %0 {offsets = [2, 0], sizes = [1, 512], strides = [1, 1]} : vector<4x512xf32> to vector<1x512xf32>
    %46 = vector.broadcast %34 : vector<32x1xf32> to vector<32x512xf32>
    %47 = vector.broadcast %45 : vector<1x512xf32> to vector<32x512xf32>
    %48 = arith.mulf %46, %47 : vector<32x512xf32>
    %49 = arith.addf %44, %48 : vector<32x512xf32>
    %50 = vector.extract_strided_slice %0 {offsets = [3, 0], sizes = [1, 512], strides = [1, 1]} : vector<4x512xf32> to vector<1x512xf32>
    %51 = vector.broadcast %35 : vector<32x1xf32> to vector<32x512xf32>
    %52 = vector.broadcast %50 : vector<1x512xf32> to vector<32x512xf32>
    %53 = arith.mulf %51, %52 : vector<32x512xf32>
    %54 = arith.addf %49, %53 : vector<32x512xf32>
    %55 = vector.broadcast %4 : vector<32x1xf32> to vector<32x512xf32>
    %56 = arith.addf %54, %55 : vector<32x512xf32>
    %cst_17 = arith.constant 0.000000e+00 : f32
    %57 = vector.broadcast %cst_17 : f32 to vector<32x512xf32>
    %58 = arith.maximumf %56, %57 : vector<32x512xf32>
    %cst_18 = arith.constant dense<0.000000e+00> : vector<32x2xf32>
    %59 = tpu.matmul %58, %31, %cst_18 {dimension_numbers = #tpu.dot_dimension_numbers<[1], [0], [0], [1], [0, 0, 1, 1], [], []>} : vector<32x512xf32>, vector<512x2xf32>, vector<32x2xf32> -> vector<32x2xf32>
    %60 = tpu.transpose %59, [1, 0] : vector<32x2xf32> -> vector<2x32xf32>
    %cst_19 = arith.constant dense<0.000000e+00> : vector<2x2xf32>
    %61 = tpu.matmul %60, %5, %cst_19 {dimension_numbers = #tpu.dot_dimension_numbers<[1], [0], [0], [1], [0, 0, 1, 1], [], []>} : vector<2x32xf32>, vector<32x2xf32>, vector<2x2xf32> -> vector<2x2xf32>
    %62 = vector.broadcast %6 : vector<1x2xf32> to vector<2x2xf32>
    %63 = arith.addf %61, %62 : vector<2x2xf32>
    %cst_20 = arith.constant dense<0xFF800000> : vector<2xf32>
    %64 = vector.multi_reduction <maximumf>, %63, %cst_20 [1] : vector<2x2xf32> to vector<2xf32>
    %65 = vector.shape_cast %64 : vector<2xf32> to vector<2x1xf32>
    %66 = vector.broadcast %65 : vector<2x1xf32> to vector<2x2xf32>
    %67 = arith.subf %63, %66 : vector<2x2xf32>
    %68 = math.exp %67 : vector<2x2xf32>
    %cst_21 = arith.constant dense<0.000000e+00> : vector<2xf32>
    %69 = vector.multi_reduction <add>, %68, %cst_21 [1] : vector<2x2xf32> to vector<2xf32>
    %70 = vector.shape_cast %69 : vector<2xf32> to vector<2x1xf32>
    %71 = math.log %70 : vector<2x1xf32>
    %72 = vector.broadcast %71 : vector<2x1xf32> to vector<2x2xf32>
    %73 = arith.subf %67, %72 : vector<2x2xf32>
    %74 = math.exp %73 : vector<2x2xf32>
    %75 = arith.mulf %1, %1 : vector<4x512xf32>
    %cst_22 = arith.constant dense<0.000000e+00> : vector<512xf32>
    %76 = vector.multi_reduction <add>, %75, %cst_22 [0] : vector<4x512xf32> to vector<512xf32>
    %77 = vector.shape_cast %76 : vector<512xf32> to vector<1x512xf32>
    %78 = vector.broadcast %77 : vector<1x512xf32> to vector<2x512xf32>
    %79 = arith.mulf %17, %78 : vector<2x512xf32>
    %cst_23 = arith.constant dense<0.000000e+00> : vector<2xf32>
    %80 = vector.multi_reduction <add>, %79, %cst_23 [1] : vector<2x512xf32> to vector<2xf32>
    %81 = vector.shape_cast %80 : vector<2xf32> to vector<2x1xf32>
    %82 = math.sqrt %81 : vector<2x1xf32>
    %cst_24 = arith.constant 9.99999993E-9 : f32
    %83 = vector.broadcast %cst_24 : f32 to vector<2x1xf32>
    %84 = arith.addf %82, %83 : vector<2x1xf32>
    %cst_25 = arith.constant 1.000000e+00 : f32
    %85 = vector.broadcast %cst_25 : f32 to vector<2x1xf32>
    %86 = arith.divf %85, %84 : vector<2x1xf32>
    %87 = vector.broadcast %86 : vector<2x1xf32> to vector<2x512xf32>
    %88 = arith.mulf %17, %87 : vector<2x512xf32>
    %cst_26 = arith.constant dense<0.000000e+00> : vector<512xf32>
    %89 = vector.multi_reduction <add>, %88, %cst_26 [0] : vector<2x512xf32> to vector<512xf32>
    %90 = vector.shape_cast %89 : vector<512xf32> to vector<1x512xf32>
    %91 = vector.broadcast %90 : vector<1x512xf32> to vector<4x512xf32>
    %92 = arith.mulf %1, %91 : vector<4x512xf32>
    %cst_27 = arith.constant 9.99999997E-7 : f32
    %93 = vector.broadcast %cst_27 : f32 to vector<4x512xf32>
    %94 = arith.mulf %93, %92 : vector<4x512xf32>
    %95 = arith.addf %0, %94 : vector<4x512xf32>
    %96 = vector.extract_strided_slice %95 {offsets = [0, 0], sizes = [1, 512], strides = [1, 1]} : vector<4x512xf32> to vector<1x512xf32>
    %97 = vector.broadcast %32 : vector<32x1xf32> to vector<32x512xf32>
    %98 = vector.broadcast %96 : vector<1x512xf32> to vector<32x512xf32>
    %99 = arith.mulf %97, %98 : vector<32x512xf32>
    %100 = vector.extract_strided_slice %95 {offsets = [1, 0], sizes = [1, 512], strides = [1, 1]} : vector<4x512xf32> to vector<1x512xf32>
    %101 = vector.broadcast %33 : vector<32x1xf32> to vector<32x512xf32>
    %102 = vector.broadcast %100 : vector<1x512xf32> to vector<32x512xf32>
    %103 = arith.mulf %101, %102 : vector<32x512xf32>
    %104 = arith.addf %99, %103 : vector<32x512xf32>
    %105 = vector.extract_strided_slice %95 {offsets = [2, 0], sizes = [1, 512], strides = [1, 1]} : vector<4x512xf32> to vector<1x512xf32>
    %106 = vector.broadcast %34 : vector<32x1xf32> to vector<32x512xf32>
    %107 = vector.broadcast %105 : vector<1x512xf32> to vector<32x512xf32>
    %108 = arith.mulf %106, %107 : vector<32x512xf32>
    %109 = arith.addf %104, %108 : vector<32x512xf32>
    %110 = vector.extract_strided_slice %95 {offsets = [3, 0], sizes = [1, 512], strides = [1, 1]} : vector<4x512xf32> to vector<1x512xf32>
    %111 = vector.broadcast %35 : vector<32x1xf32> to vector<32x512xf32>
    %112 = vector.broadcast %110 : vector<1x512xf32> to vector<32x512xf32>
    %113 = arith.mulf %111, %112 : vector<32x512xf32>
    %114 = arith.addf %109, %113 : vector<32x512xf32>
    %115 = vector.broadcast %4 : vector<32x1xf32> to vector<32x512xf32>
    %116 = arith.addf %114, %115 : vector<32x512xf32>
    %cst_28 = arith.constant 0.000000e+00 : f32
    %117 = vector.broadcast %cst_28 : f32 to vector<32x512xf32>
    %118 = arith.maximumf %116, %117 : vector<32x512xf32>
    %cst_29 = arith.constant dense<0.000000e+00> : vector<32x2xf32>
    %119 = tpu.matmul %118, %31, %cst_29 {dimension_numbers = #tpu.dot_dimension_numbers<[1], [0], [0], [1], [0, 0, 1, 1], [], []>} : vector<32x512xf32>, vector<512x2xf32>, vector<32x2xf32> -> vector<32x2xf32>
    %120 = tpu.transpose %119, [1, 0] : vector<32x2xf32> -> vector<2x32xf32>
    %cst_30 = arith.constant dense<0.000000e+00> : vector<2x2xf32>
    %121 = tpu.matmul %120, %5, %cst_30 {dimension_numbers = #tpu.dot_dimension_numbers<[1], [0], [0], [1], [0, 0, 1, 1], [], []>} : vector<2x32xf32>, vector<32x2xf32>, vector<2x2xf32> -> vector<2x2xf32>
    %122 = vector.broadcast %6 : vector<1x2xf32> to vector<2x2xf32>
    %123 = arith.addf %121, %122 : vector<2x2xf32>
    %cst_31 = arith.constant dense<0xFF800000> : vector<2xf32>
    %124 = vector.multi_reduction <maximumf>, %123, %cst_31 [1] : vector<2x2xf32> to vector<2xf32>
    %125 = vector.shape_cast %124 : vector<2xf32> to vector<2x1xf32>
    %126 = vector.broadcast %125 : vector<2x1xf32> to vector<2x2xf32>
    %127 = arith.subf %123, %126 : vector<2x2xf32>
    %128 = math.exp %127 : vector<2x2xf32>
    %cst_32 = arith.constant dense<0.000000e+00> : vector<2xf32>
    %129 = vector.multi_reduction <add>, %128, %cst_32 [1] : vector<2x2xf32> to vector<2xf32>
    %130 = vector.shape_cast %129 : vector<2xf32> to vector<2x1xf32>
    %131 = math.log %130 : vector<2x1xf32>
    %132 = vector.broadcast %131 : vector<2x1xf32> to vector<2x2xf32>
    %133 = arith.subf %127, %132 : vector<2x2xf32>
    %134 = math.exp %133 : vector<2x2xf32>
    %135 = arith.subf %134, %74 : vector<2x2xf32>
    %cst_33 = arith.constant 2.500000e-01 : f32
    %136 = vector.broadcast %cst_33 : f32 to vector<2x2xf32>
    %137 = arith.mulf %135, %136 : vector<2x2xf32>
    %138 = tpu.transpose %137, [1, 0] : vector<2x2xf32> -> vector<2x2xf32>
    %cst_34 = arith.constant dense<0.000000e+00> : vector<32x2xf32>
    %139 = tpu.matmul %5, %138, %cst_34 {dimension_numbers = #tpu.dot_dimension_numbers<[1], [0], [0], [1], [0, 0, 1, 1], [], []>} : vector<32x2xf32>, vector<2x2xf32>, vector<32x2xf32> -> vector<32x2xf32>
    %cst_35 = arith.constant 3.906250e-03 : f32
    %140 = vector.broadcast %cst_35 : f32 to vector<32x2xf32>
    %141 = arith.mulf %139, %140 : vector<32x2xf32>
    %142 = vector.extract_strided_slice %141 {offsets = [0, 0], sizes = [32, 1], strides = [1, 1]} : vector<32x2xf32> to vector<32x1xf32>
    %143 = vector.broadcast %18 : vector<1x512xf32> to vector<32x512xf32>
    %144 = vector.broadcast %142 : vector<32x1xf32> to vector<32x512xf32>
    %145 = arith.mulf %143, %144 : vector<32x512xf32>
    %146 = vector.extract_strided_slice %141 {offsets = [0, 1], sizes = [32, 1], strides = [1, 1]} : vector<32x2xf32> to vector<32x1xf32>
    %147 = vector.broadcast %19 : vector<1x512xf32> to vector<32x512xf32>
    %148 = vector.broadcast %146 : vector<32x1xf32> to vector<32x512xf32>
    %149 = arith.mulf %147, %148 : vector<32x512xf32>
    %150 = arith.addf %145, %149 : vector<32x512xf32>
    %cst_36 = arith.constant 0.000000e+00 : f32
    %151 = vector.broadcast %cst_36 : f32 to vector<32x512xf32>
    %152 = arith.cmpf ogt, %116, %151 : vector<32x512xf32>
    %cst_37 = arith.constant 0.000000e+00 : f32
    %153 = vector.broadcast %cst_37 : f32 to vector<32x512xf32>
    %154 = arith.select %152, %150, %153 : vector<32x512xi1>, vector<32x512xf32>
    %cst_38 = arith.constant dense<0.000000e+00> : vector<4x512xf32>
    %155 = tpu.matmul %3, %154, %cst_38 {dimension_numbers = #tpu.dot_dimension_numbers<[1], [0], [0], [1], [0, 0, 1, 1], [], []>} : vector<4x32xf32>, vector<32x512xf32>, vector<4x512xf32> -> vector<4x512xf32>
    %cst_39 = arith.constant 9.99999997E-7 : f32
    %156 = vector.broadcast %cst_39 : f32 to vector<4x512xf32>
    %157 = arith.mulf %156, %155 : vector<4x512xf32>
    %158 = arith.mulf %157, %157 : vector<4x512xf32>
    %cst_40 = arith.constant dense<0.000000e+00> : vector<512xf32>
    %159 = vector.multi_reduction <add>, %158, %cst_40 [0] : vector<4x512xf32> to vector<512xf32>
    %160 = vector.shape_cast %159 : vector<512xf32> to vector<1x512xf32>
    %161 = vector.broadcast %160 : vector<1x512xf32> to vector<2x512xf32>
    %162 = arith.mulf %17, %161 : vector<2x512xf32>
    %cst_41 = arith.constant dense<0.000000e+00> : vector<2xf32>
    %163 = vector.multi_reduction <add>, %162, %cst_41 [1] : vector<2x512xf32> to vector<2xf32>
    %164 = vector.shape_cast %163 : vector<2xf32> to vector<2x1xf32>
    %165 = math.sqrt %164 : vector<2x1xf32>
    %cst_42 = arith.constant 9.99999993E-9 : f32
    %166 = vector.broadcast %cst_42 : f32 to vector<2x1xf32>
    %167 = arith.addf %165, %166 : vector<2x1xf32>
    %cst_43 = arith.constant 1.000000e+00 : f32
    %168 = vector.broadcast %cst_43 : f32 to vector<2x1xf32>
    %169 = arith.divf %168, %167 : vector<2x1xf32>
    %170 = vector.broadcast %169 : vector<2x1xf32> to vector<2x512xf32>
    %171 = arith.mulf %17, %170 : vector<2x512xf32>
    %cst_44 = arith.constant dense<0.000000e+00> : vector<512xf32>
    %172 = vector.multi_reduction <add>, %171, %cst_44 [0] : vector<2x512xf32> to vector<512xf32>
    %173 = vector.shape_cast %172 : vector<512xf32> to vector<1x512xf32>
    %174 = vector.broadcast %173 : vector<1x512xf32> to vector<4x512xf32>
    %175 = arith.mulf %157, %174 : vector<4x512xf32>
    %cst_45 = arith.constant 1.000000e-01 : f32
    %176 = vector.broadcast %cst_45 : f32 to vector<4x512xf32>
    %177 = arith.mulf %176, %175 : vector<4x512xf32>
    %178 = arith.addf %0, %177 : vector<4x512xf32>
    %179 = vector.extract_strided_slice %178 {offsets = [0, 0], sizes = [1, 512], strides = [1, 1]} : vector<4x512xf32> to vector<1x512xf32>
    %180 = vector.broadcast %32 : vector<32x1xf32> to vector<32x512xf32>
    %181 = vector.broadcast %179 : vector<1x512xf32> to vector<32x512xf32>
    %182 = arith.mulf %180, %181 : vector<32x512xf32>
    %183 = vector.extract_strided_slice %178 {offsets = [1, 0], sizes = [1, 512], strides = [1, 1]} : vector<4x512xf32> to vector<1x512xf32>
    %184 = vector.broadcast %33 : vector<32x1xf32> to vector<32x512xf32>
    %185 = vector.broadcast %183 : vector<1x512xf32> to vector<32x512xf32>
    %186 = arith.mulf %184, %185 : vector<32x512xf32>
    %187 = arith.addf %182, %186 : vector<32x512xf32>
    %188 = vector.extract_strided_slice %178 {offsets = [2, 0], sizes = [1, 512], strides = [1, 1]} : vector<4x512xf32> to vector<1x512xf32>
    %189 = vector.broadcast %34 : vector<32x1xf32> to vector<32x512xf32>
    %190 = vector.broadcast %188 : vector<1x512xf32> to vector<32x512xf32>
    %191 = arith.mulf %189, %190 : vector<32x512xf32>
    %192 = arith.addf %187, %191 : vector<32x512xf32>
    %193 = vector.extract_strided_slice %178 {offsets = [3, 0], sizes = [1, 512], strides = [1, 1]} : vector<4x512xf32> to vector<1x512xf32>
    %194 = vector.broadcast %35 : vector<32x1xf32> to vector<32x512xf32>
    %195 = vector.broadcast %193 : vector<1x512xf32> to vector<32x512xf32>
    %196 = arith.mulf %194, %195 : vector<32x512xf32>
    %197 = arith.addf %192, %196 : vector<32x512xf32>
    %198 = vector.broadcast %4 : vector<32x1xf32> to vector<32x512xf32>
    %199 = arith.addf %197, %198 : vector<32x512xf32>
    %cst_46 = arith.constant 0.000000e+00 : f32
    %200 = vector.broadcast %cst_46 : f32 to vector<32x512xf32>
    %201 = arith.maximumf %199, %200 : vector<32x512xf32>
    %cst_47 = arith.constant dense<0.000000e+00> : vector<32x2xf32>
    %202 = tpu.matmul %201, %31, %cst_47 {dimension_numbers = #tpu.dot_dimension_numbers<[1], [0], [0], [1], [0, 0, 1, 1], [], []>} : vector<32x512xf32>, vector<512x2xf32>, vector<32x2xf32> -> vector<32x2xf32>
    %203 = tpu.transpose %202, [1, 0] : vector<32x2xf32> -> vector<2x32xf32>
    %cst_48 = arith.constant dense<0.000000e+00> : vector<2x2xf32>
    %204 = tpu.matmul %203, %5, %cst_48 {dimension_numbers = #tpu.dot_dimension_numbers<[1], [0], [0], [1], [0, 0, 1, 1], [], []>} : vector<2x32xf32>, vector<32x2xf32>, vector<2x2xf32> -> vector<2x2xf32>
    %205 = vector.broadcast %6 : vector<1x2xf32> to vector<2x2xf32>
    %206 = arith.addf %204, %205 : vector<2x2xf32>
    %cst_49 = arith.constant dense<0xFF800000> : vector<2xf32>
    %207 = vector.multi_reduction <maximumf>, %206, %cst_49 [1] : vector<2x2xf32> to vector<2xf32>
    %208 = vector.shape_cast %207 : vector<2xf32> to vector<2x1xf32>
    %209 = vector.broadcast %208 : vector<2x1xf32> to vector<2x2xf32>
    %210 = arith.subf %206, %209 : vector<2x2xf32>
    %211 = math.exp %210 : vector<2x2xf32>
    %cst_50 = arith.constant dense<0.000000e+00> : vector<2xf32>
    %212 = vector.multi_reduction <add>, %211, %cst_50 [1] : vector<2x2xf32> to vector<2xf32>
    %213 = vector.shape_cast %212 : vector<2xf32> to vector<2x1xf32>
    %214 = math.log %213 : vector<2x1xf32>
    %215 = vector.broadcast %214 : vector<2x1xf32> to vector<2x2xf32>
    %216 = arith.subf %210, %215 : vector<2x2xf32>
    %217 = arith.subf %73, %216 : vector<2x2xf32>
    %218 = arith.mulf %74, %217 : vector<2x2xf32>
    %cst_51 = arith.constant dense<0.000000e+00> : vector<2xf32>
    %219 = vector.multi_reduction <add>, %218, %cst_51 [1] : vector<2x2xf32> to vector<2xf32>
    %220 = vector.shape_cast %219 : vector<2xf32> to vector<2x1xf32>
    %cst_52 = arith.constant dense<0.000000e+00> : vector<1xf32>
    %221 = vector.multi_reduction <add>, %220, %cst_52 [0] : vector<2x1xf32> to vector<1xf32>
    %222 = vector.shape_cast %221 : vector<1xf32> to vector<1x1xf32>
    %cst_53 = arith.constant 2.500000e-01 : f32
    %223 = vector.broadcast %cst_53 : f32 to vector<1x1xf32>
    %224 = arith.mulf %222, %223 : vector<1x1xf32>
    %c0_54 = arith.constant 0 : index
    %c0_55 = arith.constant 0 : index
    %225 = vector.load %arg7[%c0_54, %c0_55] : memref<1x1xf32, #tpu.memory_space<vmem>>, vector<1x1xf32>
    tpu.vector_store %arg7[%c0_54, %c0_55], %224 {strides = array<i32>} : memref<1x1xf32, #tpu.memory_space<vmem>>, vector<1x1xf32>,
    return
  }
}

</mosaic_0001>

<bundles_post_ra>
// kernel: tpu_custom_call.1
= control target key start
LH: loop header
LB: loop body
LE: loop exit
PB: predicated region body
PF: predicated region fallthrough
CT: control target
= control target key end

     0   :  { %v3737_v1 = vmov 2   ;;  %v5595_v2 = vmov 0   ;;  %v45_v4 = vlaneseq  ;;  %s5532_s0 = inlined_call_operand.vmem [shape: f32[4,512], index: 0, kind: input, shape index: {}]   ;;  %s5533_s1 = inlined_call_operand.vmem [shape: f32[4,512], index: 1, kind: input, shape index: {}]   ;;  %s5534_s2 = inlined_call_operand.vmem [shape: f32[32,4], index: 2, kind: input, shape index: {}]   ;;  %s5535_s3 = inlined_call_operand.vmem [shape: f32[4,32], index: 3, kind: input, shape index: {}]   ;;  %s5536_s4 = inlined_call_operand.vmem [shape: f32[32,1], index: 4, kind: input, shape index: {}]   ;;  %s5537_s5 = inlined_call_operand.vmem [shape: f32[32,2], index: 5, kind: input, shape index: {}]   ;;  %s5538_s6 = inlined_call_operand.vmem [shape: f32[1,2], index: 6, kind: input, shape index: {}]   ;;  %s5539_s7 = inlined_call_operand.hbm [shape: f32[1,1], index: 7, kind: output, shape index: {}]  }
   0x1   :  { %v31_v0 = vld [vmem:[%s5534_s2] sm:$0xff]  ;;  %3664 = vset.pattern.permute.xlu1 %v3737_v1  ;;  %3662 = vset.pattern.permute.xlu0 %v5595_v2  ;;  %v3794_v3 = vld [vmem:[%s5534_s2 + $0x8] sm:$0xff] }
   0x2   :  { %554 = vperm.xlu1 %3664, %v31_v0   ;;  %397 = vperm.xlu0 %3662, %v31_v0  }
   0x3   :  { %12 = vsyncpa [#allocation3], 0  ;;  %v5597_v5 = vmov 1   ;;  %v33_v6 = vld [vmem:[%s5534_s2 + $0x10] sm:$0xff]  ;;  %v3802_v7 = vand.u32 127, %v45_v4  ;;  %v3804_v8 = vshrl.u32 %v45_v4, 7 }
   0x4   :  { %v5759_v16 = vmov 0  ;;  %v3740_v18 = vmov 3   ;;  %v5601_v19 = vmov 0.00390625|0.00390625   ;;  %v5762_v21 = vmov 0  ;;  %v3876_v27 = vld [vmem:[%s5534_s2 + $0x18] sm:$0xff] }
   0x5   :  { %v3807_v9 = vmul.u32 256, %v3802_v7  ;;  %v89_v10 = vadd.s32 128, %v3804_v8  ;;  %v90_v11 = vadd.s32 136, %v3804_v8  ;;  %v121_v13 = vadd.s32 384, %v3804_v8  ;;  %v36_v30 = vld [vmem:[%s5536_s4] sm:$0xff]  ;;  %v39_v32 = vld [vmem:[%s5536_s4 + $0x18] sm:$0xff] }
   0x6   :  { %3665 = vset.pattern.permute.xlu1 %v5595_v2  ;;  %3663 = vset.pattern.permute.xlu0 %v5597_v5  ;;  %v122_v14 = vadd.s32 392, %v3804_v8  ;;  %v74_v15 = vadd.s32 8, %v3804_v8  ;;  %v105_v17 = vadd.s32 256, %v3804_v8  ;;  %v106_v20 = vadd.s32 264, %v3804_v8  ;;  %v29_v38 = vld [vmem:[%s5533_s1] sm:$0xff]  ;;  %v30_v44 = vld [vmem:[%s5533_s1 + $0x8] sm:$0xff] }
   0x7   :  { %402 = vperm.xlu1 %3665, %v3794_v3   ;;  %470 = vperm.xlu0 %3663, %v31_v0   ;;  %vm154_vm0 = vcmp.ge.s32.totalorder %v89_v10, %v3807_v9  ;;  %v3815_v12 = vadd.s32 256, %v3807_v9  ;;  %vm155_vm1 = vcmp.ge.s32.totalorder %v90_v11, %v3807_v9  ;;  %vm186_vm5 = vcmp.ge.s32.totalorder %v121_v13, %v3807_v9  ;;  %v37_v50 = vld [vmem:[%s5536_s4 + $0x8] sm:$0xff] }
   0x8   :  { %vm187_vm7 = vcmp.ge.s32.totalorder %v122_v14, %v3807_v9  ;;  %vm138_vm12 = vcmp.ge.s32.totalorder %v3804_v8, %v3807_v9  ;;  %vm139_vm14 = vcmp.ge.s32.totalorder %v74_v15, %v3807_v9  ;;  %v91_v22 = vadd.s32 144, %v3804_v8 }
   0x9   :  { %vm219_vm2 = vcmp.lt.s32.totalorder %v89_v10, %v3815_v12  ;;  %vm220_vm3 = vcmp.lt.s32.totalorder %v90_v11, %v3815_v12  ;;  %vm251_vm8 = vcmp.lt.s32.totalorder %v121_v13, %v3815_v12  ;;  %vm252_vm10 = vcmp.lt.s32.totalorder %v122_v14, %v3815_v12 }
   0xa   :  { %vm283_vm4 = vmand %vm154_vm0, %vm219_vm2  ;;  %vm203_vm15 = vcmp.lt.s32.totalorder %v3804_v8, %v3815_v12  ;;  %vm204_vm0 = vcmp.lt.s32.totalorder %v74_v15, %v3815_v12  ;;  %v92_v23 = vadd.s32 152, %v3804_v8  ;;  %v5765_v24 = vmov 0 }
   0xb   :  { %3666 = vset.pattern.permute.xlu1 %v5597_v5  ;;  %478 = vperm.xlu0 %3663, %v33_v6   ;;  %vm284_vm6 = vmand %vm155_vm1, %vm220_vm3  ;;  %vm170_vm3 = vcmp.ge.s32.totalorder %v105_v17, %v3807_v9  ;;  %v123_v25 = vadd.s32 400, %v3804_v8  ;;  %v124_v26 = vadd.s32 408, %v3804_v8  ;;  %v5768_v28 = vmov 0 }
   0xc   :  { %474 = vperm.xlu1 %3666, %v3794_v3   ;;  %vm3829_vm9 = vmpackc.low %vm284_vm6, %vm283_vm4  ;;  %vm235_vm4 = vcmp.lt.s32.totalorder %v105_v17, %v3815_v12  ;;  %vm171_vm6 = vcmp.ge.s32.totalorder %v106_v20, %v3807_v9  ;;  %v75_v29 = vadd.s32 16, %v3804_v8  ;;  %v76_v31 = vadd.s32 24, %v3804_v8 }
   0xd   :  { %v5760_v16 = vsel %vm3829_vm9, 4294967295, %v5759_v16  ;;  %3420 = vmatprep.subr.msk.bf16.mxu0 %vm3829_vm9, %v5601_v19  ;;  %vm315_vm11 = vmand %vm186_vm5, %vm251_vm8  ;;  %v5771_v33 = vmov 0  ;;  %v107_v34 = vadd.s32 272, %v3804_v8  ;;  %v108_v35 = vadd.s32 280, %v3804_v8 }
   0xe   :  { %5761 = vst [vmem:[#allocation5_spill] sm:$0xff] %v5760_v16  ;;  %vm316_vm13 = vmand %vm187_vm7, %vm252_vm10  ;;  %vm236_vm7 = vcmp.lt.s32.totalorder %v106_v20, %v3815_v12  ;;  %v5774_v36 = vmov 0  ;;  %v93_v37 = vadd.s32 160, %v3804_v8  ;;  %v94_v39 = vadd.s32 168, %v3804_v8 }
   0xf   :  { %3671 = vset.pattern.permute.xlu0 %v3737_v1  ;;  %vm3846_vm1 = vmpackc.low %vm316_vm13, %vm315_vm11  ;;  %vm156_vm11 = vcmp.ge.s32.totalorder %v91_v22, %v3807_v9  ;;  %v5777_v40 = vmov 0  ;;  %v125_v41 = vadd.s32 416, %v3804_v8  ;;  %v1070_v42 = vmul.f32 %v29_v38, %v29_v38 }
  0x10   :  { %3667 = vset.pattern.permute.xlu1 %v3737_v1  ;;  %562 = vperm.xlu0 %3671, %v33_v6   ;;  %v5763_v21 = vsel %vm3846_vm1, 4294967295, %v5762_v21  ;;  %vm267_vm2 = vmand %vm138_vm12, %vm203_vm15  ;;  %vm221_vm12 = vcmp.lt.s32.totalorder %v91_v22, %v3815_v12  ;;  %vm222_vm15 = vcmp.lt.s32.totalorder %v92_v23, %v3815_v12  ;;  %v126_v43 = vadd.s32 424, %v3804_v8 }
  0x11   :  { %558 = vperm.xlu1 %3667, %v3794_v3   ;;  %5764 = vst [vmem:[#allocation6_spill] sm:$0xff] %v5763_v21  ;;  %3452 = vmatprep.subr.msk.bf16.mxu1 %vm3846_vm1, %v5601_v19  ;;  %vm268_vm5 = vmand %vm139_vm14, %vm204_vm0  ;;  %vm157_vm14 = vcmp.ge.s32.totalorder %v92_v23, %v3807_v9  ;;  %v5780_v45 = vmov 0  ;;  %v77_v46 = vadd.s32 32, %v3804_v8  ;;  %v78_v47 = vadd.s32 40, %v3804_v8 }
  0x12   :  { %vm3859_vm8 = vmpackc.low %vm268_vm5, %vm267_vm2  ;;  %v1071_v48 = vmul.f32 %v30_v44, %v30_v44  ;;  %v1074_v49 = vcombine.high %v1070_v42, %v1070_v42  ;;  %vm256_vm1 = vcmp.lt.s32.totalorder %v126_v43, %v3815_v12  ;;  %v5783_v51 = vmov 0 }
  0x13   :  { %v5766_v24 = vsel %vm3859_vm8, 4294967295, %v5765_v24  ;;  %3422 = vmatpush3.bf16.msk.msra.mxu0 %vm3859_vm8, %v5601_v19  ;;  %vm299_vm10 = vmand %vm170_vm3, %vm235_vm4  ;;  %vm188_vm3 = vcmp.ge.s32.totalorder %v123_v25, %v3807_v9  ;;  %vm253_vm4 = vcmp.lt.s32.totalorder %v123_v25, %v3815_v12  ;;  %v109_v52 = vadd.s32 288, %v3804_v8 }
  0x14   :  { %3672 = vset.pattern.permute.xlu0 %v3740_v18  ;;  %5767 = vst [vmem:[#allocation7_spill] sm:$0xff] %v5766_v24  ;;  %vm300_vm13 = vmand %vm171_vm6, %vm236_vm7  ;;  %vm189_vm6 = vcmp.ge.s32.totalorder %v124_v26, %v3807_v9  ;;  %vm254_vm7 = vcmp.lt.s32.totalorder %v124_v26, %v3815_v12  ;;  %v110_v54 = vadd.s32 296, %v3804_v8  ;;  %v3980_v55 = vmul.u32 256, %v3804_v8 }
  0x15   :  { %3668 = vset.pattern.permute.xlu1 %v5595_v2  ;;  %638 = vperm.xlu0 %3672, %v31_v0   ;;  %vm3878_vm0 = vmpackc.low %vm300_vm13, %vm299_vm10  ;;  %vm205_vm13 = vcmp.lt.s32.totalorder %v75_v29, %v3815_v12  ;;  %v1075_v56 = vcombine.high %v1071_v48, %v1071_v48  ;;  %v5787_v58 = vmov 0  ;;  %v95_v59 = vadd.s32 176, %v3804_v8 }
  0x16   :  { %407 = vperm.xlu1 %3668, %v33_v6   ;;  %v5769_v28 = vsel %vm3878_vm0, 4294967295, %v5768_v28  ;;  %3454 = vmatpush3.bf16.msk.msra.mxu1 %vm3878_vm0, %v5601_v19  ;;  %vm285_vm2 = vmand %vm156_vm11, %vm221_vm12  ;;  %vm140_vm12 = vcmp.ge.s32.totalorder %v75_v29, %v3807_v9  ;;  %v96_v61 = vadd.s32 184, %v3804_v8  ;;  %v47_v62 = vadd.s32 128, %v3802_v7 }
  0x17   :  { %5770 = vst [vmem:[#allocation8_spill] sm:$0xff] %v5769_v28  ;;  %vm286_vm5 = vmand %vm157_vm14, %vm222_vm15  ;;  %vm141_vm15 = vcmp.ge.s32.totalorder %v76_v31, %v3807_v9  ;;  %v127_v4 = vadd.s32 432, %v3804_v8  ;;  %v128_v10 = vadd.s32 440, %v3804_v8  ;;  %v5795_v15 = vmov 0 }
  0x18   :  { %vm3899_vm10 = vmpackc.low %vm286_vm5, %vm285_vm2  ;;  %vm206_vm2 = vcmp.lt.s32.totalorder %v76_v31, %v3815_v12  ;;  %v79_v17 = vadd.s32 48, %v3804_v8  ;;  %v80_v22 = vadd.s32 56, %v3804_v8  ;;  %v5798_v26 = vmov 0 }
  0x19   :  { %646 = vperm.xlu0 %3672, %v33_v6   ;;  %v5772_v33 = vsel %vm3899_vm10, 4294967295, %v5771_v33  ;;  %3424 = vmatprep.subr.msk.bf16.mxu0 %vm3899_vm10, %v5601_v19  ;;  %vm317_vm11 = vmand %vm188_vm3, %vm253_vm4  ;;  %vm172_vm4 = vcmp.ge.s32.totalorder %v107_v34, %v3807_v9  ;;  %v4007_v6 = vadd.s32 256, %v3980_v55 }
  0x1a   :  { %3669 = vset.pattern.permute.xlu1 %v3740_v18  ;;  %5773 = vst [vmem:[#allocation9_spill] sm:$0xff] %v5772_v33  ;;  %vm318_vm14 = vmand %vm189_vm6, %vm254_vm7  ;;  %vm237_vm6 = vcmp.lt.s32.totalorder %v107_v34, %v3815_v12  ;;  %v38_v18 = vld [vmem:[%s5536_s4 + $0x10] sm:$0xff] }
  0x1b   :  { %642 = vperm.xlu1 %3669, %v3794_v3   ;;  %vm3913_vm5 = vmpackc.low %vm318_vm14, %vm317_vm11  ;;  %vm173_vm11 = vcmp.ge.s32.totalorder %v108_v35, %v3807_v9  ;;  %vm238_vm14 = vcmp.lt.s32.totalorder %v108_v35, %v3815_v12  ;;  %v5791_v3 = vmov 0  ;;  %v5806_v35 = vmov 0 }
  0x1c   :  { %v5775_v36 = vsel %vm3913_vm5, 4294967295, %v5774_v36  ;;  %3456 = vmatprep.subr.msk.bf16.mxu1 %vm3913_vm5, %v5601_v19  ;;  %vm269_vm3 = vmand %vm140_vm12, %vm205_vm13  ;;  %vm158_vm13 = vcmp.ge.s32.totalorder %v93_v37, %v3807_v9 }
  0x1d   :  { %650 = vperm.xlu0 %3672, %v3876_v27   ;;  %5776 = vst [vmem:[#allocation10_spill] sm:$0xff] %v5775_v36  ;;  %vm270_vm7 = vmand %vm141_vm15, %vm206_vm2  ;;  %vm223_vm15 = vcmp.lt.s32.totalorder %v93_v37, %v3815_v12  ;;  %v97_v37 = vadd.s32 192, %v3804_v8 }
  0x1e   :  { %vm3930_vm0 = vmpackc.low %vm270_vm7, %vm269_vm3  ;;  %vm159_vm3 = vcmp.ge.s32.totalorder %v94_v39, %v3807_v9  ;;  %vm224_vm7 = vcmp.lt.s32.totalorder %v94_v39, %v3815_v12 }
  0x1f   :  { %3670 = vset.pattern.permute.xlu1 %v5595_v2  ;;  %v5778_v40 = vsel %vm3930_vm0, 4294967295, %v5777_v40  ;;  %3426 = vmatpush3.bf16.msk.msra.mxu0 %vm3930_vm0, %v5601_v19  ;;  %vm301_vm12 = vmand %vm172_vm4, %vm237_vm6 }
  0x20   :  { %723 = vperm.xlu1 %3670, %v36_v30   ;;  %5779 = vst [vmem:[#allocation11_spill] sm:$0xff] %v5778_v40  ;;  %vm302_vm2 = vmand %vm173_vm11, %vm238_vm14  ;;  %vm190_vm11 = vcmp.ge.s32.totalorder %v125_v41, %v3807_v9  ;;  %vm255_vm14 = vcmp.lt.s32.totalorder %v125_v41, %v3815_v12  ;;  %v112_v30 = vadd.s32 312, %v3804_v8  ;;  %v98_v41 = vadd.s32 200, %v3804_v8 }
  0x21   :  { %3677 = vset.pattern.permute.xlu0 %v5595_v2  ;;  %vm3947_vm5 = vmpackc.low %vm302_vm2, %vm301_vm12  ;;  %vm191_vm2 = vcmp.ge.s32.totalorder %v126_v43, %v3807_v9 }
  0x22   :  { %738 = vperm.xlu0 %3677, %v39_v32   ;;  %v5781_v45 = vsel %vm3947_vm5, 4294967295, %v5780_v45  ;;  %3458 = vmatpush3.bf16.msk.msra.mxu1 %vm3947_vm5, %v5601_v19  ;;  %vm287_vm6 = vmand %vm158_vm13, %vm223_vm15  ;;  %vm5786_vm13 = vcmask 1043456   ;;  %vm208_vm5 = vcmp.lt.s32.totalorder %v78_v47, %v3815_v12  ;;  %vm163_vm8 = vcmp.ge.s32.totalorder %v98_v41, %v3807_v9 }
  0x23   :  { %5782 = vst [vmem:[#allocation12_spill] sm:$0xff] %v5781_v45  ;;  %vm288_vm12 = vmand %vm159_vm3, %vm224_vm7  ;;  %v1079_v53 = vsel %vm5786_vm13, %v1070_v42, 0.0  ;;  %vm142_vm3 = vcmp.ge.s32.totalorder %v77_v46, %v3807_v9  ;;  %vm207_vm7 = vcmp.lt.s32.totalorder %v77_v46, %v3815_v12  ;;  %v1086_v57 = vsel %vm5786_vm13, %v1074_v49, 0.0 }
  0x24   :  { %412 = vperm.xlu1 %3670, %v3876_v27   ;;  %vm3964_vm4 = vmpackc.low %vm288_vm12, %vm287_vm6  ;;  %vm143_vm12 = vcmp.ge.s32.totalorder %v78_v47, %v3807_v9  ;;  %v1080_v60 = vrot.slane %v1079_v53, 4  ;;  %vm240_vm13 = vcmp.lt.s32.totalorder %v110_v54, %v3815_v12  ;;  %v1087_v63 = vrot.slane %v1086_v57, 4 }
  0x25   :  { %v5784_v51 = vsel %vm3964_vm4, 4294967295, %v5783_v51  ;;  %3428 = vmatprep.subr.msk.bf16.mxu0 %vm3964_vm4, %v5601_v19  ;;  %vm319_vm15 = vmand %vm190_vm11, %vm255_vm14  ;;  %vm174_vm14 = vcmp.ge.s32.totalorder %v109_v52, %v3807_v9  ;;  %vm5790_vm4 = vcmask 1043456   ;;  %v49_v42 = vadd.s32 384, %v3802_v7 }
  0x26   :  { %5785 = vst [vmem:[#allocation13_spill] sm:$0xff] %v5784_v51  ;;  %vm320_vm6 = vmand %vm191_vm2, %vm256_vm1  ;;  %vm239_vm2 = vcmp.lt.s32.totalorder %v109_v52, %v3815_v12  ;;  %v1093_v0 = vsel %vm5790_vm4, %v1071_v48, 0.0  ;;  %vm225_vm4 = vcmp.lt.s32.totalorder %v95_v59, %v3815_v12  ;;  %v1081_v11 = vadd.f32 %v1080_v60, %v1079_v53 }
  0x27   :  { %vm3983_vm11 = vmpackc.low %vm320_vm6, %vm319_vm15  ;;  %vm175_vm6 = vcmp.ge.s32.totalorder %v110_v54, %v3807_v9  ;;  %v1094_v14 = vrot.slane %v1093_v0, 4  ;;  %v1088_v20 = vadd.f32 %v1087_v63, %v1086_v57  ;;  %v5816_v46 = vmov 0 }
  0x28   :  { %3673 = vset.pattern.permute.xlu1 %v5597_v5  ;;  %v5788_v58 = vsel %vm3983_vm11, 4294967295, %v5787_v58  ;;  %3460 = vmatprep.subr.msk.bf16.mxu1 %vm3983_vm11, %v5601_v19  ;;  %vm271_vm1 = vmand %vm142_vm3, %vm207_vm7  ;;  %vm160_vm3 = vcmp.ge.s32.totalorder %v95_v59, %v3807_v9  ;;  %vm5794_vm7 = vcmask 1043456   ;;  %v1082_v25 = vrot.slane %v1081_v11, 2 }
  0x29   :  { %482 = vperm.xlu1 %3673, %v3876_v27   ;;  %5789 = vst [vmem:[#allocation14_spill] sm:$0xff] %v5788_v58  ;;  %vm272_vm15 = vmand %vm143_vm12, %vm208_vm5  ;;  %v1100_v13 = vsel %vm5794_vm7, %v1075_v56, 0.0  ;;  %v1095_v29 = vadd.f32 %v1094_v14, %v1093_v0  ;;  %v1089_v31 = vrot.slane %v1088_v20, 2  ;;  %vm5803_vm7 = vcmp.ge.s32.totalorder %v3802_v7, %v3980_v55 }
  0x2a   :  { %vm4000_vm11 = vmpackc.low %vm272_vm15, %vm271_vm1  ;;  %vm161_vm1 = vcmp.ge.s32.totalorder %v96_v61, %v3807_v9  ;;  %v1101_v23 = vrot.slane %v1100_v13, 4  ;;  %v1083_v39 = vadd.f32 %v1082_v25, %v1081_v11  ;;  %v129_v47 = vadd.s32 448, %v3804_v8 }
  0x2b   :  { %v5792_v3 = vsel %vm4000_vm11, 4294967295, %v5791_v3  ;;  %3430 = vmatpush3.bf16.msk.msra.mxu0 %vm4000_vm11, %v5601_v19  ;;  %vm303_vm5 = vmand %vm174_vm14, %vm239_vm2  ;;  %vm226_vm14 = vcmp.lt.s32.totalorder %v96_v61, %v3815_v12  ;;  %vm193_vm2 = vcmp.ge.s32.totalorder %v128_v10, %v3807_v9  ;;  %v1096_v43 = vrot.slane %v1095_v29, 2 }
  0x2c   :  { %5793 = vst [vmem:[#allocation15_spill] sm:$0xff] %v5792_v3  ;;  %vm304_vm12 = vmand %vm175_vm6, %vm240_vm13  ;;  %v1102_v34 = vadd.f32 %v1101_v23, %v1100_v13  ;;  %vm242_vm11 = vcmp.lt.s32.totalorder %v112_v30, %v3815_v12  ;;  %v1090_v44 = vadd.f32 %v1089_v31, %v1088_v20  ;;  %v130_v48 = vadd.s32 456, %v3804_v8 }
  0x2d   :  { %3674 = vset.pattern.permute.xlu1 %v5595_v2  ;;  %vm4026_vm15 = vmpackc.low %vm304_vm12, %vm303_vm5  ;;  %vm257_vm5 = vcmp.lt.s32.totalorder %v127_v4, %v3815_v12  ;;  %v1084_v49 = vrot.slane %v1083_v39, 1  ;;  %vm61_vm9 = vcmp.lt.s32.totalorder %v49_v42, %v4007_v6  ;;  %v1097_v52 = vadd.f32 %v1096_v43, %v1095_v29 }
  0x2e   :  { %728 = vperm.xlu1 %3674, %v37_v50   ;;  %v5796_v15 = vsel %vm4026_vm15, 4294967295, %v5795_v15  ;;  %3462 = vmatpush3.bf16.msk.msra.mxu1 %vm4026_vm15, %v5601_v19  ;;  %vm289_vm6 = vmand %vm160_vm3, %vm225_vm4  ;;  %vm258_vm15 = vcmp.lt.s32.totalorder %v128_v10, %v3815_v12  ;;  %vm210_vm3 = vcmp.lt.s32.totalorder %v80_v22, %v3815_v12  ;;  %v1103_v50 = vrot.slane %v1102_v34, 2 }
  0x2f   :  { %5797 = vst [vmem:[#allocation16_spill] sm:$0xff] %v5796_v15  ;;  %vm290_vm12 = vmand %vm161_vm1, %vm226_vm14  ;;  %vm5801_vm1 = vcmp.ge.s32.totalorder %v127_v4, %v3807_v9  ;;  %v5823_v53 = vmov 0  ;;  %v81_v54 = vadd.s32 64, %v3804_v8  ;;  %v1091_v56 = vrot.slane %v1090_v44, 1 }
  0x30   :  { %vm4055_vm13 = vmpackc.low %vm290_vm12, %vm289_vm6  ;;  %v1085_v59 = vadd.f32 %v1084_v49, %v1083_v39  ;;  %v1104_v60 = vadd.f32 %v1103_v50, %v1102_v34  ;;  %v5828_v61 = vmov 0  ;;  %v1098_v63 = vrot.slane %v1097_v52, 1 }
  0x31   :  { %v5799_v26 = vsel %vm4055_vm13, 4294967295, %v5798_v26  ;;  %3432 = vmatprep.subr.msk.bf16.mxu0 %vm4055_vm13, %v5601_v19  ;;  %vm321_vm14 = vmand %vm5801_vm1, %vm257_vm5  ;;  %vm5802_vm1 = vcmp.lt.s32.totalorder %v3802_v7, %v4007_v6  ;;  %vm5810_vm13 = vcmp.ge.s32.totalorder %v47_v62, %v3980_v55  ;;  %v114_v0 = vadd.s32 328, %v3804_v8 }
  0x32   :  { %3675 = vset.pattern.permute.xlu1 %v3737_v1  ;;  %v48_v1 = vadd.s32 256, %v3802_v7  ;;  %5800 = vst [vmem:[#allocation17_spill] sm:$0xff] %v5799_v26  ;;  %vm322_vm12 = vmand %vm193_vm2, %vm258_vm15  ;;  %vm5809_vm15 = vcmp.lt.s32.totalorder %v47_v62, %v4007_v6  ;;  %v5821_v7 = vmov 0  ;;  %v113_v62 = vadd.s32 320, %v3804_v8 }
  0x33   :  { %566 = vperm.xlu1 %3675, %v3876_v27   ;;  %v111_v27 = vadd.s32 304, %v3804_v8  ;;  %vm4084_vm6 = vmand %vm5803_vm7, %vm5802_vm1  ;;  %vm5813_vm7 = vcmp.lt.s32.totalorder %v79_v17, %v3815_v12  ;;  %v5599_v4 = vmov 0.0   ;;  %v1092_v10 = vadd.f32 %v1091_v56, %v1090_v44 }
  0x34   :  { %vm4088_vm2 = vmpackc.low %vm322_vm12, %vm321_vm14  ;;  %vm5814_vm14 = vcmp.ge.s32.totalorder %v79_v17, %v3807_v9  ;;  %vm5820_vm0 = vcmp.ge.s32.totalorder %v48_v1, %v3980_v55  ;;  %v5833_v13 = vmov 0  ;;  %v1105_v14 = vrot.slane %v1104_v60, 1 }
  0x35   :  { %v5807_v35 = vsel %vm4088_vm2, 4294967295, %v5806_v35  ;;  %vm4097_vm5 = vmand %vm5810_vm13, %vm5809_vm15  ;;  %3464 = vmatprep.subr.msk.bf16.mxu1 %vm4088_vm2, %v5601_v19  ;;  %vm176_vm1 = vcmp.ge.s32.totalorder %v111_v27, %v3807_v9  ;;  %vm241_vm4 = vcmp.lt.s32.totalorder %v111_v27, %v3815_v12  ;;  %vm5815_vm13 = vcmp.ge.s32.totalorder %v80_v22, %v3807_v9 }
  0x36   :  { %5808 = vst [vmem:[#allocation18_spill] sm:$0xff] %v5807_v35  ;;  %vm273_vm12 = vmand %vm5814_vm14, %vm5813_vm7  ;;  %vm177_vm2 = vcmp.ge.s32.totalorder %v112_v30, %v3807_v9  ;;  %vm5819_vm14 = vcmp.lt.s32.totalorder %v48_v1, %v4007_v6  ;;  %v4174_v6 = vsel %vm4084_vm6, 1.0, %v5599_v4  ;;  %v4185_v11 = vsel %vm4097_vm5, 1.0, %v5599_v4 }
  0x37   :  { %3676 = vset.pattern.permute.xlu1 %v5595_v2  ;;  %vm274_vm15 = vmand %vm5815_vm13, %vm210_vm3  ;;  %vm227_vm13 = vcmp.lt.s32.totalorder %v97_v37, %v3815_v12  ;;  %5831 = vst [vmem:[#allocation22_spill] sm:$0xff] %v4174_v6  ;;  %v99_v1 = vadd.s32 208, %v3804_v8  ;;  %v100_v17 = vadd.s32 216, %v3804_v8  ;;  %v1107_v20 = vmul.f32 %v4174_v6, %v1085_v59 }
  0x38   :  { %733 = vperm.xlu1 %3676, %v38_v18   ;;  %vm4118_vm7 = vmpackc.low %vm274_vm15, %vm273_vm12  ;;  %vm162_vm12 = vcmp.ge.s32.totalorder %v97_v37, %v3807_v9  ;;  %5832 = vst [vmem:[#allocation23_spill] sm:$0xff] %v4185_v11  ;;  %v1099_v18 = vadd.f32 %v1098_v63, %v1097_v52  ;;  %v1108_v23 = vmul.f32 %v4185_v11, %v1092_v10  ;;  %v5838_v25 = vmov 0 }
  0x39   :  { %v5817_v46 = vsel %vm4118_vm7, 4294967295, %v5816_v46  ;;  %vm4127_vm10 = vmand %vm5820_vm0, %vm5819_vm14  ;;  %3434 = vmatpush3.bf16.msk.msra.mxu0 %vm4118_vm7, %v5601_v19  ;;  %vm228_vm0 = vcmp.lt.s32.totalorder %v98_v41, %v3815_v12  ;;  %vm56_vm14 = vcmp.ge.s32.totalorder %v49_v42, %v3980_v55  ;;  %v82_v55 = vadd.s32 72, %v3804_v8 }
  0x3a   :  { %5818 = vst [vmem:[#allocation19_spill] sm:$0xff] %v5817_v46  ;;  %v5822_v7 = vsel %vm4127_vm10, 4294967295, %v5821_v7  ;;  %vm305_vm3 = vmand %vm176_vm1, %vm241_vm4  ;;  %vm194_vm4 = vcmp.ge.s32.totalorder %v129_v47, %v3807_v9  ;;  %v131_v27 = vadd.s32 464, %v3804_v8  ;;  %v132_v29 = vadd.s32 472, %v3804_v8 }
  0x3b   :  { %vm306_vm15 = vmand %vm177_vm2, %vm242_vm11  ;;  %vm259_vm2 = vcmp.lt.s32.totalorder %v129_v47, %v3815_v12  ;;  %v1106_v30 = vadd.f32 %v1105_v14, %v1104_v60  ;;  %v5841_v34 = vmov 0  ;;  %v83_v37 = vadd.s32 80, %v3804_v8 }
  0x3c   :  { %vm4141_vm7 = vmpackc.low %vm306_vm15, %vm305_vm3  ;;  %vm195_vm3 = vcmp.ge.s32.totalorder %v130_v48, %v3807_v9  ;;  %vm260_vm15 = vcmp.lt.s32.totalorder %v130_v48, %v3815_v12  ;;  %v84_v39 = vadd.s32 88, %v3804_v8  ;;  %v5845_v42 = vmov 0 }
  0x3d   :  { %v5824_v53 = vsel %vm4141_vm7, 4294967295, %v5823_v53  ;;  %3466 = vmatpush3.bf16.msk.msra.mxu1 %vm4141_vm7, %v5601_v19  ;;  %vm291_vm11 = vmand %vm162_vm12, %vm227_vm13  ;;  %vm146_vm12 = vcmp.ge.s32.totalorder %v81_v54, %v3807_v9  ;;  %v115_v43 = vadd.s32 336, %v3804_v8  ;;  %v116_v47 = vadd.s32 344, %v3804_v8 }
  0x3e   :  { %5825 = vst [vmem:[#allocation20_spill] sm:$0xff] %v5824_v53  ;;  %vm292_vm1 = vmand %vm163_vm8, %vm228_vm0  ;;  %vm147_vm0 = vcmp.ge.s32.totalorder %v82_v55, %v3807_v9  ;;  %v5849_v49 = vmov 0  ;;  %v101_v50 = vadd.s32 224, %v3804_v8  ;;  %v102_v52 = vadd.s32 232, %v3804_v8 }
  0x3f   :  { %vm4156_vm10 = vmand %vm56_vm14, %vm61_vm9  ;;  %vm211_vm9 = vcmp.lt.s32.totalorder %v81_v54, %v3815_v12  ;;  %vm212_vm14 = vcmp.lt.s32.totalorder %v82_v55, %v3815_v12  ;;  %v5853_v55 = vmov 0  ;;  %v133_v57 = vadd.s32 480, %v3804_v8 }
  0x40   :  { %vm4160_vm7 = vmpackc.low %vm292_vm1, %vm291_vm11  ;;  %vm179_vm1 = vcmp.ge.s32.totalorder %v114_v0, %v3807_v9  ;;  %v4237_v41 = vsel %vm4156_vm10, 1.0, %v5599_v4  ;;  %vm148_vm10 = vcmp.ge.s32.totalorder %v83_v37, %v3807_v9  ;;  %v134_v59 = vadd.s32 488, %v3804_v8 }
  0x41   :  { %v5829_v61 = vsel %vm4160_vm7, 4294967295, %v5828_v61  ;;  %3436 = vmatprep.subr.msk.bf16.mxu0 %vm4160_vm7, %v5601_v19  ;;  %vm323_vm8 = vmand %vm194_vm4, %vm259_vm2  ;;  %vm178_vm4 = vcmp.ge.s32.totalorder %v113_v62, %v3807_v9  ;;  %vm243_vm2 = vcmp.lt.s32.totalorder %v113_v62, %v3815_v12  ;;  %5844 = vst [vmem:[#allocation28_spill] sm:$0xff] %v4237_v41  ;;  %v5856_v62 = vmov 0 }
  0x42   :  { %5830 = vst [vmem:[#allocation21_spill] sm:$0xff] %v5829_v61  ;;  %vm324_vm13 = vmand %vm195_vm3, %vm260_vm15  ;;  %vm244_vm3 = vcmp.lt.s32.totalorder %v114_v0, %v3815_v12  ;;  %vm5836_vm15 = vnez %v5822_v7  ;;  %v1110_v7 = vmul.f32 %v4237_v41, %v1106_v30  ;;  %v85_v63 = vadd.s32 96, %v3804_v8 }
  0x43   :  { %vm4187_vm11 = vmpackc.low %vm324_vm13, %vm323_vm8  ;;  %v4204_v22 = vsel %vm5836_vm15, 1.0, %v5599_v4  ;;  %vm5572_vm8 = vcmask 1041408   ;;  %vm164_vm13 = vcmp.ge.s32.totalorder %v99_v1, %v3807_v9  ;;  %vm165_vm15 = vcmp.ge.s32.totalorder %v100_v17, %v3807_v9 }
  0x44   :  { %v5834_v13 = vsel %vm4187_vm11, 4294967295, %v5833_v13  ;;  %3468 = vmatprep.subr.msk.bf16.mxu1 %vm4187_vm11, %v5601_v19  ;;  %vm275_vm6 = vmand %vm146_vm12, %vm211_vm9  ;;  %5837 = vst [vmem:[#allocation25_spill] sm:$0xff] %v4204_v22  ;;  %v1109_v31 = vmul.f32 %v4204_v22, %v1099_v18  ;;  %v1112_v32 = vsel %vm5572_vm8, %v1107_v20, 0.0  ;;  %v1113_v38 = vsel %vm5572_vm8, %v1108_v23, 0.0 }
  0x45   :  { %5835 = vst [vmem:[#allocation24_spill] sm:$0xff] %v5834_v13  ;;  %vm276_vm5 = vmand %vm147_vm0, %vm212_vm14  ;;  %vm229_vm0 = vcmp.lt.s32.totalorder %v99_v1, %v3815_v12  ;;  %v1114_v44 = vadd.f32 %v1113_v38, %v1112_v32  ;;  %v86_v0 = vadd.s32 104, %v3804_v8  ;;  %v5859_v10 = vmov 0 }
  0x46   :  { %vm4207_vm12 = vmpackc.low %vm276_vm5, %vm275_vm6  ;;  %vm230_vm6 = vcmp.lt.s32.totalorder %v100_v17, %v3815_v12  ;;  %v117_v1 = vadd.s32 352, %v3804_v8  ;;  %v118_v14 = vadd.s32 360, %v3804_v8  ;;  %v5862_v17 = vmov 0 }
  0x47   :  { %v5839_v25 = vsel %vm4207_vm12, 4294967295, %v5838_v25  ;;  %3438 = vmatpush3.bf16.msk.msra.mxu0 %vm4207_vm12, %v5601_v19  ;;  %vm307_vm9 = vmand %vm178_vm4, %vm243_vm2  ;;  %vm196_vm2 = vcmp.ge.s32.totalorder %v131_v27, %v3807_v9  ;;  %v103_v18 = vadd.s32 240, %v3804_v8  ;;  %v104_v20 = vadd.s32 248, %v3804_v8 }
  0x48   :  { %5840 = vst [vmem:[#allocation26_spill] sm:$0xff] %v5839_v25  ;;  %vm308_vm14 = vmand %vm179_vm1, %vm244_vm3  ;;  %vm261_vm1 = vcmp.lt.s32.totalorder %v131_v27, %v3815_v12  ;;  %v5865_v23 = vmov 0  ;;  %v135_v27 = vadd.s32 496, %v3804_v8  ;;  %v5868_v30 = vmov 0 }
  0x49   :  { %vm4222_vm5 = vmpackc.low %vm308_vm14, %vm307_vm9  ;;  %vm197_vm9 = vcmp.ge.s32.totalorder %v132_v29, %v3807_v9  ;;  %vm262_vm14 = vcmp.lt.s32.totalorder %v132_v29, %v3815_v12  ;;  %v136_v29 = vadd.s32 504, %v3804_v8  ;;  %v88_v32 = vadd.s32 120, %v3804_v8 }
  0x4a   :  { %v5842_v34 = vsel %vm4222_vm5, 4294967295, %v5841_v34  ;;  %3470 = vmatpush3.bf16.msk.msra.mxu1 %vm4222_vm5, %v5601_v19  ;;  %vm293_vm4 = vmand %vm164_vm13, %vm229_vm0  ;;  %vm213_vm0 = vcmp.lt.s32.totalorder %v83_v37, %v3815_v12  ;;  %v5871_v37 = vmov 0  ;;  %v119_v38 = vadd.s32 368, %v3804_v8 }
  0x4b   :  { %5843 = vst [vmem:[#allocation27_spill] sm:$0xff] %v5842_v34  ;;  %vm294_vm3 = vmand %vm165_vm15, %vm230_vm6  ;;  %vm5848_vm15 = vcmask 1041408   ;;  %v4449_v2 = vsub.s32 7, %v3804_v8 }
  0x4c   :  { %vm4241_vm8 = vmpackc.low %vm294_vm3, %vm293_vm4  ;;  %v1115_v48 = vsel %vm5848_vm15, %v1109_v31, 0.0  ;;  %vm149_vm4 = vcmp.ge.s32.totalorder %v84_v39, %v3807_v9  ;;  %vm214_vm3 = vcmp.lt.s32.totalorder %v84_v39, %v3815_v12  ;;  %vm245_vm15 = vcmp.lt.s32.totalorder %v115_v43, %v3815_v12 }
  0x4d   :  { %v5846_v42 = vsel %vm4241_vm8, 4294967295, %v5845_v42  ;;  %3440 = vmatprep.subr.msk.bf16.mxu0 %vm4241_vm8, %v5601_v19  ;;  %vm325_vm13 = vmand %vm196_vm2, %vm261_vm1  ;;  %vm180_vm1 = vcmp.ge.s32.totalorder %v115_v43, %v3807_v9  ;;  %v1116_v54 = vadd.f32 %v1115_v48, %v1114_v44  ;;  %v87_v31 = vadd.s32 112, %v3804_v8  ;;  %5899 = vst [vmem:[#allocation56_spill] sm:$0xff] %v4449_v2 }
  0x4e   :  { %5847 = vst [vmem:[#allocation29_spill] sm:$0xff] %v5846_v42  ;;  %vm326_vm6 = vmand %vm197_vm9, %vm262_vm14  ;;  %vm181_vm14 = vcmp.ge.s32.totalorder %v116_v47, %v3807_v9  ;;  %v120_v39 = vadd.s32 376, %v3804_v8  ;;  %v5874_v43 = vmov 0  ;;  %v5877_v44 = vmov 0 }
  0x4f   :  { %vm4256_vm5 = vmpackc.low %vm326_vm6, %vm325_vm13  ;;  %vm246_vm13 = vcmp.lt.s32.totalorder %v116_v47, %v3815_v12  ;;  %vm5852_vm6 = vcmask 1041408   ;;  %v5880_v47 = vmov 0 }
  0x50   :  { %v5850_v49 = vsel %vm4256_vm5, 4294967295, %v5849_v49  ;;  %3472 = vmatprep.subr.msk.bf16.mxu1 %vm4256_vm5, %v5601_v19  ;;  %vm277_vm2 = vmand %vm148_vm10, %vm213_vm0  ;;  %v1117_v56 = vsel %vm5852_vm6, %v1110_v7, 0.0  ;;  %vm166_vm0 = vcmp.ge.s32.totalorder %v101_v50, %v3807_v9  ;;  %vm167_vm6 = vcmp.ge.s32.totalorder %v102_v52, %v3807_v9 }
  0x51   :  { %5851 = vst [vmem:[#allocation30_spill] sm:$0xff] %v5850_v49  ;;  %vm278_vm9 = vmand %vm149_vm4, %vm214_vm3  ;;  %vm231_vm4 = vcmp.lt.s32.totalorder %v101_v50, %v3815_v12  ;;  %v1118_v60 = vadd.f32 %v1117_v56, %v1116_v54  ;;  %vm199_vm5 = vcmp.ge.s32.totalorder %v134_v59, %v3807_v9  ;;  %v4398_v50 = vsub.s32 0, %v3804_v8 }
  0x52   :  { %vm4270_vm11 = vmpackc.low %vm278_vm9, %vm277_vm2  ;;  %vm232_vm2 = vcmp.lt.s32.totalorder %v102_v52, %v3815_v12  ;;  %v4401_v52 = vsub.s32 4, %v3804_v8  ;;  %v4404_v54 = vsub.s32 1, %v3804_v8  ;;  %v4407_v56 = vsub.s32 5, %v3804_v8 }
  0x53   :  { %v5854_v55 = vsel %vm4270_vm11, 4294967295, %v5853_v55  ;;  %3442 = vmatpush3.bf16.msk.msra.mxu0 %vm4270_vm11, %v5601_v19  ;;  %vm309_vm10 = vmand %vm180_vm1, %vm245_vm15  ;;  %vm198_vm15 = vcmp.ge.s32.totalorder %v133_v57, %v3807_v9  ;;  %5888 = vst [vmem:[#allocation45_spill] sm:$0xff] %v4398_v50 }
  0x54   :  { %5855 = vst [vmem:[#allocation31_spill] sm:$0xff] %v5854_v55  ;;  %vm310_vm3 = vmand %vm181_vm14, %vm246_vm13  ;;  %vm263_vm14 = vcmp.lt.s32.totalorder %v133_v57, %v3815_v12  ;;  %v4412_v57 = vld [vmem:[%s5532_s0] sm:$0xff] }
  0x55   :  { %vm4283_vm9 = vmpackc.low %vm310_vm3, %vm309_vm10  ;;  %vm264_vm10 = vcmp.lt.s32.totalorder %v134_v59, %v3815_v12  ;;  %5889 = vst [vmem:[#allocation46_spill] sm:$0xff] %v4401_v52  ;;  %v4417_v59 = vld [vmem:[%s5532_s0 + $0x8] sm:$0xff] }
  0x56   :  { %v5857_v62 = vsel %vm4283_vm9, 4294967295, %v5856_v62  ;;  %3474 = vmatpush3.bf16.msk.msra.mxu1 %vm4283_vm9, %v5601_v19  ;;  %vm295_vm1 = vmand %vm166_vm0, %vm231_vm4  ;;  %vm150_vm4 = vcmp.ge.s32.totalorder %v85_v63, %v3807_v9  ;;  %5890 = vst [vmem:[#allocation47_spill] sm:$0xff] %v4404_v54 }
  0x57   :  { %5858 = vst [vmem:[#allocation32_spill] sm:$0xff] %v5857_v62  ;;  %vm296_vm13 = vmand %vm167_vm6, %vm232_vm2  ;;  %vm215_vm6 = vcmp.lt.s32.totalorder %v85_v63, %v3815_v12 }
  0x58   :  { %vm4296_vm3 = vmpackc.low %vm296_vm13, %vm295_vm1  ;;  %vm151_vm1 = vcmp.ge.s32.totalorder %v86_v0, %v3807_v9  ;;  %vm216_vm13 = vcmp.lt.s32.totalorder %v86_v0, %v3815_v12  ;;  %5891 = vst [vmem:[#allocation48_spill] sm:$0xff] %v4407_v56  ;;  %v424_v0 = vrot.slane %v4412_v57, %v4401_v52 }
  0x59   :  { %v5860_v10 = vsel %vm4296_vm3, 4294967295, %v5859_v10  ;;  %3444 = vmatprep.subr.msk.bf16.mxu0 %vm4296_vm3, %v5601_v19  ;;  %vm327_vm0 = vmand %vm198_vm15, %vm263_vm14  ;;  %vm182_vm14 = vcmp.ge.s32.totalorder %v117_v1, %v3807_v9  ;;  %vm247_vm3 = vcmp.lt.s32.totalorder %v117_v1, %v3815_v12  ;;  %5892 = vst [vmem:[#allocation49_spill] sm:$0xff] %v4412_v57  ;;  %v432_v1 = vrot.slane %v4417_v59, %v4401_v52 }
  0x5a   :  { %5861 = vst [vmem:[#allocation33_spill] sm:$0xff] %v5860_v10  ;;  %vm328_vm2 = vmand %vm199_vm5, %vm264_vm10  ;;  %vm183_vm10 = vcmp.ge.s32.totalorder %v118_v14, %v3807_v9  ;;  %v4452_v5 = vrot.slane %v424_v0, %v4398_v50 }
  0x5b   :  { %vm4309_vm9 = vmpackc.low %vm328_vm2, %vm327_vm0  ;;  %vm248_vm0 = vcmp.lt.s32.totalorder %v118_v14, %v3815_v12  ;;  %5893 = vst [vmem:[#allocation50_spill] sm:$0xff] %v4417_v59  ;;  %v420_v14 = vrot.slane %v4412_v57, %v4398_v50  ;;  %v4455_v4 = vrot.slane %v432_v1, %v4398_v50 }
  0x5c   :  { %1119 = vadd.xlane.f32.xlu1 %v1118_v60  ;;  %v5863_v17 = vsel %vm4309_vm9, 4294967295, %v5862_v17  ;;  %3476 = vmatprep.subr.msk.bf16.mxu1 %vm4309_vm9, %v5601_v19  ;;  %vm279_vm15 = vmand %vm150_vm4, %vm215_vm6  ;;  %vm168_vm6 = vcmp.ge.s32.totalorder %v103_v18, %v3807_v9  ;;  %vm233_vm9 = vcmp.lt.s32.totalorder %v103_v18, %v3815_v12  ;;  %v428_v18 = vrot.slane %v4417_v59, %v4398_v50 }
  0x5d   :  { %5864 = vst [vmem:[#allocation34_spill] sm:$0xff] %v5863_v17  ;;  %vm280_vm5 = vmand %vm151_vm1, %vm216_vm13  ;;  %vm169_vm13 = vcmp.ge.s32.totalorder %v104_v20, %v3807_v9 }
  0x5e   :  { %vm4322_vm2 = vmpackc.low %vm280_vm5, %vm279_vm15  ;;  %vm234_vm15 = vcmp.lt.s32.totalorder %v104_v20, %v3815_v12  ;;  %v492_v20 = vrot.slane %v4412_v57, %v4407_v56 }
  0x5f   :  { %v5866_v23 = vsel %vm4322_vm2, 4294967295, %v5865_v23  ;;  %3446 = vmatpush3.bf16.msk.msra.mxu0 %vm4322_vm2, %v5601_v19  ;;  %vm311_vm4 = vmand %vm182_vm14, %vm247_vm3  ;;  %vm200_vm14 = vcmp.ge.s32.totalorder %v135_v27, %v3807_v9  ;;  %vm265_vm2 = vcmp.lt.s32.totalorder %v135_v27, %v3815_v12  ;;  %v500_v27 = vrot.slane %v4417_v59, %v4407_v56 }
  0x60   :  { %5867 = vst [vmem:[#allocation35_spill] sm:$0xff] %v5866_v23  ;;  %vm312_vm1 = vmand %vm183_vm10, %vm248_vm0  ;;  %vm201_vm0 = vcmp.ge.s32.totalorder %v136_v29, %v3807_v9 }
  0x61   :  { %vm4335_vm5 = vmpackc.low %vm312_vm1, %vm311_vm4  ;;  %vm266_vm4 = vcmp.lt.s32.totalorder %v136_v29, %v3815_v12  ;;  %v488_v29 = vrot.slane %v4412_v57, %v4404_v54 }
  0x62   :  { %v5869_v30 = vsel %vm4335_vm5, 4294967295, %v5868_v30  ;;  %3478 = vmatpush3.bf16.msk.msra.mxu1 %vm4335_vm5, %v5601_v19  ;;  %vm297_vm3 = vmand %vm168_vm6, %vm233_vm9  ;;  %vm152_vm6 = vcmp.ge.s32.totalorder %v87_v31, %v3807_v9  ;;  %vm217_vm5 = vcmp.lt.s32.totalorder %v87_v31, %v3815_v12  ;;  %v496_v31 = vrot.slane %v4417_v59, %v4404_v54 }
  0x63   :  { %5870 = vst [vmem:[#allocation36_spill] sm:$0xff] %v5869_v30  ;;  %vm298_vm10 = vmand %vm169_vm13, %vm234_vm15  ;;  %vm153_vm15 = vcmp.ge.s32.totalorder %v88_v32, %v3807_v9  ;;  %v4472_v0 = vrot.slane %v488_v29, %v4404_v54  ;;  %v660_v29 = vrot.slane %v4412_v57, %v4449_v2 }
  0x64   :  { %vm4348_vm1 = vmpackc.low %vm298_vm10, %vm297_vm3  ;;  %vm218_vm3 = vcmp.lt.s32.totalorder %v88_v32, %v3815_v12  ;;  %v4440_v32 = vsub.s32 2, %v3804_v8  ;;  %v4475_v1 = vrot.slane %v496_v31, %v4404_v54  ;;  %v668_v31 = vrot.slane %v4417_v59, %v4449_v2 }
  0x65   :  { %v5872_v37 = vsel %vm4348_vm1, 4294967295, %v5871_v37  ;;  %3448 = vmatprep.subr.msk.bf16.mxu0 %vm4348_vm1, %v5601_v19  ;;  %vm329_vm9 = vmand %vm200_vm14, %vm265_vm2  ;;  %vm184_vm14 = vcmp.ge.s32.totalorder %v119_v38, %v3807_v9  ;;  %vm249_vm1 = vcmp.lt.s32.totalorder %v119_v38, %v3815_v12  ;;  %v4443_v38 = vsub.s32 6, %v3804_v8 }
  0x66   :  { %5873 = vst [vmem:[#allocation37_spill] sm:$0xff] %v5872_v37  ;;  %vm330_vm13 = vmand %vm201_vm0, %vm266_vm4  ;;  %vm185_vm0 = vcmp.ge.s32.totalorder %v120_v39, %v3807_v9  ;;  %vm250_vm4 = vcmp.lt.s32.totalorder %v120_v39, %v3815_v12  ;;  %v4446_v39 = vsub.s32 3, %v3804_v8  ;;  %v4469_v8 = vrot.slane %v500_v27, %v4404_v54 }
  0x67   :  { %vm4361_vm10 = vmpackc.low %vm330_vm13, %vm329_vm9  ;;  %5896 = vst [vmem:[#allocation53_spill] sm:$0xff] %v4440_v32  ;;  %v580_v27 = vrot.slane %v4417_v59, %v4440_v32 }
  0x68   :  { %v5875_v43 = vsel %vm4361_vm10, 4294967295, %v5874_v43  ;;  %3480 = vmatprep.subr.msk.bf16.mxu1 %vm4361_vm10, %v5601_v19  ;;  %vm281_vm2 = vmand %vm152_vm6, %vm217_vm5  ;;  %5897 = vst [vmem:[#allocation54_spill] sm:$0xff] %v4443_v38  ;;  %v656_v17 = vrot.slane %v4412_v57, %v4446_v39  ;;  %v664_v62 = vrot.slane %v4417_v59, %v4446_v39  ;;  %vm5910_vm6 = vnez %v5772_v33 }
  0x69   :  { %5876 = vst [vmem:[#allocation38_spill] sm:$0xff] %v5875_v43  ;;  %vm282_vm11 = vmand %vm153_vm15, %vm218_vm3  ;;  %v4466_v43 = vrot.slane %v492_v20, %v4404_v54  ;;  %v572_v20 = vrot.slane %v4412_v57, %v4440_v32  ;;  %v4526_v54 = vrot.slane %v660_v29, %v4446_v39  ;;  %vm5912_vm15 = vnez %v5778_v40 }
  0x6a   :  { %vm4372_vm8 = vmpackc.low %vm282_vm11, %vm281_vm2  ;;  %vm5883_vm11 = vnez %v5760_v16  ;;  %5898 = vst [vmem:[#allocation55_spill] sm:$0xff] %v4446_v39  ;;  %v4461_v16 = vrot.slane %v428_v18, %v4398_v50  ;;  %v584_v18 = vrot.slane %v4417_v59, %v4443_v38  ;;  %vm5913_vm3 = vnez %v5784_v51 }
  0x6b   :  { %v5878_v44 = vsel %vm4372_vm8, 4294967295, %v5877_v44  ;;  %3450 = vmatpush3.bf16.msk.msra.mxu0 %vm4372_vm8, %v5601_v19  ;;  %vm313_vm9 = vmand %vm184_vm14, %vm249_vm1  ;;  %v4520_v59 = vrot.slane %v572_v20, %v4440_v32  ;;  %vm5908_vm1 = vnez %v5766_v24  ;;  %vm5915_vm2 = vnez %v5792_v3 }
  0x6c   :  { %5879 = vst [vmem:[#allocation39_spill] sm:$0xff] %v5878_v44  ;;  %vm314_vm13 = vmand %vm185_vm0, %vm250_vm4  ;;  %v4517_v21 = vrot.slane %v584_v18, %v4440_v32  ;;  %vm5916_vm14 = vnez %v5799_v26  ;;  %vm5919_vm0 = vnez %v5817_v46  ;;  %vm5922_vm4 = vnez %v5846_v42 }
  0x6d   :  { %vm4379_vm5 = vmpackc.low %vm314_vm13, %vm313_vm9  ;;  %vm5923_vm9 = vnez %v5854_v55  ;;  %vm5924_vm13 = vnez %v5860_v10 }
  0x6e   :  { %v5881_v47 = vsel %vm4379_vm5, 4294967295, %v5880_v47  ;;  %3482 = vmatpush3.bf16.msk.msra.mxu1 %vm4379_vm5, %v5601_v19 }
  0x6f   :  { %5882 = vst [vmem:[#allocation40_spill] sm:$0xff] %v5881_v47  ;;  %3490 = vmatprep.subr.msk.bf16.mxu1 %vm5883_vm11, %v5601_v19  ;;  %v4458_v19 = vrot.slane %v420_v14, %v4398_v50  ;;  %v576_v14 = vrot.slane %v4412_v57, %v4443_v38  ;;  %v4529_v50 = vrot.slane %v668_v31, %v4446_v39 }
  0x71   :  { %v4514_v28 = vrot.slane %v576_v14, %v4440_v32  ;;  %v4535_v14 = vrot.slane %v664_v62, %v4446_v39 }
  0x81   :  { %v4389_v9 = vpop.permute.xlu1 %554  ;;  %v4391_v12 = vpop.permute.xlu0 %397 }
  0x82   :  { %5884 = vst [vmem:[#allocation41_spill] sm:$0xff] %v4389_v9  ;;  %5885 = vst [vmem:[#allocation42_spill] sm:$0xff] %v4391_v12  ;;  %v454_v49 = vmul.f32 %v4452_v5, %v4391_v12  ;;  %v456_v34 = vmul.f32 %v4455_v4, %v4391_v12  ;;  %v453_v13 = vmul.f32 %v4458_v19, %v4391_v12 }
  0x83   :  { %v455_v53 = vmul.f32 %v4461_v16, %v4391_v12  ;;  %v4523_v12 = vrot.slane %v580_v27, %v4440_v32  ;;  %v606_v27 = vmul.f32 %v4514_v28, %v4389_v9  ;;  %v608_v29 = vmul.f32 %v4517_v21, %v4389_v9 }
  0x84   :  { %v605_v31 = vmul.f32 %v4520_v59, %v4389_v9 }
  0x86   :  { %v4393_v7 = vpop.permute.xlu1 %402  ;;  %v4395_v48 = vpop.permute.xlu0 %470 }
  0x87   :  { %5886 = vst [vmem:[#allocation43_spill] sm:$0xff] %v4393_v7  ;;  %5887 = vst [vmem:[#allocation44_spill] sm:$0xff] %v4395_v48  ;;  %v522_v35 = vmul.f32 %v4466_v43, %v4395_v48  ;;  %v524_v15 = vmul.f32 %v4469_v8, %v4395_v48  ;;  %v521_v58 = vmul.f32 %v4472_v0, %v4395_v48 }
  0x88   :  { %v523_v45 = vmul.f32 %v4475_v1, %v4395_v48  ;;  %v4532_v48 = vrot.slane %v656_v17, %v4446_v39  ;;  %v607_v17 = vmul.f32 %v4523_v12, %v4389_v9  ;;  %v458_v9 = vmul.f32 %v4452_v5, %v4393_v7 }
  0x89   :  { %v538_v2 = vadd.f32 %v522_v35, %v454_v49  ;;  %v540_v20 = vadd.f32 %v524_v15, %v456_v34  ;;  %v537_v38 = vadd.f32 %v521_v58, %v453_v13  ;;  %v460_v39 = vmul.f32 %v4455_v4, %v4393_v7 }
  0x8a   :  { %v4421_v63 = vpop.permute.xlu0 %478  ;;  %v539_v56 = vadd.f32 %v523_v45, %v455_v53  ;;  %v457_v32 = vmul.f32 %v4458_v19, %v4393_v7 }
  0x8b   :  { %v4419_v60 = vpop.permute.xlu1 %474  ;;  %5895 = vst [vmem:[#allocation52_spill] sm:$0xff] %v4421_v63  ;;  %v622_v53 = vadd.f32 %v606_v27, %v538_v2  ;;  %v624_v13 = vadd.f32 %v608_v29, %v540_v20  ;;  %v621_v34 = vadd.f32 %v605_v31, %v537_v38 }
  0x8c   :  { %5894 = vst [vmem:[#allocation51_spill] sm:$0xff] %v4419_v60  ;;  %v623_v49 = vadd.f32 %v607_v17, %v539_v56  ;;  %v526_v2 = vmul.f32 %v4466_v43, %v4419_v60  ;;  %v528_v56 = vmul.f32 %v4469_v8, %v4419_v60  ;;  %v525_v38 = vmul.f32 %v4472_v0, %v4419_v60 }
  0x8d   :  { %v527_v20 = vmul.f32 %v4475_v1, %v4419_v60 }
  0x8f   :  { %v4477_v30 = vpop.permute.xlu0 %562 }
  0x90   :  { %v4463_v47 = vpop.permute.xlu1 %558  ;;  %5901 = vst [vmem:[#allocation58_spill] sm:$0xff] %v4477_v30 }
  0x91   :  { %5900 = vst [vmem:[#allocation57_spill] sm:$0xff] %v4463_v47  ;;  %v610_v60 = vmul.f32 %v4514_v28, %v4463_v47 }
  0x92   :  { %v5958_v51 = vld [vmem:[#allocation52_spill] sm:$0xff] }
  0x94   :  { %v4537_v18 = vpop.permute.xlu0 %638 }
  0x95   :  { %v4511_v36 = vpop.permute.xlu1 %407  ;;  %5903 = vst [vmem:[#allocation60_spill] sm:$0xff] %v4537_v18  ;;  %v690_v35 = vmul.f32 %v4526_v54, %v4537_v18  ;;  %v692_v45 = vmul.f32 %v4529_v50, %v4537_v18  ;;  %v689_v58 = vmul.f32 %v4532_v48, %v4537_v18  ;;  %v691_v15 = vmul.f32 %v4535_v14, %v4537_v18 }
  0x96   :  { %5902 = vst [vmem:[#allocation59_spill] sm:$0xff] %v4511_v36 }
  0x97   :  { %v706_v52 = vadd.f32 %v690_v35, %v622_v53  ;;  %v708_v57 = vadd.f32 %v692_v45, %v624_v13  ;;  %v705_v41 = vadd.f32 %v689_v58, %v621_v34  ;;  %v707_v22 = vadd.f32 %v691_v15, %v623_v49 }
  0x98   :  { %v459_v35 = vmul.f32 %v4461_v16, %v4393_v7  ;;  %v530_v45 = vmul.f32 %v4466_v43, %v4421_v63  ;;  %v532_v58 = vmul.f32 %v4469_v8, %v4421_v63  ;;  %v529_v15 = vmul.f32 %v4472_v0, %v4421_v63 }
  0x99   :  { %v462_v49 = vmul.f32 %v4452_v5, %v4511_v36  ;;  %v541_v7 = vadd.f32 %v525_v38, %v457_v32  ;;  %v461_v32 = vmul.f32 %v4458_v19, %v4511_v36  ;;  %v463_v38 = vmul.f32 %v4461_v16, %v4511_v36 }
  0x9a   :  { %v4547_v62 = vpop.permute.xlu1 %642 }
  0x9b   :  { %5904 = vst [vmem:[#allocation61_spill] sm:$0xff] %v4547_v62  ;;  %v695_v24 = vmul.f32 %v4535_v14, %v4547_v62  ;;  %v545_v6 = vadd.f32 %v529_v15, %v461_v32 }
  0x9d   :  { %v5957_v26 = vld [vmem:[#allocation59_spill] sm:$0xff] }
  0x9f   :  { %v4563_v11 = vpop.permute.xlu1 %723 }
  0xa0   :  { %5905 = vst [vmem:[#allocation62_spill] sm:$0xff] %v4563_v11  ;;  %v742_v27 = vadd.f32 %v4563_v11, %v706_v52  ;;  %v744_v29 = vadd.f32 %v4563_v11, %v708_v57  ;;  %v741_v31 = vadd.f32 %v4563_v11, %v705_v41  ;;  %v743_v17 = vadd.f32 %v4563_v11, %v707_v22 }
  0xa1   :  { %v542_v41 = vadd.f32 %v526_v2, %v458_v9  ;;  %v544_v22 = vadd.f32 %v528_v56, %v460_v39  ;;  %v531_v11 = vmul.f32 %v4475_v1, %v4421_v63  ;;  %v609_v9 = vmul.f32 %v4520_v59, %v4463_v47 }
  0xa2   :  { %v758_v53 = vmax.f32 %v742_v27, 0.0  ;;  %v760_v52 = vmax.f32 %v744_v29, 0.0  ;;  %v757_v13 = vmax.f32 %v741_v31, 0.0  ;;  %v759_v57 = vmax.f32 %v743_v17, 0.0  ;;  %v4610_v31 = vpop.permute.xlu0 %646 }
  0xa3   :  { %v4585_v34 = vpop.permute.xlu1 %412  ;;  %v543_v27 = vadd.f32 %v527_v20, %v459_v35  ;;  %v612_v29 = vmul.f32 %v4517_v21, %v4463_v47  ;;  %v464_v39 = vmul.f32 %v4455_v4, %v4511_v36  ;;  %v611_v2 = vmul.f32 %v4523_v12, %v4463_v47  ;;  %5909 = vst [vmem:[#allocation64_spill] sm:$0xff] %v4610_v31 }
  0xa4   :  { %5906 = vst [vmem:[#allocation63_spill] sm:$0xff] %v4585_v34  ;;  %837 = vmatprep.mubr.f32.mxu0 %v758_v53  ;;  %922 = vmatprep.mubr.f32.mxu1 %v760_v52  ;;  %v614_v56 = vmul.f32 %v4514_v28, %v4477_v30  ;;  %v5907_v20 = vmov 0.00390625|0.00390625   ;;  %v546_v17 = vadd.f32 %v530_v45, %v462_v49 }
  0xa5   :  { %838 = vmatmul.mubr.f32.vlgmr.msra.gmra.mrb[0].mxu0 %v757_v13  ;;  %923 = vmatmul.mubr.f32.vlgmr.msra.gmra.mrb[0].mxu1 %v759_v57  ;;  %v616_v35 = vmul.f32 %v4517_v21, %v4477_v30  ;;  %v613_v53 = vmul.f32 %v4520_v59, %v4477_v30  ;;  %v615_v52 = vmul.f32 %v4523_v12, %v4477_v30 }
  0xa6   :  { %3492 = vmatpush3.bf16.msk.msra.mxu1 %vm5908_vm1, %v5907_v20  ;;  %v694_v57 = vmul.f32 %v4526_v54, %v4547_v62  ;;  %v696_v45 = vmul.f32 %v4529_v50, %v4547_v62  ;;  %v693_v49 = vmul.f32 %v4532_v48, %v4547_v62  ;;  %v626_v63 = vadd.f32 %v610_v60, %v542_v41 }
  0xa7   :  { %3494 = vmatprep.subr.msk.bf16.mxu1 %vm5910_vm6, %v5907_v20  ;;  %v628_v30 = vadd.f32 %v612_v29, %v544_v22  ;;  %v625_v36 = vadd.f32 %v609_v9, %v541_v7  ;;  %v548_v47 = vadd.f32 %v532_v58, %v464_v39  ;;  %v627_v33 = vadd.f32 %v611_v2, %v543_v27 }
  0xa8   :  { %v4621_v13 = vpop.permute.xlu1 %482  ;;  %v698_v18 = vmul.f32 %v4526_v54, %v4610_v31  ;;  %v547_v44 = vadd.f32 %v531_v11, %v463_v38  ;;  %v630_v37 = vadd.f32 %v614_v56, %v546_v17  ;;  %v700_v23 = vmul.f32 %v4529_v50, %v4610_v31  ;;  %v4671_v38 = vpop.permute.xlu0 %650 }
  0xa9   :  { %5911 = vst [vmem:[#allocation65_spill] sm:$0xff] %v4621_v13  ;;  %v697_v60 = vmul.f32 %v4532_v48, %v4610_v31  ;;  %v699_v7 = vmul.f32 %v4535_v14, %v4610_v31  ;;  %v710_v58 = vadd.f32 %v694_v57, %v626_v63  ;;  %v712_v11 = vadd.f32 %v696_v45, %v628_v30 }
  0xaa   :  { %3496 = vmatpush3.bf16.msk.msra.mxu1 %vm5912_vm15, %v5907_v20  ;;  %v709_v15 = vadd.f32 %v693_v49, %v625_v36  ;;  %v711_v41 = vadd.f32 %v695_v24, %v627_v33  ;;  %v632_v27 = vadd.f32 %v616_v35, %v548_v47  ;;  %v534_v29 = vmul.f32 %v4466_v43, %v4621_v13 }
  0xab   :  { %3498 = vmatprep.subr.msk.bf16.mxu1 %vm5913_vm3, %v5907_v20  ;;  %v536_v9 = vmul.f32 %v4469_v8, %v4621_v13  ;;  %v533_v39 = vmul.f32 %v4472_v0, %v4621_v13  ;;  %v466_v33 = vmul.f32 %v4452_v5, %v4585_v34  ;;  %v468_v36 = vmul.f32 %v4455_v4, %v4585_v34 }
  0xac   :  { %v465_v43 = vmul.f32 %v4458_v19, %v4585_v34  ;;  %v535_v47 = vmul.f32 %v4475_v1, %v4621_v13  ;;  %5917 = vst [vmem:[#allocation67_spill] sm:$0xff] %v4671_v38  ;;  %v714_v5 = vadd.f32 %v698_v18, %v630_v37  ;;  %v629_v17 = vadd.f32 %v613_v53, %v545_v6 }
  0xad   :  { %v4645_v22 = vpop.permute.xlu1 %728  ;;  %v631_v35 = vadd.f32 %v615_v52, %v547_v44  ;;  %v467_v4 = vmul.f32 %v4461_v16, %v4585_v34  ;;  %v550_v1 = vadd.f32 %v534_v29, %v466_v33  ;;  %v552_v57 = vadd.f32 %v536_v9, %v468_v36 }
  0xae   :  { %5914 = vst [vmem:[#allocation66_spill] sm:$0xff] %v4645_v22  ;;  %v746_v2 = vadd.f32 %v4645_v22, %v710_v58  ;;  %v748_v56 = vadd.f32 %v4645_v22, %v712_v11  ;;  %v745_v30 = vadd.f32 %v4645_v22, %v709_v15  ;;  %v747_v24 = vadd.f32 %v4645_v22, %v711_v41 }
  0xaf   :  { %3500 = vmatpush3.bf16.msk.msra.mxu1 %vm5915_vm2, %v5907_v20  ;;  %v549_v45 = vadd.f32 %v533_v39, %v465_v43  ;;  %v702_v16 = vmul.f32 %v4526_v54, %v4671_v38  ;;  %v704_v44 = vmul.f32 %v4529_v50, %v4671_v38  ;;  %v551_v18 = vadd.f32 %v535_v47, %v467_v4  ;;  %v4697_v54 = vpop.permute.xlu0 %738 }
  0xb0   :  { %3502 = vmatprep.subr.msk.bf16.mxu1 %vm5916_vm14, %v5907_v20  ;;  %v762_v63 = vmax.f32 %v746_v2, 0.0  ;;  %v764_v8 = vmax.f32 %v748_v56, 0.0  ;;  %v761_v0 = vmax.f32 %v745_v30, 0.0  ;;  %v763_v32 = vmax.f32 %v747_v24, 0.0  ;;  %5920 = vst [vmem:[#allocation69_spill] sm:$0xff] %v4697_v54 }
  0xb1   :  { %v716_v50 = vadd.f32 %v700_v23, %v632_v27  ;;  %v713_v58 = vadd.f32 %v697_v60, %v629_v17  ;;  %v715_v11 = vadd.f32 %v699_v7, %v631_v35  ;;  %v703_v39 = vmul.f32 %v4535_v14, %v4671_v38  ;;  %v5955_v17 = vld [vmem:[#allocation51_spill] sm:$0xff] }
  0xb2   :  { %v4675_v19 = vpop.permute.xlu1 %566  ;;  %842 = vmatprep.mubr.f32.mxu0 %v762_v63  ;;  %927 = vmatprep.mubr.f32.mxu1 %v764_v8 }
  0xb3   :  { %5918 = vst [vmem:[#allocation68_spill] sm:$0xff] %v4675_v19  ;;  %843 = vmatmul.mubr.f32.gmra.mrb[2].mxu0 %v761_v0  ;;  %928 = vmatmul.mubr.f32.gmra.mrb[2].mxu1 %v763_v32  ;;  %v618_v49 = vmul.f32 %v4514_v28, %v4675_v19  ;;  %v620_v37 = vmul.f32 %v4517_v21, %v4675_v19  ;;  %v5925_v32 = vld [vmem:[#allocation35_spill] sm:$0xff] }
  0xb4   :  { %v617_v6 = vmul.f32 %v4520_v59, %v4675_v19  ;;  %v619_v53 = vmul.f32 %v4523_v12, %v4675_v19  ;;  %3504 = vmatpush3.bf16.msk.msra.mxu1 %vm5919_vm0, %v5907_v20  ;;  %v701_v59 = vmul.f32 %v4532_v48, %v4671_v38 }
  0xb5   :  { %v634_v28 = vadd.f32 %v618_v49, %v550_v1  ;;  %v636_v52 = vadd.f32 %v620_v37, %v552_v57  ;;  %3506 = vmatprep.subr.msk.bf16.mxu1 %vm4160_vm7, %v5907_v20 }
  0xb6   :  { %v633_v21 = vadd.f32 %v617_v6, %v549_v45  ;;  %v635_v12 = vadd.f32 %v619_v53, %v551_v18  ;;  %v5931_v18 = vld [vmem:[#allocation23_spill] sm:$0xff] }
  0xb7   :  { %v4699_v15 = vpop.permute.xlu1 %733  ;;  %v718_v41 = vadd.f32 %v702_v16, %v634_v28  ;;  %v720_v29 = vadd.f32 %v704_v44, %v636_v52  ;;  %v5930_v16 = vld [vmem:[#allocation22_spill] sm:$0xff]  ;;  %v5932_v28 = vld [vmem:[#allocation25_spill] sm:$0xff] }
  0xb8   :  { %5921 = vst [vmem:[#allocation70_spill] sm:$0xff] %v4699_v15  ;;  %v717_v9 = vadd.f32 %v701_v59, %v633_v21  ;;  %v750_v48 = vadd.f32 %v4699_v15, %v714_v5  ;;  %v752_v2 = vadd.f32 %v4699_v15, %v716_v50  ;;  %v749_v56 = vadd.f32 %v4699_v15, %v713_v58  ;;  %v5927_v5 = vld [vmem:[#allocation37_spill] sm:$0xff]  ;;  %v5933_v21 = vld [vmem:[#allocation28_spill] sm:$0xff] }
  0xb9   :  { %v751_v30 = vadd.f32 %v4699_v15, %v715_v11  ;;  %3508 = vmatpush3.bf16.msk.msra.mxu1 %vm4207_vm12, %v5907_v20  ;;  %v754_v23 = vadd.f32 %v4697_v54, %v718_v41  ;;  %v756_v60 = vadd.f32 %v4697_v54, %v720_v29  ;;  %v719_v7 = vadd.f32 %v703_v39, %v635_v12 }
  0xba   :  { %3510 = vmatprep.subr.msk.bf16.mxu1 %vm5922_vm4, %v5907_v20  ;;  %v766_v14 = vmax.f32 %v750_v48, 0.0  ;;  %v768_v27 = vmax.f32 %v752_v2, 0.0  ;;  %v765_v24 = vmax.f32 %v749_v56, 0.0  ;;  %v753_v47 = vadd.f32 %v4697_v54, %v717_v9 }
  0xbb   :  { %v767_v33 = vmax.f32 %v751_v30, 0.0  ;;  %v770_v36 = vmax.f32 %v754_v23, 0.0  ;;  %v772_v43 = vmax.f32 %v756_v60, 0.0  ;;  %v755_v63 = vadd.f32 %v4697_v54, %v719_v7 }
  0xbc   :  { %847 = vmatprep.mubr.f32.mxu0 %v766_v14  ;;  %932 = vmatprep.mubr.f32.mxu1 %v768_v27  ;;  %v769_v8 = vmax.f32 %v753_v47, 0.0  ;;  %vm5926_vm4 = vnez %v5925_v32  ;;  %vm5928_vm12 = vnez %v5927_v5 }
  0xbd   :  { %848 = vmatmul.mubr.f32.gmra.mrb[4].mxu0 %v765_v24  ;;  %933 = vmatmul.mubr.f32.gmra.mrb[4].mxu1 %v767_v33  ;;  %v771_v0 = vmax.f32 %v755_v63, 0.0 }
  0xbe   :  { %852 = vmatprep.mubr.f32.mxu0 %v770_v36  ;;  %937 = vmatprep.mubr.f32.mxu1 %v772_v43 }
  0xbf   :  { %3512 = vmatpush3.bf16.msk.msra.mxu1 %vm5923_vm9, %v5907_v20 }
  0xc0   :  { %3514 = vmatprep.subr.msk.bf16.mxu1 %vm5924_vm13, %v5907_v20 }
  0xc1   :  { %853 = vmatmul.mubr.f32.gmra.mrb[6].mxu0 %v769_v8  ;;  %938 = vmatmul.mubr.f32.gmra.mrb[6].mxu1 %v771_v0 }
  0xc3   :  { %3516 = vmatpush3.bf16.msk.msra.mxu1 %vm5926_vm4, %v5907_v20 }
  0xc4   :  { %3518 = vmatprep.subr.msk.bf16.mxu1 %vm5928_vm12, %v5907_v20 }
  0xc7   :  { %3520 = vmatpush3.bf16.msk.msra.mxu1 %vm4372_vm8, %v5907_v20  ;;  %vm5934_vm8 = vcmask 1041408  }
  0xc8   :  { %vm5935_vm12 = vmmov %vm5934_vm8 }
  0xc9   :  { %vm5936_vm4 = vmmov %vm5934_vm8 }
  0xca   :  { %vm5937_vm7 = vmmov %vm5936_vm4 }
  0xe9   :  { %v1120_v35 = vpop.xlane.xlu1 %1119 }
  0xea   :  { %3684 = vrsqrt.f32 %v1120_v35  ;;  %vm1123_vm9 = vcmp.eq.f32.partialorder %v1120_v35, inf  ;;  %v1126_v1 = vand.u32 2147483648, %v1120_v35  ;;  %vm1125_vm13 = vcmp.eq.f32.partialorder %v1120_v35, 0.0 }
  0xf4   :  { %v3685_v4 = vpop.eup %3684 }
  0xf5   :  { %v1122_v57 = vmul.f32 %v3685_v4, %v1120_v35 }
  0xf7   :  { %v1124_v45 = vsel %vm1123_vm9, %v1120_v35, %v1122_v57 }
  0xf8   :  { %v1127_v49 = vsel %vm1125_vm13, %v1126_v1, %v1124_v45 }
  0xf9   :  { %v1128_v37 = vadd.f32 1e-08, %v1127_v49  ;;  %v3708_v49 = vld [vmem:[%s5533_s1] sm:$0xff] }
  0xfb   :  { %3686 = vrcp.f32 %v1128_v37 }
 0x105   :  { %v3687_v6 = vpop.eup %3686 }
 0x106   :  { %v1131_v44 = vmul.f32 %v3687_v6, %v5930_v16  ;;  %v1132_v53 = vmul.f32 %v3687_v6, %v5931_v18  ;;  %v1133_v52 = vmul.f32 %v3687_v6, %v5932_v28  ;;  %v1134_v59 = vmul.f32 %v3687_v6, %v5933_v21  ;;  %v3709_v6 = vld [vmem:[%s5533_s1 + $0x8] sm:$0xff] }
 0x107   :  { %v5959_v28 = vld [vmem:[#allocation58_spill] sm:$0xff] }
 0x108   :  { %v1135_v50 = vsel %vm5934_vm8, %v1131_v44, 0.0  ;;  %v1142_v58 = vsel %vm5935_vm12, %v1132_v53, 0.0  ;;  %v1149_v11 = vsel %vm5936_vm4, %v1133_v52, 0.0  ;;  %v1156_v12 = vsel %vm5937_vm7, %v1134_v59, 0.0  ;;  %v4749_v52 = vld [vmem:[%s5537_s5] sm:$0xff]  ;;  %v4754_v59 = vld [vmem:[%s5537_s5 + $0x8] sm:$0xff] }
 0x109   :  { %v1136_v41 = vrot.slane %v1135_v50, 4  ;;  %v1143_v29 = vrot.slane %v1142_v58, 4  ;;  %v1150_v9 = vrot.slane %v1149_v11, 4  ;;  %v1157_v39 = vrot.slane %v1156_v12, 4  ;;  %5938 = vst [vmem:[#allocation71_spill] sm:$0xff] %v4754_v59  ;;  %v5960_v16 = vld [vmem:[#allocation62_spill] sm:$0xff] }
 0x10b   :  { %v1137_v48 = vadd.f32 %v1136_v41, %v1135_v50  ;;  %v1144_v2 = vadd.f32 %v1143_v29, %v1142_v58  ;;  %v1151_v56 = vadd.f32 %v1150_v9, %v1149_v11  ;;  %v1158_v30 = vadd.f32 %v1157_v39, %v1156_v12  ;;  %v5939_v50 = vld [vmem:[#allocation49_spill] sm:$0xff]  ;;  %v5941_v29 = vld [vmem:[#allocation46_spill] sm:$0xff]  ;;  %v5942_v39 = vld [vmem:[#allocation48_spill] sm:$0xff] }
 0x10c   :  { %v5695_v11 = vmov 0.0|0.0   ;;  %v4760_v12 = vpack.c.bf16 %v4754_v59, %v4749_v52 }
 0x10d   :  { %v1138_v23 = vrot.slane %v1137_v48, 2  ;;  %v1145_v60 = vrot.slane %v1144_v2, 2  ;;  %v1152_v7 = vrot.slane %v1151_v56, 2  ;;  %v1159_v14 = vrot.slane %v1158_v30, 2  ;;  %3483 = vmatprep.subr.bf16.mxu0 %v5695_v11  ;;  %3553 = vmatprep.subr.bf16.mxu1 %v5695_v11 }
 0x10e   :  { %5940 = vst [vmem:[#allocation49_spill] sm:$0xff] %v4760_v12  ;;  %3485 = vmatpush3.bf16.msra.mxu0 %v4760_v12 }
 0x10f   :  { %v1139_v27 = vadd.f32 %v1138_v23, %v1137_v48  ;;  %v1146_v24 = vadd.f32 %v1145_v60, %v1144_v2  ;;  %v1153_v33 = vadd.f32 %v1152_v7, %v1151_v56  ;;  %v1160_v36 = vadd.f32 %v1159_v14, %v1158_v30  ;;  %v5943_v2 = vld [vmem:[#allocation54_spill] sm:$0xff]  ;;  %v5944_v30 = vld [vmem:[#allocation56_spill] sm:$0xff]  ;;  %v5945_v60 = vld [vmem:[#allocation45_spill] sm:$0xff]  ;;  %3486 = vmatprep.subr.bf16.mxu0 %v5695_v11 }
 0x110   :  { %v5946_v14 = vld [vmem:[#allocation47_spill] sm:$0xff] }
 0x111   :  { %v1140_v43 = vrot.slane %v1139_v27, 1  ;;  %v1147_v47 = vrot.slane %v1146_v24, 1  ;;  %v1154_v63 = vrot.slane %v1153_v33, 1  ;;  %v1161_v8 = vrot.slane %v1160_v36, 1 }
 0x113   :  { %v1141_v0 = vadd.f32 %v1140_v43, %v1139_v27  ;;  %v1148_v35 = vadd.f32 %v1147_v47, %v1146_v24  ;;  %v1155_v4 = vadd.f32 %v1154_v63, %v1153_v33  ;;  %v1162_v1 = vadd.f32 %v1161_v8, %v1160_v36  ;;  %v5947_v24 = vld [vmem:[#allocation53_spill] sm:$0xff]  ;;  %v5948_v36 = vld [vmem:[#allocation55_spill] sm:$0xff] }
 0x115   :  { %v1167_v57 = vcombine.low %v1141_v0, %v1148_v35  ;;  %v1168_v45 = vcombine.low %v1155_v4, %v1162_v1 }
 0x117   :  { %v1171_v37 = vmul.f32 %v3708_v49, %v1167_v57  ;;  %v1172_v44 = vmul.f32 %v3709_v6, %v1168_v45  ;;  %v5949_v45 = vld [vmem:[#allocation42_spill] sm:$0xff] }
 0x119   :  { %v1173_v53 = vmul.f32 1e-06, %v1171_v37  ;;  %v1174_v41 = vmul.f32 1e-06, %v1172_v44  ;;  %v5950_v37 = vld [vmem:[#allocation44_spill] sm:$0xff]  ;;  %v5951_v44 = vld [vmem:[#allocation41_spill] sm:$0xff] }
 0x11b   :  { %v1175_v58 = vadd.f32 %v1173_v53, %v5939_v50  ;;  %v5952_v50 = vld [vmem:[#allocation50_spill] sm:$0xff] }
 0x11d   :  { %v1186_v9 = vrot.slane %v1175_v58, %v5941_v29  ;;  %v1238_v48 = vrot.slane %v1175_v58, %v5942_v39  ;;  %v1306_v56 = vrot.slane %v1175_v58, %v5943_v2  ;;  %v1374_v23 = vrot.slane %v1175_v58, %v5944_v30 }
 0x11e   :  { %v1182_v7 = vrot.slane %v1175_v58, %v5945_v60  ;;  %v1234_v27 = vrot.slane %v1175_v58, %v5946_v14  ;;  %v1302_v33 = vrot.slane %v1175_v58, %v5947_v24  ;;  %v1370_v43 = vrot.slane %v1175_v58, %v5948_v36 }
 0x11f   :  { %v1206_v47 = vrot.slane %v1186_v9, %v5945_v60  ;;  %v1258_v63 = vrot.slane %v1238_v48, %v5946_v14  ;;  %v1326_v8 = vrot.slane %v1306_v56, %v5947_v24  ;;  %v1394_v0 = vrot.slane %v1374_v23, %v5948_v36  ;;  %v5953_v9 = vld [vmem:[#allocation60_spill] sm:$0xff] }
 0x120   :  { %v1202_v35 = vrot.slane %v1182_v7, %v5945_v60  ;;  %v4779_v4 = vrot.slane %v1234_v27, %v5946_v14  ;;  %v4782_v1 = vrot.slane %v1302_v33, %v5947_v24  ;;  %v4785_v57 = vrot.slane %v1370_v43, %v5948_v36  ;;  %v5954_v43 = vld [vmem:[#allocation43_spill] sm:$0xff] }
 0x121   :  { %v1216_v49 = vmul.f32 %v1206_v47, %v5949_v45  ;;  %v1268_v6 = vmul.f32 %v1258_v63, %v5950_v37  ;;  %v1336_v53 = vmul.f32 %v1326_v8, %v5951_v44  ;;  %v4791_v58 = vadd.f32 %v1174_v41, %v5952_v50  ;;  %v5956_v50 = vld [vmem:[#allocation57_spill] sm:$0xff] }
 0x122   :  { %v1404_v48 = vmul.f32 %v1394_v0, %v5953_v9  ;;  %v1215_v56 = vmul.f32 %v1202_v35, %v5949_v45  ;;  %v1267_v23 = vmul.f32 %v4779_v4, %v5950_v37  ;;  %v1335_v7 = vmul.f32 %v4782_v1, %v5951_v44 }
 0x123   :  { %v1284_v27 = vadd.f32 %v1268_v6, %v1216_v49  ;;  %v1403_v33 = vmul.f32 %v4785_v57, %v5953_v9  ;;  %v1220_v11 = vmul.f32 %v1206_v47, %v5954_v43  ;;  %v1272_v5 = vmul.f32 %v1258_v63, %v5955_v17 }
 0x124   :  { %v1283_v41 = vadd.f32 %v1267_v23, %v1215_v56  ;;  %v1340_v32 = vmul.f32 %v1326_v8, %v5956_v50  ;;  %v1219_v10 = vmul.f32 %v1202_v35, %v5954_v43  ;;  %v1271_v55 = vmul.f32 %v4779_v4, %v5955_v17 }
 0x125   :  { %v1352_v42 = vadd.f32 %v1336_v53, %v1284_v27  ;;  %v1288_v25 = vadd.f32 %v1272_v5, %v1220_v11  ;;  %v1408_v61 = vmul.f32 %v1394_v0, %v4547_v62  ;;  %v1339_v49 = vmul.f32 %v4782_v1, %v5956_v50 }
 0x126   :  { %v1351_v6 = vadd.f32 %v1335_v7, %v1283_v41  ;;  %v1287_v46 = vadd.f32 %v1271_v55, %v1219_v10  ;;  %v1224_v3 = vmul.f32 %v1206_v47, %v5957_v26  ;;  %v1276_v56 = vmul.f32 %v1258_v63, %v5958_v51 }
 0x127   :  { %v1420_v23 = vadd.f32 %v1404_v48, %v1352_v42  ;;  %v1356_v40 = vadd.f32 %v1340_v32, %v1288_v25  ;;  %v1407_v21 = vmul.f32 %v4785_v57, %v4547_v62  ;;  %v1344_v18 = vmul.f32 %v1326_v8, %v5959_v28 }
 0x128   :  { %v1419_v53 = vadd.f32 %v1403_v33, %v1351_v6  ;;  %v1355_v5 = vadd.f32 %v1339_v49, %v1287_v46  ;;  %v1292_v11 = vadd.f32 %v1276_v56, %v1224_v3  ;;  %v1223_v27 = vmul.f32 %v1202_v35, %v5957_v26 }
 0x129   :  { %v4817_v59 = vadd.f32 %v1420_v23, %v5960_v16  ;;  %v1424_v55 = vadd.f32 %v1408_v61, %v1356_v40  ;;  %v1412_v10 = vmul.f32 %v1394_v0, %v4610_v31  ;;  %v1275_v42 = vmul.f32 %v4779_v4, %v5958_v51 }
 0x12a   :  { %v4823_v25 = vadd.f32 %v1419_v53, %v5960_v16  ;;  %v1423_v32 = vadd.f32 %v1407_v21, %v1355_v5  ;;  %v1360_v48 = vadd.f32 %v1344_v18, %v1292_v11  ;;  %v1343_v46 = vmul.f32 %v4782_v1, %v5959_v28 }
 0x12b   :  { %v1452_v3 = vmax.f32 %v4817_v59, 0.0  ;;  %v4829_v7 = vadd.f32 %v1424_v55, %v4645_v22  ;;  %v1291_v33 = vadd.f32 %v1275_v42, %v1223_v27  ;;  %v1228_v40 = vmul.f32 %v1206_v47, %v4585_v34 }
 0x12c   :  { %v1451_v61 = vmax.f32 %v4823_v25, 0.0  ;;  %v4834_v41 = vadd.f32 %v1423_v32, %v4645_v22  ;;  %v1428_v49 = vadd.f32 %v1412_v10, %v1360_v48  ;;  %v1280_v21 = vmul.f32 %v1258_v63, %v4621_v13 }
 0x12d   :  { %1531 = vmatprep.mubr.f32.mxu1 %v1452_v3  ;;  %v1456_v18 = vmax.f32 %v4829_v7, 0.0  ;;  %v1359_v6 = vadd.f32 %v1343_v46, %v1291_v33  ;;  %v1411_v56 = vmul.f32 %v4785_v57, %v4610_v31  ;;  %v1348_v23 = vmul.f32 %v1326_v8, %v4675_v19 }
 0x12e   :  { %1532 = vmatmul.mubr.f32.vlgmr.msra.gmra.mrb[8].mxu1 %v1451_v61  ;;  %v4842_v47 = vadd.f32 %v1428_v49, %v4699_v15  ;;  %v1296_v53 = vadd.f32 %v1280_v21, %v1228_v40  ;;  %v1416_v5 = vmul.f32 %v1394_v0, %v4671_v38  ;;  %v1227_v11 = vmul.f32 %v1202_v35, %v4585_v34 }
 0x12f   :  { %1536 = vmatprep.mubr.f32.mxu1 %v1456_v18  ;;  %v1455_v63 = vmax.f32 %v4834_v41, 0.0  ;;  %v1427_v27 = vadd.f32 %v1411_v56, %v1359_v6  ;;  %v1279_v55 = vmul.f32 %v4779_v4, %v4621_v13  ;;  %v1347_v10 = vmul.f32 %v4782_v1, %v4675_v19  ;;  %3555 = vmatpush3.bf16.msra.mxu1 %v4760_v12 }
 0x130   :  { %v1460_v8 = vmax.f32 %v4842_v47, 0.0  ;;  %v1364_v42 = vadd.f32 %v1348_v23, %v1296_v53  ;;  %v1194_v32 = vrot.slane %v4791_v58, %v5941_v29  ;;  %v1246_v0 = vrot.slane %v4791_v58, %v5942_v39 }
 0x131   :  { %v4858_v35 = vadd.f32 %v1427_v27, %v4699_v15  ;;  %v1295_v48 = vadd.f32 %v1279_v55, %v1227_v11  ;;  %v1314_v4 = vrot.slane %v4791_v58, %v5943_v2  ;;  %v1382_v1 = vrot.slane %v4791_v58, %v5944_v30 }
 0x132   :  { %v5961_v46 = vmov 0.0|0.0   ;;  %1537 = vmatmul.mubr.f32.gmra.mrb[10].mxu1 %v1455_v63  ;;  %v1432_v3 = vadd.f32 %v1416_v5, %v1364_v42  ;;  %v1214_v33 = vrot.slane %v1194_v32, %v5945_v60  ;;  %v4867_v40 = vrot.slane %v1246_v0, %v5946_v14 }
 0x133   :  { %3556 = vmatprep.subr.bf16.mxu1 %v5961_v46  ;;  %v1190_v61 = vrot.slane %v4791_v58, %v5945_v60  ;;  %1541 = vmatprep.mubr.f32.mxu1 %v1460_v8  ;;  %v1459_v49 = vmax.f32 %v4858_v35, 0.0  ;;  %v1363_v21 = vadd.f32 %v1347_v10, %v1295_v48  ;;  %v1415_v18 = vmul.f32 %v4785_v57, %v4671_v38 }
 0x134   :  { %v4875_v6 = vrot.slane %v1314_v4, %v5947_v24  ;;  %v4878_v56 = vadd.f32 %v1432_v3, %v4697_v54  ;;  %v1218_v23 = vmul.f32 %v1214_v33, %v5949_v45  ;;  %v1270_v53 = vmul.f32 %v4867_v40, %v5950_v37 }
 0x135   :  { %v1210_v5 = vrot.slane %v1190_v61, %v5945_v60  ;;  %v1431_v11 = vadd.f32 %v1415_v18, %v1363_v21  ;;  %v1402_v27 = vrot.slane %v1382_v1, %v5948_v36  ;;  %v1242_v57 = vrot.slane %v4791_v58, %v5946_v14 }
 0x136   :  { %v1338_v63 = vmul.f32 %v4875_v6, %v5951_v44  ;;  %1542 = vmatmul.mubr.f32.gmra.mrb[12].mxu1 %v1459_v49  ;;  %v1464_v55 = vmax.f32 %v4878_v56, 0.0  ;;  %v1286_v10 = vadd.f32 %v1270_v53, %v1218_v23  ;;  %v1310_v42 = vrot.slane %v4791_v58, %v5947_v24 }
 0x137   :  { %v1217_v8 = vmul.f32 %v1210_v5, %v5949_v45  ;;  %v4894_v32 = vadd.f32 %v1431_v11, %v4697_v54  ;;  %v1262_v0 = vrot.slane %v1242_v57, %v5946_v14  ;;  %v1378_v48 = vrot.slane %v4791_v58, %v5948_v36 }
 0x138   :  { %v1222_v4 = vmul.f32 %v1214_v33, %v5954_v43  ;;  %1546 = vmatprep.mubr.f32.mxu1 %v1464_v55  ;;  %v1354_v1 = vadd.f32 %v1338_v63, %v1286_v10  ;;  %v1330_v3 = vrot.slane %v1310_v42, %v5947_v24  ;;  %v1274_v61 = vmul.f32 %v4867_v40, %v5955_v17 }
 0x139   :  { %v1463_v49 = vmax.f32 %v4894_v32, 0.0  ;;  %v1269_v21 = vmul.f32 %v1262_v0, %v5950_v37  ;;  %v1398_v18 = vrot.slane %v1378_v48, %v5948_v36  ;;  %v1406_v23 = vmul.f32 %v1402_v27, %v5953_v9 }
 0x13a   :  { %v1290_v53 = vadd.f32 %v1274_v61, %v1222_v4  ;;  %v1342_v58 = vmul.f32 %v4875_v6, %v5956_v50  ;;  %v1221_v11 = vmul.f32 %v1210_v5, %v5954_v43  ;;  %v1337_v57 = vmul.f32 %v1330_v3, %v5951_v44 }
 0x13b   :  { %1547 = vmatmul.mubr.f32.gmra.mrb[14].mxu1 %v1463_v49  ;;  %v1285_v63 = vadd.f32 %v1269_v21, %v1217_v8  ;;  %v1410_v55 = vmul.f32 %v1402_v27, %v4547_v62  ;;  %v1273_v10 = vmul.f32 %v1262_v0, %v5955_v17  ;;  %v1422_v42 = vadd.f32 %v1406_v23, %v1354_v1 }
 0x13c   :  { %v1405_v12 = vmul.f32 %v1398_v18, %v5953_v9  ;;  %v1358_v48 = vadd.f32 %v1342_v58, %v1290_v53  ;;  %v1226_v37 = vmul.f32 %v1214_v33, %v5957_v26  ;;  %v1341_v45 = vmul.f32 %v1330_v3, %v5956_v50 }
 0x13d   :  { %v1353_v4 = vadd.f32 %v1337_v57, %v1285_v63  ;;  %v1289_v61 = vadd.f32 %v1273_v10, %v1221_v11  ;;  %v1278_v49 = vmul.f32 %v4867_v40, %v5958_v51  ;;  %v1409_v21 = vmul.f32 %v1398_v18, %v4547_v62 }
 0x13e   :  { %v1426_v8 = vadd.f32 %v1410_v55, %v1358_v48  ;;  %v1346_v43 = vmul.f32 %v4875_v6, %v5959_v28  ;;  %v1225_v1 = vmul.f32 %v1210_v5, %v5957_v26  ;;  %v1277_v58 = vmul.f32 %v1262_v0, %v5958_v51 }
 0x13f   :  { %v1421_v23 = vadd.f32 %v1405_v12, %v1353_v4  ;;  %v1357_v17 = vadd.f32 %v1341_v45, %v1289_v61  ;;  %v1294_v53 = vadd.f32 %v1278_v49, %v1226_v37  ;;  %v1414_v11 = vmul.f32 %v1402_v27, %v4610_v31 }
 0x140   :  { %v1230_v63 = vmul.f32 %v1214_v33, %v4585_v34  ;;  %v1293_v50 = vadd.f32 %v1277_v58, %v1225_v1  ;;  %v1345_v55 = vmul.f32 %v1330_v3, %v5959_v28  ;;  %v4927_v48 = vadd.f32 %v1422_v42, %v5960_v16 }
 0x141   :  { %v1425_v57 = vadd.f32 %v1409_v21, %v1357_v17  ;;  %v1362_v10 = vadd.f32 %v1346_v43, %v1294_v53  ;;  %v4930_v62 = vadd.f32 %v1426_v8, %v4645_v22  ;;  %v1413_v12 = vmul.f32 %v1398_v18, %v4610_v31 }
 0x142   :  { %v1282_v45 = vmul.f32 %v4867_v40, %v4621_v13  ;;  %v4936_v37 = vadd.f32 %v1421_v23, %v5960_v16  ;;  %v1361_v17 = vadd.f32 %v1345_v55, %v1293_v50  ;;  %v1350_v43 = vmul.f32 %v4875_v6, %v4675_v19 }
 0x143   :  { %v1430_v33 = vadd.f32 %v1414_v11, %v1362_v10  ;;  %v1418_v42 = vmul.f32 %v1402_v27, %v4671_v38  ;;  %v1229_v61 = vmul.f32 %v1210_v5, %v4585_v34  ;;  %v1281_v49 = vmul.f32 %v1262_v0, %v4621_v13 }
 0x144   :  { %v1298_v4 = vadd.f32 %v1282_v45, %v1230_v63  ;;  %v4944_v8 = vadd.f32 %v1425_v57, %v4645_v22  ;;  %v1429_v21 = vadd.f32 %v1413_v12, %v1361_v17  ;;  %v1349_v1 = vmul.f32 %v1330_v3, %v4675_v19 }
 0x145   :  { %v4947_v40 = vadd.f32 %v1430_v33, %v4699_v15  ;;  %v1297_v23 = vadd.f32 %v1281_v49, %v1229_v61  ;;  %vm1980_vm7 = vcmp.gt.f32.partialorder %v4817_v59, 0.0  ;;  %vm1984_vm8 = vcmp.gt.f32.partialorder %v4829_v7, 0.0 }
 0x146   :  { %v1366_v50 = vadd.f32 %v1350_v43, %v1298_v4  ;;  %v4953_v6 = vadd.f32 %v1429_v21, %v4699_v15  ;;  %v1417_v5 = vmul.f32 %v1398_v18, %v4671_v38  ;;  %vm4956_vm12 = vmpackc.low %vm1984_vm8, %vm1980_vm7  ;;  %vm1982_vm4 = vcmp.gt.f32.partialorder %v4927_v48, 0.0  ;;  %v5011_v4 = vld [vmem:[%s5537_s5 + $0x10] sm:$0xff] }
 0x147   :  { %vm1986_vm9 = vcmp.gt.f32.partialorder %v4930_v62, 0.0  ;;  %v1365_v3 = vadd.f32 %v1349_v1, %v1297_v23  ;;  %vm1979_vm0 = vcmp.gt.f32.partialorder %v4823_v25, 0.0  ;;  %vm1983_vm14 = vcmp.gt.f32.partialorder %v4834_v41, 0.0  ;;  %v6028_v25 = vld [vmem:[#allocation7_spill] sm:$0xff] }
 0x148   :  { %v1434_v0 = vadd.f32 %v1418_v42, %v1366_v50  ;;  %vm4962_vm13 = vmpackc.low %vm1986_vm9, %vm1982_vm4  ;;  %vm1981_vm7 = vcmp.gt.f32.partialorder %v4936_v37, 0.0  ;;  %vm1985_vm8 = vcmp.gt.f32.partialorder %v4944_v8, 0.0  ;;  %vm1988_vm3 = vcmp.gt.f32.partialorder %v4842_v47, 0.0  ;;  %v5016_v42 = vld [vmem:[%s5537_s5 + $0x18] sm:$0xff]  ;;  %v5979_v50 = vld [vmem:[#allocation6_spill] sm:$0xff] }
 0x149   :  { %vm4968_vm2 = vmpackc.low %vm1983_vm14, %vm1979_vm0  ;;  %v1433_v18 = vadd.f32 %v1417_v5, %v1365_v3  ;;  %vm1992_vm9 = vcmp.gt.f32.partialorder %v4878_v56, 0.0  ;;  %vm1990_vm14 = vcmp.gt.f32.partialorder %v4947_v40, 0.0  ;;  %vm1987_vm15 = vcmp.gt.f32.partialorder %v4858_v35, 0.0  ;;  %v6031_v47 = vld [vmem:[#allocation9_spill] sm:$0xff]  ;;  %v6034_v56 = vld [vmem:[#allocation11_spill] sm:$0xff] }
 0x14a   :  { %v4976_v7 = vadd.f32 %v1434_v0, %v4697_v54  ;;  %vm4978_vm4 = vmpackc.low %vm1985_vm8, %vm1981_vm7  ;;  %vm1991_vm6 = vcmp.gt.f32.partialorder %v4894_v32, 0.0  ;;  %vm1989_vm1 = vcmp.gt.f32.partialorder %v4953_v6, 0.0  ;;  %v5020_v21 = vpack.c.bf16 %v5016_v42, %v5011_v4  ;;  %v6037_v35 = vld [vmem:[#allocation13_spill] sm:$0xff] }
 0x14b   :  { %vm4984_vm0 = vmpackc.low %vm1992_vm9, %vm1988_vm3  ;;  %v4991_v41 = vadd.f32 %v1433_v18, %v4697_v54  ;;  %v5981_v23 = vmov 0.0   ;;  %v1461_v34 = vmax.f32 %v4953_v6, 0.0 }
 0x14c   :  { %vm1994_vm7 = vcmp.gt.f32.partialorder %v4976_v7, 0.0  ;;  %vm4994_vm8 = vmpackc.low %vm1991_vm6, %vm1987_vm15  ;;  %5978 = vst [vmem:[#allocation50_spill] sm:$0xff] %v5020_v21  ;;  %3488 = vmatpush3.bf16.msra.mxu0 %v5020_v21  ;;  %3558 = vmatpush3.bf16.msra.mxu1 %v5020_v21  ;;  %vm5724_vm6 = vmmov 0   ;;  %vm5725_vm15 = vcmask 261120   ;;  %v1466_v15 = vmax.f32 %v4976_v7, 0.0 }
 0x14d   :  { %vm4999_vm11 = vmpackc.low %vm1994_vm7, %vm1990_vm14  ;;  %vm1993_vm3 = vcmp.gt.f32.partialorder %v4991_v41, 0.0  ;;  %3386 = vmatprep.mubr.msk.f32.mxu0 %vm5724_vm6, %v5981_v23  ;;  %3397 = vmatprep.mubr.msk.f32.mxu1 %vm5724_vm6, %v5981_v23  ;;  %v1465_v21 = vmax.f32 %v4991_v41, 0.0 }
 0x14e   :  { %vm5004_vm9 = vmpackc.low %vm1993_vm3, %vm1989_vm1  ;;  %vm5980_vm1 = vnez %v5979_v50 }
 0x14f   :  { %3522 = vmatprep.subr.msk.bf16.mxu0 %vm5980_vm1, %v5907_v20 }
 0x178   :  { %v3126_v32 = vpop.f32.mrb[0].mxu0  ;;  %v3170_v11 = vpop.f32.mrb[0].mxu1 }
 0x179   :  { %v3127_v63 = vpop.f32.mrb[1].mxu0  ;;  %v3171_v57 = vpop.f32.mrb[1].mxu1 }
 0x17a   :  { %v3128_v10 = vadd.f32 %v3127_v63, %v3126_v32  ;;  %v3172_v55 = vadd.f32 %v3171_v57, %v3170_v11 }
 0x17c   :  { %v925_v12 = vadd.f32 %v3172_v55, %v3128_v10 }
 0x17e   :  { %943 = vxpose.xlu0.b32.start [1/4] (short) (narrow) %v925_v12, 8 }
 0x186   :  { %v3129_v45 = vpop.f32.mrb[2].mxu0  ;;  %v3173_v33 = vpop.f32.mrb[2].mxu1 }
 0x187   :  { %v3130_v17 = vpop.f32.mrb[3].mxu0  ;;  %v3174_v43 = vpop.f32.mrb[3].mxu1 }
 0x188   :  { %v3131_v61 = vadd.f32 %v3130_v17, %v3129_v45  ;;  %v3175_v49 = vadd.f32 %v3174_v43, %v3173_v33 }
 0x18a   :  { %v930_v1 = vadd.f32 %v3175_v49, %v3131_v61 }
 0x18c   :  { %944 = vxpose.xlu0.b32.cont [2/4] (short) (narrow) %v930_v1, 8 }
 0x190   :  { %v3132_v5 = vpop.f32.mrb[4].mxu0  ;;  %v3176_v0 = vpop.f32.mrb[4].mxu1 }
 0x191   :  { %v3133_v3 = vpop.f32.mrb[5].mxu0  ;;  %v3177_v18 = vpop.f32.mrb[5].mxu1 }
 0x192   :  { %v3134_v32 = vadd.f32 %v3133_v3, %v3132_v5  ;;  %v3178_v11 = vadd.f32 %v3177_v18, %v3176_v0  ;;  %v1454_v18 = vmax.f32 %v4927_v48, 0.0  ;;  %v5992_v48 = vld [vmem:[#allocation18_spill] sm:$0xff] }
 0x194   :  { %v935_v63 = vadd.f32 %v3178_v11, %v3134_v32  ;;  %v3135_v57 = vpop.f32.mrb[6].mxu0  ;;  %v3179_v10 = vpop.f32.mrb[6].mxu1 }
 0x195   :  { %v3136_v55 = vpop.f32.mrb[7].mxu0  ;;  %v3180_v12 = vpop.f32.mrb[7].mxu1 }
 0x196   :  { %v3137_v45 = vadd.f32 %v3136_v55, %v3135_v57  ;;  %v3181_v33 = vadd.f32 %v3180_v12, %v3179_v10  ;;  %945 = vxpose.xlu0.b32.cont [3/4] (short) (narrow) %v935_v63, 8  ;;  %v5982_v63 = vld [vmem:[#allocation8_spill] sm:$0xff]  ;;  %v5984_v57 = vld [vmem:[#allocation10_spill] sm:$0xff]  ;;  %v5998_v12 = vld [vmem:[#allocation27_spill] sm:$0xff] }
 0x197   :  { %vm5983_vm14 = vnez %v5982_v63  ;;  %vm5985_vm7 = vnez %v5984_v57  ;;  %v5994_v10 = vld [vmem:[#allocation20_spill] sm:$0xff] }
 0x198   :  { %v940_v17 = vadd.f32 %v3181_v33, %v3137_v45  ;;  %vm5995_vm1 = vnez %v5994_v10  ;;  %v5996_v55 = vld [vmem:[#allocation24_spill] sm:$0xff]  ;;  %v6000_v45 = vld [vmem:[#allocation30_spill] sm:$0xff] }
 0x199   :  { %v6002_v33 = vld [vmem:[#allocation32_spill] sm:$0xff] }
 0x19a   :  { %946 = vxpose.xlu0.b32.end [4/4] (short) (narrow) %v940_v17, 8  ;;  %v6004_v17 = vld [vmem:[#allocation34_spill] sm:$0xff] }
 0x201   :  { %v3219_v43 = vpop.f32.mrb[8].mxu1 }
 0x202   :  { %v3220_v61 = vpop.f32.mrb[9].mxu1 }
 0x203   :  { %v3221_v49 = vadd.f32 %v3220_v61, %v3219_v43  ;;  %v6006_v43 = vld [vmem:[#allocation36_spill] sm:$0xff] }
 0x205   :  { %v3222_v1 = vpop.f32.mrb[10].mxu1 }
 0x206   :  { %v3223_v54 = vpop.f32.mrb[11].mxu1 }
 0x207   :  { %v3224_v38 = vadd.f32 %v3223_v54, %v3222_v1  ;;  %v5990_v54 = vld [vmem:[#allocation16_spill] sm:$0xff] }
 0x209   :  { %v3225_v19 = vpop.f32.mrb[12].mxu1 }
 0x20a   :  { %v3226_v13 = vpop.f32.mrb[13].mxu1 }
 0x20b   :  { %v3227_v5 = vadd.f32 %v3226_v13, %v3225_v19  ;;  %v5986_v13 = vld [vmem:[#allocation12_spill] sm:$0xff]  ;;  %v5988_v19 = vld [vmem:[#allocation14_spill] sm:$0xff] }
 0x20c   :  { %vm5987_vm3 = vnez %v5986_v13  ;;  %vm5989_vm6 = vnez %v5988_v19 }
 0x20e   :  { %v3228_v0 = vpop.f32.mrb[14].mxu1  ;;  %v959_v3 = vpop.trf.xlu0 }
 0x20f   :  { %v3229_v32 = vpop.f32.mrb[15].mxu1  ;;  %3387 = vmatmul.mubr.msk.f32.vlgmr.msra.gmra.mrb[8].mxu0 %vm5725_vm15, %v959_v3  ;;  %vm5991_vm15 = vnez %v5990_v54  ;;  %v1458_v3 = vmax.f32 %v4930_v62, 0.0  ;;  %v2939_v62 = vld [vmem:[%s5538_s6] ss:$0 sm:$0xff] }
 0x210   :  { %v3230_v11 = vadd.f32 %v3229_v32, %v3228_v0  ;;  %3524 = vmatpush3.bf16.msk.msra.mxu0 %vm5983_vm14, %v5907_v20  ;;  %1616 = vmatprep.mubr.f32.mxu0 %v1454_v18  ;;  %vm5993_vm14 = vnez %v5992_v48  ;;  %v1453_v0 = vmax.f32 %v4936_v37, 0.0  ;;  %v1457_v18 = vmax.f32 %v4944_v8, 0.0 }
 0x211   :  { %3526 = vmatprep.subr.msk.bf16.mxu0 %vm5985_vm7, %v5907_v20  ;;  %vm5997_vm7 = vnez %v5996_v55  ;;  %v1462_v32 = vmax.f32 %v4947_v40, 0.0  ;;  %v6058_v55 = vld [vmem:[#allocation33_spill] sm:$0xff] }
 0x214   :  { %3528 = vmatpush3.bf16.msk.msra.mxu0 %vm5987_vm3, %v5907_v20  ;;  %vm5999_vm3 = vnez %v5998_v12  ;;  %v6060_v12 = vld [vmem:[#allocation34_spill] sm:$0xff] }
 0x215   :  { %3530 = vmatprep.subr.msk.bf16.mxu0 %vm5989_vm6, %v5907_v20  ;;  %vm6001_vm6 = vnez %v6000_v45  ;;  %v6064_v45 = vld [vmem:[#allocation36_spill] sm:$0xff] }
 0x218   :  { %3532 = vmatpush3.bf16.msk.msra.mxu0 %vm5991_vm15, %v5907_v20  ;;  %vm6003_vm15 = vnez %v6002_v33 }
 0x219   :  { %3534 = vmatprep.subr.msk.bf16.mxu0 %vm5993_vm14, %v5907_v20  ;;  %vm6005_vm14 = vnez %v6004_v17 }
 0x21c   :  { %3536 = vmatpush3.bf16.msk.msra.mxu0 %vm5995_vm1, %v5907_v20  ;;  %vm6007_vm1 = vnez %v6006_v43 }
 0x21d   :  { %3538 = vmatprep.subr.msk.bf16.mxu0 %vm5997_vm7, %v5907_v20 }
 0x220   :  { %3540 = vmatpush3.bf16.msk.msra.mxu0 %vm5999_vm3, %v5907_v20 }
 0x221   :  { %3542 = vmatprep.subr.msk.bf16.mxu0 %vm6001_vm6, %v5907_v20 }
 0x224   :  { %3544 = vmatpush3.bf16.msk.msra.mxu0 %vm6003_vm15, %v5907_v20 }
 0x225   :  { %3546 = vmatprep.subr.msk.bf16.mxu0 %vm6005_vm14, %v5907_v20  ;;  %vm1758_vm14 = vcmask 15360  }
 0x228   :  { %3548 = vmatpush3.bf16.msk.msra.mxu0 %vm6007_vm1, %v5907_v20 }
 0x229   :  { %3550 = vmatprep.subr.msk.bf16.mxu0 %vm4361_vm10, %v5907_v20  ;;  %vm6011_vm10 = vcmask 9216  }
 0x22a   :  { %vm6012_vm1 = vmmov %vm6011_vm10 }
 0x22c   :  { %3552 = vmatpush3.bf16.msk.msra.mxu0 %vm4379_vm5, %v5907_v20  ;;  %vm5739_vm5 = vcmask 9216  }
 0x22f   :  { %1617 = vmatmul.mubr.f32.vlgmr.msra.gmra.mrb[10].mxu0 %v1453_v0 }
 0x230   :  { %1621 = vmatprep.mubr.f32.mxu0 %v1458_v3 }
 0x233   :  { %1622 = vmatmul.mubr.f32.gmra.mrb[12].mxu0 %v1457_v18 }
 0x234   :  { %1626 = vmatprep.mubr.f32.mxu0 %v1462_v32 }
 0x237   :  { %1627 = vmatmul.mubr.f32.gmra.mrb[14].mxu0 %v1461_v34 }
 0x238   :  { %1631 = vmatprep.mubr.f32.mxu0 %v1466_v15 }
 0x23b   :  { %1632 = vmatmul.mubr.f32.gmra.mrb[16].mxu0 %v1465_v21 }
 0x23c   :  { %2149 = vmatprep.mubr.f32.mxu0 %v5981_v23 }
 0x2e2   :  { %v1051_v37 = vpop.f32.mrb[8].mxu0 }
 0x2e3   :  { %v1052_v8 = vadd.f32 %v2939_v62, %v1051_v37  ;;  %v3388_v40 = vpop.f32.mrb[9].mxu0 }
 0x2e5   :  { %v1056_v0 = vsel %vm5739_vm5, %v1052_v8, -inf  ;;  %vm6010_vm5 = vcmask 261120  }
 0x2e6   :  { %1057 = vmax.xlane.f32.xlu0 %v1056_v0 }
 0x302   :  { %v3263_v6 = vpop.f32.mrb[10].mxu0 }
 0x303   :  { %v3264_v7 = vpop.f32.mrb[11].mxu0 }
 0x304   :  { %v3265_v34 = vadd.f32 %v3264_v7, %v3263_v6 }
 0x306   :  { %v1619_v15 = vadd.f32 %v3265_v34, %v3221_v49  ;;  %v3266_v3 = vpop.f32.mrb[12].mxu0 }
 0x307   :  { %v3267_v41 = vpop.f32.mrb[13].mxu0 }
 0x308   :  { %v3268_v21 = vadd.f32 %v3267_v41, %v3266_v3  ;;  %1637 = vxpose.xlu1.b32.start [1/4] (short) (narrow) %v1619_v15, 8 }
 0x30a   :  { %v1624_v18 = vadd.f32 %v3268_v21, %v3224_v38  ;;  %v3269_v32 = vpop.f32.mrb[14].mxu0 }
 0x30b   :  { %v3270_v31 = vpop.f32.mrb[15].mxu0 }
 0x30c   :  { %v3271_v28 = vadd.f32 %v3270_v31, %v3269_v32  ;;  %1638 = vxpose.xlu1.b32.cont [2/4] (short) (narrow) %v1624_v18, 8 }
 0x30e   :  { %v1629_v51 = vadd.f32 %v3271_v28, %v3227_v5  ;;  %v3272_v26 = vpop.f32.mrb[16].mxu0 }
 0x30f   :  { %v3273_v37 = vpop.f32.mrb[17].mxu0 }
 0x310   :  { %v3274_v40 = vadd.f32 %v3273_v37, %v3272_v26  ;;  %1639 = vxpose.xlu1.b32.cont [3/4] (short) (narrow) %v1629_v51, 8 }
 0x312   :  { %v1634_v22 = vadd.f32 %v3274_v40, %v3230_v11 }
 0x314   :  { %1640 = vxpose.xlu1.b32.end [4/4] (short) (narrow) %v1634_v22, 8 }
 0x373   :  { %v1058_v49 = vpop.xlane.xlu0 %1057 }
 0x374   :  { %v1059_v6 = vsub.f32 %v1052_v8, %v1058_v49 }
 0x376   :  { %v1060_v7 = vmul.f32 1.442695, %v1059_v6 }
 0x378   :  { %3688 = vpow2.f32 %v1060_v7 }
 0x382   :  { %v3689_v3 = vpop.eup %3688 }
 0x383   :  { %v1062_v28 = vsel %vm6012_vm1, %v3689_v3, 0.0 }
 0x388   :  { %v1653_v0 = vpop.trf.xlu1 }
 0x389   :  { %3398 = vmatmul.mubr.msk.f32.vlgmr.msra.gmra.mrb[16].mxu1 %vm6010_vm5, %v1653_v0  ;;  %vm6013_vm5 = vmmov %vm6012_vm1  ;;  %vm6036_vm1 = vnez %v5986_v13  ;;  %v6049_v13 = vld [vmem:[#allocation21_spill] sm:$0xff] }
 0x38a   :  { %3402 = vmatprep.mubr.msk.f32.mxu1 %vm1758_vm14, %v4749_v52 }
 0x45c   :  { %v1738_v34 = vpop.f32.mrb[16].mxu1 }
 0x45d   :  { %v1739_v38 = vadd.f32 %v2939_v62, %v1738_v34  ;;  %v3399_v15 = vpop.f32.mrb[17].mxu1 }
 0x45f   :  { %v1742_v31 = vsel %vm6011_vm10, %v1739_v38, -inf }
 0x460   :  { %1743 = vmax.xlane.f32.xlu0 %v1742_v31 }
 0x464   :  { %1063 = vadd.xlane.f32.xlu0 %v1062_v28 }
 0x4ed   :  { %v1744_v51 = vpop.xlane.xlu0 %1743 }
 0x4ee   :  { %v1745_v26 = vsub.f32 %v1739_v38, %v1744_v51 }
 0x4f0   :  { %v1746_v22 = vmul.f32 1.442695, %v1745_v26 }
 0x4f1   :  { %v1064_v62 = vpop.xlane.xlu0 %1063 }
 0x4f2   :  { %3690 = vpow2.f32 %v1746_v22  ;;  %v6017_v22 = vmov 1  }
 0x4f3   :  { %3692 = vlog2.f32 %v1064_v62  ;;  %v6018_v62 = vmov 0  }
 0x4fc   :  { %v3691_v5 = vpop.eup %3690 }
 0x4fd   :  { %v1748_v11 = vsel %vm6013_vm5, %v3691_v5, 0.0  ;;  %v3693_v41 = vpop.eup %3692  ;;  %vm6039_vm5 = vnez %v5988_v19  ;;  %v6051_v19 = vld [vmem:[#allocation26_spill] sm:$0xff] }
 0x4fe   :  { %1749 = vadd.xlane.f32.xlu1 %v1748_v11  ;;  %v1066_v21 = vmul.f32 0.6931472, %v3693_v41 }
 0x500   :  { %v5096_v18 = vsub.f32 %v1059_v6, %v1066_v21  ;;  %v6016_v6 = vld [vmem:[#allocation71_spill] sm:$0xff] }
 0x501   :  { %v6020_v21 = vld [vmem:[#allocation23_spill] sm:$0xff] }
 0x502   :  { %6014 = vst [vmem:[#allocation6_spill] sm:$0xff] %v5096_v18  ;;  %v1068_v40 = vmul.f32 1.442695, %v5096_v18 }
 0x58b   :  { %v1750_v8 = vpop.xlane.xlu1 %1749 }
 0x58c   :  { %3694 = vlog2.f32 %v1750_v8  ;;  %v6019_v8 = vld [vmem:[#allocation22_spill] sm:$0xff] }
 0x58d   :  { %3696 = vpow2.f32 %v1068_v40  ;;  %v1918_v41 = vrot.slane %v6019_v8, %v5946_v14 }
 0x596   :  { %v3695_v32 = vpop.eup %3694 }
 0x597   :  { %v1752_v37 = vmul.f32 0.6931472, %v3695_v32  ;;  %v5099_v7 = vpop.eup %3696  ;;  %v1922_v32 = vrot.slane %v6020_v21, %v5946_v14 }
 0x598   :  { %6015 = vst [vmem:[#allocation8_spill] sm:$0xff] %v5099_v7 }
 0x599   :  { %v1753_v0 = vsub.f32 %v1745_v26, %v1752_v37  ;;  %v6021_v37 = vld [vmem:[#allocation25_spill] sm:$0xff] }
 0x59a   :  { %v1926_v40 = vrot.slane %v6021_v37, %v5946_v14 }
 0x59b   :  { %v1754_v49 = vmul.f32 1.442695, %v1753_v0  ;;  %v6022_v0 = vld [vmem:[#allocation28_spill] sm:$0xff] }
 0x59d   :  { %3698 = vpow2.f32 %v1754_v49  ;;  %v1930_v49 = vrot.slane %v6022_v0, %v5946_v14 }
 0x5a7   :  { %v3699_v34 = vpop.eup %3698 }
 0x5a8   :  { %v1756_v52 = vsub.f32 %v3699_v34, %v5099_v7  ;;  %v1866_v34 = vrot.slane %v6019_v8, %v5945_v60 }
 0x5aa   :  { %v1757_v38 = vmul.f32 0.25, %v1756_v52  ;;  %v1870_v52 = vrot.slane %v6020_v21, %v5945_v60 }
 0x5ac   :  { %3400 = vmatprep.subr.msk.mxu1 %vm1758_vm14, %v1757_v38 }
 0x5ad   :  { %3401 = vmatpush3.xpose.msk.msra.mxu1 %vm1758_vm14, %v1757_v38  ;;  %v1874_v38 = vrot.slane %v6021_v37, %v5945_v60 }
 0x5b0   :  { %3403 = vmatmul.mubr.msk.f32.vlgmr.msra.gmra.mrb[18].mxu1 %vm1758_vm14, %v6016_v6  ;;  %v1878_v6 = vrot.slane %v6022_v0, %v5945_v60 }
 0x5b1   :  { %3405 = vmatprep.mubr.msk.f32.mxu1 %vm1758_vm14, %v5011_v4 }
 0x5b4   :  { %3406 = vmatmul.mubr.msk.f32.gmra.mrb[20].mxu1 %vm1758_vm14, %v5016_v42  ;;  %vm6038_vm14 = vnez %v6037_v35 }
 0x5b5   :  { %2078 = vmatprep.mubr.f32.mxu1 %v5981_v23 }
 0x683   :  { %v3404_v15 = vpop.f32.mrb[18].mxu1 }
 0x684   :  { %v1860_v31 = vmul.f32 0.00390625, %v3404_v15  ;;  %v1840_v3 = vpop.f32.mrb[19].mxu1 }
 0x685   :  { %v1859_v11 = vmul.f32 0.00390625, %v1840_v3 }
 0x686   :  { %1886 = vperm.xlu0 %3677, %v1860_v31  }
 0x687   :  { %v3407_v28 = vpop.f32.mrb[20].mxu1 }
 0x688   :  { %v1850_v51 = vpop.f32.mrb[21].mxu1  ;;  %v1862_v5 = vmul.f32 0.00390625, %v3407_v28 }
 0x689   :  { %v1861_v26 = vmul.f32 0.00390625, %v1850_v51 }
 0x68a   :  { %3678 = vset.pattern.permute.xlu0 %v6017_v22 }
 0x68b   :  { %1936 = vperm.xlu0 %3678, %v1860_v31   ;;  %1891 = vperm.xlu1 %3676, %v1861_v26  }
 0x68f   :  { %3679 = vset.pattern.permute.xlu0 %v6018_v62  ;;  %3683 = vset.pattern.permute.xlu1 %v6017_v22 }
 0x690   :  { %1881 = vperm.xlu0 %3679, %v1859_v11   ;;  %1944 = vperm.xlu1 %3683, %v1862_v5  }
 0x694   :  { %3680 = vset.pattern.permute.xlu0 %v6017_v22 }
 0x695   :  { %1932 = vperm.xlu0 %3680, %v1859_v11  }
 0x699   :  { %3681 = vset.pattern.permute.xlu0 %v6018_v62 }
 0x69a   :  { %1896 = vperm.xlu0 %3681, %v1862_v5  }
 0x69e   :  { %3682 = vset.pattern.permute.xlu0 %v6017_v22 }
 0x69f   :  { %1940 = vperm.xlu0 %3682, %v1861_v26  }
 0x705   :  { %v1887_v4 = vpop.permute.xlu0 %1886 }
 0x706   :  { %v1903_v26 = vmul.f32 %v1887_v4, %v1866_v34  ;;  %v1904_v22 = vmul.f32 %v1887_v4, %v1870_v52  ;;  %v1905_v5 = vmul.f32 %v1887_v4, %v1874_v38  ;;  %v1906_v11 = vmul.f32 %v1887_v4, %v1878_v6 }
 0x70a   :  { %v1937_v42 = vpop.permute.xlu0 %1936  ;;  %v1892_v62 = vpop.permute.xlu1 %1891 }
 0x70b   :  { %v1951_v31 = vmul.f32 %v1937_v42, %v1918_v41  ;;  %v1952_v3 = vmul.f32 %v1937_v42, %v1922_v32  ;;  %v1953_v28 = vmul.f32 %v1937_v42, %v1926_v40  ;;  %v1954_v51 = vmul.f32 %v1937_v42, %v1930_v49 }
 0x70d   :  { %v1967_v60 = vadd.f32 %v1951_v31, %v1903_v26  ;;  %v1968_v30 = vadd.f32 %v1952_v3, %v1904_v22  ;;  %v1969_v2 = vadd.f32 %v1953_v28, %v1905_v5  ;;  %v1970_v39 = vadd.f32 %v1954_v51, %v1906_v11 }
 0x70f   :  { %v1882_v15 = vpop.permute.xlu0 %1881  ;;  %v1945_v21 = vpop.permute.xlu1 %1944 }
 0x710   :  { %v1899_v7 = vmul.f32 %v1882_v15, %v1866_v34  ;;  %v1900_v18 = vmul.f32 %v1882_v15, %v1870_v52  ;;  %v1901_v23 = vmul.f32 %v1882_v15, %v1874_v38  ;;  %v1902_v16 = vmul.f32 %v1882_v15, %v1878_v6 }
 0x711   :  { %v1959_v15 = vmul.f32 %v1945_v21, %v1918_v41  ;;  %v1960_v43 = vmul.f32 %v1945_v21, %v1922_v32  ;;  %v1961_v17 = vmul.f32 %v1945_v21, %v1926_v40  ;;  %v1962_v33 = vmul.f32 %v1945_v21, %v1930_v49 }
 0x714   :  { %v1933_v9 = vpop.permute.xlu0 %1932 }
 0x715   :  { %v1947_v44 = vmul.f32 %v1933_v9, %v1918_v41  ;;  %v1948_v36 = vmul.f32 %v1933_v9, %v1922_v32  ;;  %v1949_v24 = vmul.f32 %v1933_v9, %v1926_v40  ;;  %v1950_v14 = vmul.f32 %v1933_v9, %v1930_v49 }
 0x717   :  { %v1963_v29 = vadd.f32 %v1947_v44, %v1899_v7  ;;  %v1964_v42 = vadd.f32 %v1948_v36, %v1900_v18  ;;  %v1965_v0 = vadd.f32 %v1949_v24, %v1901_v23  ;;  %v1966_v37 = vadd.f32 %v1950_v14, %v1902_v16 }
 0x719   :  { %v3562_v4 = vpack.c.bf16 %v1967_v60, %v1963_v29  ;;  %v3574_v8 = vpack.c.bf16 %v1969_v2, %v1965_v0  ;;  %v1897_v46 = vpop.permute.xlu0 %1896  ;;  %v3559_v1 = vpack.c.bf16 %v1968_v30, %v1964_v42  ;;  %v3571_v61 = vpack.c.bf16 %v1970_v39, %v1966_v37 }
 0x71a   :  { %v1911_v44 = vmul.f32 %v1897_v46, %v1866_v34  ;;  %v1912_v36 = vmul.f32 %v1897_v46, %v1870_v52  ;;  %v1913_v24 = vmul.f32 %v1897_v46, %v1874_v38  ;;  %v1914_v16 = vmul.f32 %v1897_v46, %v1878_v6 }
 0x71b   :  { %3561 = vmatprep.subr.msk.bf16.mxu1 %vm4956_vm12, %v3559_v1  ;;  %3573 = vmatprep.subr.msk.bf16.mxu0 %vm4962_vm13, %v3571_v61  ;;  %v1907_v29 = vmul.f32 %v1892_v62, %v1866_v34  ;;  %v1908_v39 = vmul.f32 %v1892_v62, %v1870_v52  ;;  %v1909_v2 = vmul.f32 %v1892_v62, %v1874_v38  ;;  %vm6026_vm12 = vcmask 261120  }
 0x71c   :  { %3564 = vmatpush1.bf16.msk.msra.mxu1 %vm4968_vm2, %v3562_v4  ;;  %3576 = vmatpush1.bf16.msk.msra.mxu0 %vm4978_vm4, %v3574_v8  ;;  %v1910_v30 = vmul.f32 %v1892_v62, %v1878_v6  ;;  %v1975_v23 = vadd.f32 %v1959_v15, %v1911_v44  ;;  %v1976_v61 = vadd.f32 %v1960_v43, %v1912_v36  ;;  %v6062_v43 = vld [vmem:[#allocation35_spill] sm:$0xff]  ;;  %v6074_v34 = vmov 0.0|0.0  }
 0x71d   :  { %v1977_v1 = vadd.f32 %v1961_v17, %v1913_v24  ;;  %v1978_v18 = vadd.f32 %v1962_v33, %v1914_v16  ;;  %v35_v33 = vld [vmem:[%s5535_s3] sm:$0xf]  ;;  %vm6025_vm2 = vnez %v5979_v50  ;;  %vm6029_vm13 = vnez %v6028_v25  ;;  %v6040_v50 = vld [vmem:[#allocation15_spill] sm:$0xff] }
 0x71e   :  { %v1941_v60 = vpop.permute.xlu0 %1940  ;;  %v6023_v17 = vld [vmem:[#allocation5_spill] sm:$0xff]  ;;  %vm6030_vm4 = vnez %v5982_v63 }
 0x71f   :  { %v1955_v14 = vmul.f32 %v1941_v60, %v1918_v41  ;;  %v1956_v9 = vmul.f32 %v1941_v60, %v1922_v32  ;;  %v1957_v27 = vmul.f32 %v1941_v60, %v1926_v40  ;;  %v1958_v53 = vmul.f32 %v1941_v60, %v1930_v49  ;;  %v6043_v63 = vld [vmem:[#allocation17_spill] sm:$0xff]  ;;  %v6068_v32 = vld [vmem:[#allocation38_spill] sm:$0xff]  ;;  %v6070_v40 = vld [vmem:[#allocation39_spill] sm:$0xff] }
 0x720   :  { %vm6024_vm10 = vnez %v6023_v17  ;;  %v6066_v41 = vld [vmem:[#allocation37_spill] sm:$0xff]  ;;  %v6072_v49 = vld [vmem:[#allocation40_spill] sm:$0xff]  ;;  %v6080_v17 = vld [vmem:[#allocation23_spill] sm:$0xff] }
 0x721   :  { %v1971_v46 = vadd.f32 %v1955_v14, %v1907_v29  ;;  %v1972_v7 = vadd.f32 %v1956_v9, %v1908_v39  ;;  %v1973_v59 = vadd.f32 %v1957_v27, %v1909_v2  ;;  %v1974_v21 = vadd.f32 %v1958_v53, %v1910_v30 }
 0x723   :  { %v3568_v37 = vpack.c.bf16 %v1975_v23, %v1971_v46  ;;  %v3580_v58 = vpack.c.bf16 %v1977_v1, %v1973_v59  ;;  %v3565_v8 = vpack.c.bf16 %v1976_v61, %v1972_v7  ;;  %v3577_v0 = vpack.c.bf16 %v1978_v18, %v1974_v21 }
 0x725   :  { %3567 = vmatprep.subr.msk.bf16.mxu1 %vm4984_vm0, %v3565_v8  ;;  %3579 = vmatprep.subr.msk.bf16.mxu0 %vm4999_vm11, %v3577_v0  ;;  %vm6027_vm11 = vmmov %vm6026_vm12  ;;  %vm6032_vm0 = vnez %v6031_v47  ;;  %v6079_v0 = vld [vmem:[#allocation22_spill] sm:$0xff]  ;;  %v6081_v47 = vld [vmem:[#allocation25_spill] sm:$0xff] }
 0x726   :  { %3570 = vmatpush1.bf16.msk.msra.mxu1 %vm4994_vm8, %v3568_v37  ;;  %3582 = vmatpush1.bf16.msk.msra.mxu0 %vm5004_vm9, %v3580_v58  ;;  %vm6033_vm8 = vnez %v5984_v57  ;;  %vm6035_vm9 = vnez %v6034_v56  ;;  %v6046_v57 = vld [vmem:[#allocation19_spill] sm:$0xff] }
 0x727   :  { %3584 = vmatprep.subr.msk.bf16.mxu1 %vm6024_vm10, %v5907_v20  ;;  %3616 = vmatprep.subr.msk.bf16.mxu0 %vm6025_vm2, %v5907_v20  ;;  %vm6041_vm10 = vnez %v6040_v50  ;;  %vm6042_vm2 = vnez %v5990_v54  ;;  %v6053_v54 = vld [vmem:[#allocation29_spill] sm:$0xff]  ;;  %v6083_v50 = vld [vmem:[#allocation28_spill] sm:$0xff] }
 0x729   :  { %3019 = vmatmul.mubr.msk.f32.vlgmr.msra.gmra.mrb[22].mxu1 %vm6026_vm12, %v35_v33  ;;  %3028 = vmatmul.mubr.msk.f32.vlgmr.msra.gmra.mrb[18].mxu0 %vm6027_vm11, %v35_v33  ;;  %vm6044_vm12 = vnez %v6043_v63  ;;  %vm6045_vm11 = vnez %v5992_v48  ;;  %v6055_v48 = vld [vmem:[#allocation31_spill] sm:$0xff] }
 0x72a   :  { %3586 = vmatpush3.bf16.msk.msra.mxu1 %vm6029_vm13, %v5907_v20  ;;  %3618 = vmatpush3.bf16.msk.msra.mxu0 %vm6030_vm4, %v5907_v20  ;;  %vm6047_vm13 = vnez %v6046_v57  ;;  %vm6048_vm4 = vnez %v5994_v10 }
 0x72b   :  { %3588 = vmatprep.subr.msk.bf16.mxu1 %vm6032_vm0, %v5907_v20  ;;  %3620 = vmatprep.subr.msk.bf16.mxu0 %vm6033_vm8, %v5907_v20  ;;  %vm6050_vm0 = vnez %v6049_v13  ;;  %vm6052_vm8 = vnez %v6051_v19 }
 0x72e   :  { %3590 = vmatpush3.bf16.msk.msra.mxu1 %vm6035_vm9, %v5907_v20  ;;  %3622 = vmatpush3.bf16.msk.msra.mxu0 %vm6036_vm1, %v5907_v20  ;;  %vm6054_vm9 = vnez %v6053_v54  ;;  %vm6056_vm1 = vnez %v6055_v48 }
 0x72f   :  { %3592 = vmatprep.subr.msk.bf16.mxu1 %vm6038_vm14, %v5907_v20  ;;  %3624 = vmatprep.subr.msk.bf16.mxu0 %vm6039_vm5, %v5907_v20  ;;  %vm6063_vm14 = vnez %v6062_v43  ;;  %vm6067_vm5 = vnez %v6066_v41 }
 0x732   :  { %3594 = vmatpush3.bf16.msk.msra.mxu1 %vm6041_vm10, %v5907_v20  ;;  %3626 = vmatpush3.bf16.msk.msra.mxu0 %vm6042_vm2, %v5907_v20  ;;  %vm6071_vm10 = vnez %v6070_v40  ;;  %vm6073_vm2 = vnez %v6072_v49 }
 0x733   :  { %3596 = vmatprep.subr.msk.bf16.mxu1 %vm6044_vm12, %v5907_v20  ;;  %3628 = vmatprep.subr.msk.bf16.mxu0 %vm6045_vm11, %v5907_v20  ;;  %vm6075_vm12 = vcmask 1043456  }
 0x734   :  { %vm6076_vm11 = vmmov %vm6075_vm12 }
 0x736   :  { %3598 = vmatpush3.bf16.msk.msra.mxu1 %vm6047_vm13, %v5907_v20  ;;  %3630 = vmatpush3.bf16.msk.msra.mxu0 %vm6048_vm4, %v5907_v20  ;;  %vm6077_vm13 = vmmov %vm6076_vm11 }
 0x737   :  { %3600 = vmatprep.subr.msk.bf16.mxu1 %vm6050_vm0, %v5907_v20  ;;  %3632 = vmatprep.subr.msk.bf16.mxu0 %vm5997_vm7, %v5907_v20  ;;  %vm6059_vm7 = vnez %v6058_v55  ;;  %vm6078_vm4 = vmmov %vm6076_vm11  ;;  %vm6082_vm0 = vcmask 1041408  }
 0x73a   :  { %3602 = vmatpush3.bf16.msk.msra.mxu1 %vm6052_vm8, %v5907_v20  ;;  %3634 = vmatpush3.bf16.msk.msra.mxu0 %vm5999_vm3, %v5907_v20  ;;  %vm6061_vm3 = vnez %v6060_v12  ;;  %vm6084_vm8 = vmmov %vm6082_vm0 }
 0x73b   :  { %3604 = vmatprep.subr.msk.bf16.mxu1 %vm6054_vm9, %v5907_v20  ;;  %3636 = vmatprep.subr.msk.bf16.mxu0 %vm6001_vm6, %v5907_v20  ;;  %vm6065_vm6 = vnez %v6064_v45  ;;  %vm6085_vm9 = vmmov %vm6082_vm0 }
 0x73e   :  { %3606 = vmatpush3.bf16.msk.msra.mxu1 %vm6056_vm1, %v5907_v20  ;;  %3638 = vmatpush3.bf16.msk.msra.mxu0 %vm6003_vm15, %v5907_v20  ;;  %vm6069_vm15 = vnez %v6068_v32  ;;  %vm6086_vm1 = vmmov %vm6082_vm0 }
 0x73f   :  { %3608 = vmatprep.subr.msk.bf16.mxu1 %vm6059_vm7, %v5907_v20  ;;  %3640 = vmatprep.subr.msk.bf16.mxu0 %vm6061_vm3, %v5907_v20 }
 0x742   :  { %3610 = vmatpush3.bf16.msk.msra.mxu1 %vm6063_vm14, %v5907_v20  ;;  %3642 = vmatpush3.bf16.msk.msra.mxu0 %vm6065_vm6, %v5907_v20  ;;  %vm6087_vm14 = vmmov %vm6082_vm0 }
 0x743   :  { %3612 = vmatprep.subr.msk.bf16.mxu1 %vm6067_vm5, %v5907_v20  ;;  %3644 = vmatprep.subr.msk.bf16.mxu0 %vm6069_vm15, %v5907_v20  ;;  %vm6088_vm6 = vmmov %vm6082_vm0 }
 0x744   :  { %vm6089_vm5 = vmmov %vm6082_vm0 }
 0x745   :  { %vm6090_vm15 = vmmov %vm6082_vm0 }
 0x746   :  { %3614 = vmatpush3.bf16.msk.msra.mxu1 %vm6071_vm10, %v5907_v20  ;;  %3646 = vmatpush3.bf16.msk.msra.mxu0 %vm6073_vm2, %v5907_v20  ;;  %vm6122_vm10 = vmmov 0   ;;  %vm6123_vm2 = vcmask 261120  }
 0x747   :  { %3647 = vmatprep.subr.bf16.mxu1 %v6074_v34 }
 0x7fc   :  { %v2080_v52 = vpop.f32.mrb[22].mxu1  ;;  %v2151_v38 = vpop.f32.mrb[18].mxu0 }
 0x7fd   :  { %v5251_v6 = vmul.f32 1e-06, %v2080_v52  ;;  %v5253_v31 = vmul.f32 1e-06, %v2151_v38  ;;  %v2082_v3 = vpop.f32.mrb[23].mxu1  ;;  %v2153_v28 = vpop.f32.mrb[19].mxu0 }
 0x7fe   :  { %v5255_v51 = vmul.f32 1e-06, %v2082_v3  ;;  %v5257_v26 = vmul.f32 1e-06, %v2153_v28 }
 0x7ff   :  { %v2160_v22 = vmul.f32 %v5251_v6, %v5251_v6  ;;  %v2162_v20 = vmul.f32 %v5253_v31, %v5253_v31 }
 0x800   :  { %v2161_v5 = vmul.f32 %v5255_v51, %v5255_v51  ;;  %v2163_v11 = vmul.f32 %v5257_v26, %v5257_v26 }
 0x801   :  { %v2164_v62 = vsel %vm6075_vm12, %v2160_v22, 0.0  ;;  %v2178_v42 = vsel %vm6076_vm11, %v2162_v20, 0.0  ;;  %vm6124_vm12 = vcmask 9216  }
 0x802   :  { %v2165_v4 = vrot.slane %v2164_v62, 4  ;;  %v2179_v15 = vrot.slane %v2178_v42, 4  ;;  %v2171_v44 = vsel %vm6077_vm13, %v2161_v5, 0.0  ;;  %v2185_v36 = vsel %vm6078_vm4, %v2163_v11, 0.0  ;;  %vm6125_vm11 = vmmov %vm6124_vm12 }
 0x803   :  { %v2172_v24 = vrot.slane %v2171_v44, 4  ;;  %v2186_v16 = vrot.slane %v2185_v36, 4  ;;  %vm6128_vm13 = vmmov %vm6125_vm11 }
 0x804   :  { %v2166_v29 = vadd.f32 %v2165_v4, %v2164_v62  ;;  %v2180_v39 = vadd.f32 %v2179_v15, %v2178_v42  ;;  %vm6129_vm4 = vmmov %vm6082_vm0 }
 0x805   :  { %v2173_v2 = vadd.f32 %v2172_v24, %v2171_v44  ;;  %v2187_v30 = vadd.f32 %v2186_v16, %v2185_v36 }
 0x806   :  { %v2167_v60 = vrot.slane %v2166_v29, 2  ;;  %v2181_v14 = vrot.slane %v2180_v39, 2 }
 0x807   :  { %v2174_v9 = vrot.slane %v2173_v2, 2  ;;  %v2188_v27 = vrot.slane %v2187_v30, 2 }
 0x808   :  { %v2168_v53 = vadd.f32 %v2167_v60, %v2166_v29  ;;  %v2182_v23 = vadd.f32 %v2181_v14, %v2180_v39 }
 0x809   :  { %v2175_v61 = vadd.f32 %v2174_v9, %v2173_v2  ;;  %v2189_v1 = vadd.f32 %v2188_v27, %v2187_v30 }
 0x80a   :  { %v2169_v18 = vrot.slane %v2168_v53, 1  ;;  %v2183_v46 = vrot.slane %v2182_v23, 1 }
 0x80b   :  { %v2176_v7 = vrot.slane %v2175_v61, 1  ;;  %v2190_v59 = vrot.slane %v2189_v1, 1 }
 0x80c   :  { %v2170_v21 = vadd.f32 %v2169_v18, %v2168_v53  ;;  %v2184_v37 = vadd.f32 %v2183_v46, %v2182_v23 }
 0x80d   :  { %v2177_v58 = vadd.f32 %v2176_v7, %v2175_v61  ;;  %v2191_v8 = vadd.f32 %v2190_v59, %v2189_v1 }
 0x80e   :  { %v2192_v33 = vmul.f32 %v6079_v0, %v2170_v21  ;;  %v2194_v56 = vmul.f32 %v6081_v47, %v2184_v37 }
 0x80f   :  { %v2193_v25 = vmul.f32 %v6080_v17, %v2177_v58  ;;  %v2195_v63 = vmul.f32 %v6083_v50, %v2191_v8 }
 0x810   :  { %v2196_v35 = vsel %vm6082_vm0, %v2192_v33, 0.0  ;;  %v2199_v19 = vsel %vm6085_vm9, %v2194_v56, 0.0  ;;  %vm2855_vm0 = vcmask 0  }
 0x811   :  { %v2197_v57 = vsel %vm6084_vm8, %v2193_v25, 0.0  ;;  %v2201_v48 = vsel %vm6086_vm1, %v2195_v63, 0.0  ;;  %v6091_v63 = vld [vmem:[#allocation46_spill] sm:$0xff] }
 0x812   :  { %v2198_v13 = vadd.f32 %v2197_v57, %v2196_v35  ;;  %v3710_v35 = vld [vmem:[%s5532_s0] sm:$0xff] }
 0x813   :  { %v6092_v57 = vld [vmem:[#allocation48_spill] sm:$0xff] }
 0x814   :  { %v2200_v54 = vadd.f32 %v2199_v19, %v2198_v13  ;;  %v6093_v13 = vld [vmem:[#allocation54_spill] sm:$0xff] }
 0x816   :  { %v2202_v10 = vadd.f32 %v2201_v48, %v2200_v54  ;;  %v6094_v54 = vld [vmem:[#allocation56_spill] sm:$0xff] }
 0x818   :  { %2203 = vadd.xlane.f32.xlu0 %v2202_v10 }
 0x8a5   :  { %v2204_v55 = vpop.xlane.xlu0 %2203 }
 0x8a6   :  { %3700 = vrsqrt.f32 %v2204_v55  ;;  %vm2207_vm7 = vcmp.eq.f32.partialorder %v2204_v55, inf  ;;  %v2210_v45 = vand.u32 2147483648, %v2204_v55  ;;  %vm2209_vm3 = vcmp.eq.f32.partialorder %v2204_v55, 0.0 }
 0x8b0   :  { %v3701_v12 = vpop.eup %3700 }
 0x8b1   :  { %v2206_v43 = vmul.f32 %v3701_v12, %v2204_v55 }
 0x8b3   :  { %v2208_v41 = vsel %vm2207_vm7, %v2204_v55, %v2206_v43 }
 0x8b4   :  { %v2211_v32 = vsel %vm2209_vm3, %v2210_v45, %v2208_v41  ;;  %v6095_v45 = vld [vmem:[#allocation45_spill] sm:$0xff] }
 0x8b5   :  { %v2212_v40 = vadd.f32 1e-08, %v2211_v32  ;;  %v6096_v32 = vld [vmem:[#allocation47_spill] sm:$0xff] }
 0x8b7   :  { %3702 = vrcp.f32 %v2212_v40 }
 0x8c1   :  { %v3703_v49 = vpop.eup %3702 }
 0x8c2   :  { %v2215_v52 = vmul.f32 %v3703_v49, %v6079_v0  ;;  %v2216_v38 = vmul.f32 %v3703_v49, %v6080_v17  ;;  %v2217_v3 = vmul.f32 %v3703_v49, %v6081_v47  ;;  %v2218_v28 = vmul.f32 %v3703_v49, %v6083_v50  ;;  %v6097_v49 = vld [vmem:[#allocation53_spill] sm:$0xff] }
 0x8c4   :  { %v2219_v22 = vsel %vm6087_vm14, %v2215_v52, 0.0  ;;  %v2226_v20 = vsel %vm6088_vm6, %v2216_v38, 0.0  ;;  %v2233_v5 = vsel %vm6089_vm5, %v2217_v3, 0.0  ;;  %v2240_v11 = vsel %vm6090_vm15, %v2218_v28, 0.0  ;;  %v6098_v38 = vld [vmem:[#allocation55_spill] sm:$0xff] }
 0x8c5   :  { %v2220_v62 = vrot.slane %v2219_v22, 4  ;;  %v2227_v42 = vrot.slane %v2226_v20, 4  ;;  %v2234_v4 = vrot.slane %v2233_v5, 4  ;;  %v2241_v15 = vrot.slane %v2240_v11, 4 }
 0x8c7   :  { %v2221_v44 = vadd.f32 %v2220_v62, %v2219_v22  ;;  %v2228_v36 = vadd.f32 %v2227_v42, %v2226_v20  ;;  %v2235_v24 = vadd.f32 %v2234_v4, %v2233_v5  ;;  %v2242_v16 = vadd.f32 %v2241_v15, %v2240_v11  ;;  %v6099_v11 = vld [vmem:[#allocation42_spill] sm:$0xff]  ;;  %v6100_v42 = vld [vmem:[#allocation44_spill] sm:$0xff]  ;;  %v6101_v15 = vld [vmem:[#allocation41_spill] sm:$0xff] }
 0x8c9   :  { %v2222_v29 = vrot.slane %v2221_v44, 2  ;;  %v2229_v39 = vrot.slane %v2228_v36, 2  ;;  %v2236_v2 = vrot.slane %v2235_v24, 2  ;;  %v2243_v30 = vrot.slane %v2242_v16, 2 }
 0x8cb   :  { %v2223_v60 = vadd.f32 %v2222_v29, %v2221_v44  ;;  %v2230_v14 = vadd.f32 %v2229_v39, %v2228_v36  ;;  %v2237_v9 = vadd.f32 %v2236_v2, %v2235_v24  ;;  %v2244_v27 = vadd.f32 %v2243_v30, %v2242_v16  ;;  %v6102_v36 = vld [vmem:[#allocation60_spill] sm:$0xff] }
 0x8cd   :  { %v2224_v53 = vrot.slane %v2223_v60, 1  ;;  %v2231_v23 = vrot.slane %v2230_v14, 1  ;;  %v2238_v61 = vrot.slane %v2237_v9, 1  ;;  %v2245_v1 = vrot.slane %v2244_v27, 1 }
 0x8cf   :  { %v2225_v18 = vadd.f32 %v2224_v53, %v2223_v60  ;;  %v2232_v46 = vadd.f32 %v2231_v23, %v2230_v14  ;;  %v2239_v7 = vadd.f32 %v2238_v61, %v2237_v9  ;;  %v2246_v59 = vadd.f32 %v2245_v1, %v2244_v27 }
 0x8d1   :  { %v2247_v21 = vmul.f32 %v2225_v18, %v5251_v6  ;;  %v2248_v37 = vmul.f32 %v2232_v46, %v5255_v51  ;;  %v2249_v58 = vmul.f32 %v2239_v7, %v5253_v31  ;;  %v2250_v8 = vmul.f32 %v2246_v59, %v5257_v26  ;;  %v3711_v6 = vld [vmem:[%s5532_s0 + $0x8] sm:$0xff] }
 0x8d3   :  { %v2251_v0 = vmul.f32 0.1, %v2247_v21  ;;  %v2252_v33 = vmul.f32 0.1, %v2248_v37  ;;  %v2253_v17 = vmul.f32 0.1, %v2249_v58 }
 0x8d4   :  { %v2254_v25 = vmul.f32 0.1, %v2250_v8 }
 0x8d5   :  { %v2259_v47 = vcombine.low %v2251_v0, %v2252_v33 }
 0x8d6   :  { %v2260_v56 = vcombine.low %v2253_v17, %v2254_v25 }
 0x8d7   :  { %v2263_v50 = vadd.f32 %v3710_v35, %v2259_v47 }
 0x8d8   :  { %v2264_v51 = vadd.f32 %v3711_v6, %v2260_v56 }
 0x8d9   :  { %v2274_v31 = vrot.slane %v2263_v50, %v6091_v63  ;;  %v2326_v26 = vrot.slane %v2263_v50, %v6092_v57  ;;  %v2394_v19 = vrot.slane %v2263_v50, %v6093_v13  ;;  %v2462_v48 = vrot.slane %v2263_v50, %v6094_v54 }
 0x8da   :  { %v2282_v10 = vrot.slane %v2264_v51, %v6091_v63  ;;  %v2334_v55 = vrot.slane %v2264_v51, %v6092_v57  ;;  %v2402_v12 = vrot.slane %v2264_v51, %v6093_v13  ;;  %v2470_v43 = vrot.slane %v2264_v51, %v6094_v54 }
 0x8db   :  { %v5306_v41 = vrot.slane %v2274_v31, %v6095_v45  ;;  %v5309_v40 = vrot.slane %v2326_v26, %v6096_v32  ;;  %v5312_v52 = vrot.slane %v2394_v19, %v6097_v49  ;;  %v5315_v3 = vrot.slane %v2462_v48, %v6098_v38  ;;  %v6104_v19 = vld [vmem:[#allocation43_spill] sm:$0xff] }
 0x8dc   :  { %v5318_v28 = vrot.slane %v2282_v10, %v6095_v45  ;;  %v5321_v22 = vrot.slane %v2334_v55, %v6096_v32  ;;  %v5324_v20 = vrot.slane %v2402_v12, %v6097_v49  ;;  %v5327_v5 = vrot.slane %v2470_v43, %v6098_v38  ;;  %v6105_v48 = vld [vmem:[#allocation51_spill] sm:$0xff] }
 0x8dd   :  { %v2304_v62 = vmul.f32 %v5306_v41, %v6099_v11  ;;  %v2356_v4 = vmul.f32 %v5309_v40, %v6100_v42  ;;  %v2424_v44 = vmul.f32 %v5312_v52, %v6101_v15  ;;  %v2492_v24 = vmul.f32 %v5315_v3, %v6102_v36 }
 0x8de   :  { %v2306_v16 = vmul.f32 %v5318_v28, %v6099_v11  ;;  %v2358_v29 = vmul.f32 %v5321_v22, %v6100_v42  ;;  %v2426_v39 = vmul.f32 %v5324_v20, %v6101_v15  ;;  %v2494_v2 = vmul.f32 %v5327_v5, %v6102_v36 }
 0x8df   :  { %v2372_v30 = vadd.f32 %v2356_v4, %v2304_v62  ;;  %v2270_v60 = vrot.slane %v2263_v50, %v6095_v45  ;;  %v2322_v14 = vrot.slane %v2263_v50, %v6096_v32  ;;  %v2390_v9 = vrot.slane %v2263_v50, %v6097_v49 }
 0x8e0   :  { %v2374_v27 = vadd.f32 %v2358_v29, %v2306_v16  ;;  %v2458_v53 = vrot.slane %v2263_v50, %v6098_v38  ;;  %v2278_v23 = vrot.slane %v2264_v51, %v6095_v45  ;;  %v2330_v61 = vrot.slane %v2264_v51, %v6096_v32  ;;  %v6103_v50 = vld [vmem:[#allocation62_spill] sm:$0xff] }
 0x8e1   :  { %v2440_v1 = vadd.f32 %v2424_v44, %v2372_v30  ;;  %v5352_v18 = vrot.slane %v2270_v60, %v6095_v45  ;;  %v5355_v46 = vrot.slane %v2322_v14, %v6096_v32  ;;  %v5358_v7 = vrot.slane %v2390_v9, %v6097_v49  ;;  %v6107_v44 = vld [vmem:[#allocation61_spill] sm:$0xff] }
 0x8e2   :  { %v2442_v59 = vadd.f32 %v2426_v39, %v2374_v27  ;;  %v5361_v21 = vrot.slane %v2458_v53, %v6098_v38  ;;  %v5364_v37 = vrot.slane %v2278_v23, %v6095_v45  ;;  %v5367_v58 = vrot.slane %v2330_v61, %v6096_v32 }
 0x8e3   :  { %v2508_v8 = vadd.f32 %v2492_v24, %v2440_v1  ;;  %v2303_v0 = vmul.f32 %v5352_v18, %v6099_v11  ;;  %v2355_v33 = vmul.f32 %v5355_v46, %v6100_v42  ;;  %v2423_v17 = vmul.f32 %v5358_v7, %v6101_v15 }
 0x8e4   :  { %v2510_v25 = vadd.f32 %v2494_v2, %v2442_v59  ;;  %v2491_v47 = vmul.f32 %v5361_v21, %v6102_v36  ;;  %v2305_v56 = vmul.f32 %v5364_v37, %v6099_v11  ;;  %v2357_v35 = vmul.f32 %v5367_v58, %v6100_v42  ;;  %v6108_v59 = vld [vmem:[#allocation66_spill] sm:$0xff] }
 0x8e5   :  { %v2524_v6 = vadd.f32 %v2508_v8, %v6103_v50  ;;  %v2371_v63 = vadd.f32 %v2355_v33, %v2303_v0  ;;  %v2398_v31 = vrot.slane %v2264_v51, %v6097_v49  ;;  %v2466_v57 = vrot.slane %v2264_v51, %v6098_v38  ;;  %v6106_v51 = vld [vmem:[#allocation57_spill] sm:$0xff] }
 0x8e6   :  { %v2526_v26 = vadd.f32 %v2510_v25, %v6103_v50  ;;  %v2373_v13 = vadd.f32 %v2357_v35, %v2305_v56  ;;  %v2308_v54 = vmul.f32 %v5306_v41, %v6104_v19  ;;  %v2360_v10 = vmul.f32 %v5309_v40, %v6105_v48  ;;  %v6109_v35 = vld [vmem:[#allocation59_spill] sm:$0xff] }
 0x8e7   :  { %v2540_v55 = vmax.f32 %v2524_v6, 0.0  ;;  %v2439_v12 = vadd.f32 %v2423_v17, %v2371_v63  ;;  %v5390_v43 = vrot.slane %v2398_v31, %v6097_v49  ;;  %v5393_v45 = vrot.slane %v2466_v57, %v6098_v38 }
 0x8e8   :  { %v2542_v32 = vmax.f32 %v2526_v26, 0.0  ;;  %v2376_v11 = vadd.f32 %v2360_v10, %v2308_v54  ;;  %v2428_v62 = vmul.f32 %v5312_v52, %v6106_v51  ;;  %v2496_v24 = vmul.f32 %v5315_v3, %v6107_v44  ;;  %v6110_v26 = vld [vmem:[#allocation52_spill] sm:$0xff]  ;;  %v6112_v10 = vld [vmem:[#allocation58_spill] sm:$0xff] }
 0x8e9   :  { %2619 = vmatprep.mubr.f32.mxu1 %v2540_v55  ;;  %v2507_v42 = vadd.f32 %v2491_v47, %v2439_v12  ;;  %v2425_v4 = vmul.f32 %v5390_v43, %v6101_v15  ;;  %v2310_v49 = vmul.f32 %v5318_v28, %v6104_v19  ;;  %v2493_v38 = vmul.f32 %v5393_v45, %v6102_v36 }
 0x8ea   :  { %2704 = vmatprep.mubr.f32.mxu0 %v2542_v32  ;;  %v2444_v16 = vadd.f32 %v2428_v62, %v2376_v11  ;;  %v2362_v29 = vmul.f32 %v5321_v22, %v6105_v48  ;;  %v2430_v39 = vmul.f32 %v5324_v20, %v6106_v51  ;;  %v2307_v30 = vmul.f32 %v5352_v18, %v6104_v19 }
 0x8eb   :  { %v2523_v2 = vadd.f32 %v2507_v42, %v6103_v50  ;;  %v2441_v15 = vadd.f32 %v2425_v4, %v2373_v13  ;;  %v2359_v60 = vmul.f32 %v5355_v46, %v6105_v48  ;;  %v2498_v36 = vmul.f32 %v5327_v5, %v6107_v44  ;;  %v6113_v42 = vld [vmem:[#allocation64_spill] sm:$0xff] }
 0x8ec   :  { %v2512_v14 = vadd.f32 %v2496_v24, %v2444_v16  ;;  %v2378_v9 = vadd.f32 %v2362_v29, %v2310_v49  ;;  %v2427_v27 = vmul.f32 %v5358_v7, %v6106_v51  ;;  %v2309_v1 = vmul.f32 %v5364_v37, %v6104_v19  ;;  %v6111_v19 = vld [vmem:[#allocation49_spill] sm:$0xff]  ;;  %v6114_v29 = vld [vmem:[#allocation50_spill] sm:$0xff] }
 0x8ed   :  { %v2539_v53 = vmax.f32 %v2523_v2, 0.0  ;;  %v2509_v23 = vadd.f32 %v2493_v38, %v2441_v15  ;;  %v2375_v61 = vadd.f32 %v2359_v60, %v2307_v30  ;;  %v2495_v33 = vmul.f32 %v5361_v21, %v6107_v44 }
 0x8ee   :  { %v2528_v8 = vadd.f32 %v2512_v14, %v6108_v59  ;;  %v2446_v0 = vadd.f32 %v2430_v39, %v2378_v9  ;;  %v2361_v17 = vmul.f32 %v5367_v58, %v6105_v48  ;;  %v2429_v56 = vmul.f32 %v5390_v43, %v6106_v51 }
 0x8ef   :  { %2620 = vmatmul.mubr.f32.vlgmr.msra.gmra.mrb[24].mxu1 %v2539_v53  ;;  %v2525_v25 = vadd.f32 %v2509_v23, %v6103_v50  ;;  %v2443_v47 = vadd.f32 %v2427_v27, %v2375_v61  ;;  %v2312_v6 = vmul.f32 %v5306_v41, %v6109_v35  ;;  %v2364_v13 = vmul.f32 %v5309_v40, %v6110_v26 }
 0x8f0   :  { %v2544_v63 = vmax.f32 %v2528_v8, 0.0  ;;  %v2514_v31 = vadd.f32 %v2498_v36, %v2446_v0  ;;  %v2377_v57 = vadd.f32 %v2361_v17, %v2309_v1  ;;  %3649 = vmatpush3.bf16.msra.mxu1 %v6111_v19  ;;  %v2497_v50 = vmul.f32 %v5393_v45, %v6107_v44  ;;  %v6115_v8 = vld [vmem:[#allocation70_spill] sm:$0xff] }
 0x8f1   :  { %v2541_v54 = vmax.f32 %v2525_v25, 0.0  ;;  %v2511_v48 = vadd.f32 %v2495_v33, %v2443_v47  ;;  %v2432_v55 = vmul.f32 %v5312_v52, %v6112_v10  ;;  %3650 = vmatprep.subr.bf16.mxu1 %v6074_v34  ;;  %v2380_v11 = vadd.f32 %v2364_v13, %v2312_v6  ;;  %v6116_v33 = vld [vmem:[#allocation63_spill] sm:$0xff] }
 0x8f2   :  { %2624 = vmatprep.mubr.f32.mxu1 %v2544_v63  ;;  %v2530_v12 = vadd.f32 %v2514_v31, %v6108_v59  ;;  %v2445_v32 = vadd.f32 %v2429_v56, %v2377_v57  ;;  %v2314_v51 = vmul.f32 %v5318_v28, %v6109_v35  ;;  %v2500_v4 = vmul.f32 %v5315_v3, %v6113_v42  ;;  %v6118_v57 = vld [vmem:[#allocation68_spill] sm:$0xff] }
 0x8f3   :  { %2705 = vmatmul.mubr.f32.vlgmr.msra.gmra.mrb[20].mxu0 %v2541_v54  ;;  %v2527_v62 = vadd.f32 %v2511_v48, %v6108_v59  ;;  %v2366_v44 = vmul.f32 %v5321_v22, %v6110_v26  ;;  %v2434_v34 = vmul.f32 %v5324_v20, %v6112_v10  ;;  %v2448_v38 = vadd.f32 %v2432_v55, %v2380_v11 }
 0x8f4   :  { %v2546_v24 = vmax.f32 %v2530_v12, 0.0  ;;  %v2513_v49 = vadd.f32 %v2497_v50, %v2445_v32  ;;  %v2311_v16 = vmul.f32 %v5352_v18, %v6109_v35  ;;  %3652 = vmatpush3.bf16.msra.mxu1 %v6114_v29  ;;  %v2502_v15 = vmul.f32 %v5327_v5, %v6113_v42  ;;  %v6119_v50 = vld [vmem:[#allocation67_spill] sm:$0xff] }
 0x8f5   :  { %v2543_v39 = vmax.f32 %v2527_v62, 0.0  ;;  %v2382_v2 = vadd.f32 %v2366_v44, %v2314_v51  ;;  %v2363_v30 = vmul.f32 %v5355_v46, %v6110_v26  ;;  %v2516_v14 = vadd.f32 %v2500_v4, %v2448_v38 }
 0x8f6   :  { %2709 = vmatprep.mubr.f32.mxu0 %v2546_v24  ;;  %v2529_v60 = vadd.f32 %v2513_v49, %v6108_v59  ;;  %v2431_v9 = vmul.f32 %v5358_v7, %v6112_v10  ;;  %v2313_v36 = vmul.f32 %v5364_v37, %v6109_v35  ;;  %v2499_v23 = vmul.f32 %v5361_v21, %v6113_v42  ;;  %v6117_v35 = vld [vmem:[#allocation65_spill] sm:$0xff] }
 0x8f7   :  { %2625 = vmatmul.mubr.f32.gmra.mrb[26].mxu1 %v2543_v39  ;;  %v2450_v27 = vadd.f32 %v2434_v34, %v2382_v2  ;;  %v2379_v53 = vadd.f32 %v2363_v30, %v2311_v16  ;;  %v2365_v61 = vmul.f32 %v5367_v58, %v6110_v26  ;;  %v2532_v0 = vadd.f32 %v2516_v14, %v6115_v8  ;;  %v6120_v49 = vld [vmem:[#allocation69_spill] sm:$0xff] }
 0x8f8   :  { %v2545_v1 = vmax.f32 %v2529_v60, 0.0  ;;  %v2433_v59 = vmul.f32 %v5390_v43, %v6112_v10  ;;  %v2316_v17 = vmul.f32 %v5306_v41, %v6116_v33  ;;  %v2368_v6 = vmul.f32 %v5309_v40, %v6117_v35 }
 0x8f9   :  { %v2518_v25 = vadd.f32 %v2502_v15, %v2450_v27  ;;  %v2447_v47 = vadd.f32 %v2431_v9, %v2379_v53  ;;  %v2381_v56 = vadd.f32 %v2365_v61, %v2313_v36  ;;  %v2548_v63 = vmax.f32 %v2532_v0, 0.0 }
 0x8fa   :  { %2710 = vmatmul.mubr.f32.gmra.mrb[22].mxu0 %v2545_v1  ;;  %v2501_v31 = vmul.f32 %v5393_v45, %v6113_v42  ;;  %v2436_v26 = vmul.f32 %v5312_v52, %v6118_v57  ;;  %v2318_v13 = vmul.f32 %v5318_v28, %v6116_v33  ;;  %v2384_v48 = vadd.f32 %v2368_v6, %v2316_v17 }
 0x8fb   :  { %v2534_v19 = vadd.f32 %v2518_v25, %v6115_v8  ;;  %v2515_v41 = vadd.f32 %v2499_v23, %v2447_v47  ;;  %v2449_v54 = vadd.f32 %v2433_v59, %v2381_v56  ;;  %2629 = vmatprep.mubr.f32.mxu1 %v2548_v63  ;;  %v2504_v40 = vmul.f32 %v5315_v3, %v6119_v50 }
 0x8fc   :  { %v2370_v10 = vmul.f32 %v5321_v22, %v6117_v35  ;;  %v2315_v55 = vmul.f32 %v5352_v18, %v6116_v33  ;;  %v2452_v28 = vadd.f32 %v2436_v26, %v2384_v48  ;;  %v2438_v51 = vmul.f32 %v5324_v20, %v6118_v57 }
 0x8fd   :  { %v2550_v12 = vmax.f32 %v2534_v19, 0.0  ;;  %v2531_v52 = vadd.f32 %v2515_v41, %v6115_v8  ;;  %v2517_v32 = vadd.f32 %v2501_v31, %v2449_v54  ;;  %v2506_v62 = vmul.f32 %v5327_v5, %v6119_v50 }
 0x8fe   :  { %v2386_v11 = vadd.f32 %v2370_v10, %v2318_v13  ;;  %v2367_v3 = vmul.f32 %v5355_v46, %v6117_v35  ;;  %v2520_v18 = vadd.f32 %v2504_v40, %v2452_v28  ;;  %v2317_v4 = vmul.f32 %v5364_v37, %v6116_v33 }
 0x8ff   :  { %2714 = vmatprep.mubr.f32.mxu0 %v2550_v12  ;;  %v2547_v22 = vmax.f32 %v2531_v52, 0.0  ;;  %v2533_v42 = vadd.f32 %v2517_v32, %v6115_v8  ;;  %v2435_v24 = vmul.f32 %v5358_v7, %v6118_v57  ;;  %v2369_v20 = vmul.f32 %v5367_v58, %v6117_v35  ;;  %v3712_v32 = vld [vmem:[%s5538_s6] ss:$0 sm:$0xff]  ;;  %s3745_s6 = smov [#allocation2]  }
 0x900   :  { %v2454_v44 = vadd.f32 %v2438_v51, %v2386_v11  ;;  %v2383_v34 = vadd.f32 %v2367_v3, %v2315_v55  ;;  %v2536_v46 = vadd.f32 %v2520_v18, %v6120_v49  ;;  %v2503_v38 = vmul.f32 %v5361_v21, %v6119_v50  ;;  %s2863_s17 = sshll.u32 %s3745_s6, 4  ;;  %s2864_s17 = int_to_ptr.vmem [resolvable:$true] %s2863_s17 }
 0x901   :  { %2630 = vmatmul.mubr.f32.gmra.mrb[28].mxu1 %v2547_v22  ;;  %v2549_v5 = vmax.f32 %v2533_v42, 0.0  ;;  %v2385_v39 = vadd.f32 %v2369_v20, %v2317_v4  ;;  %v2437_v37 = vmul.f32 %v5390_v43, %v6118_v57  ;;  %v2505_v58 = vmul.f32 %v5393_v45, %v6119_v50  ;;  %v6126_v20 = vld [vmem:[#allocation6_spill] sm:$0xff]  ;;  %s3713_s18 = scalar_lea.vmem %s2864_s17, 16  ;;  %s3717_s19 = scalar_lea.vmem %s2864_s17, 32 }
 0x902   :  { %v2522_v16 = vadd.f32 %v2506_v62, %v2454_v44  ;;  %v2451_v29 = vadd.f32 %v2435_v24, %v2383_v34  ;;  %v2552_v2 = vmax.f32 %v2536_v46, 0.0  ;;  %v6121_v27 = vmov 0.0   ;;  %p3714_p0 = scmp.ne.s32.totalorder %s2864_s17, %s3713_s18  ;;  %p3718_p1 = scmp.lt.s32.totalorder %s2864_s17, %s2864_s17 }
 0x903   :  { %2715 = vmatmul.mubr.f32.gmra.mrb[24].mxu0 %v2549_v5  ;;  %v2453_v30 = vadd.f32 %v2437_v37, %v2385_v39  ;;  %p3719_p2 = scmp.lt.s32.totalorder %s3717_s19, %s3713_s18 }
 0x904   :  { %v2538_v7 = vadd.f32 %v2522_v16, %v6120_v49  ;;  %v2519_v15 = vadd.f32 %v2503_v38, %v2451_v29  ;;  %2634 = vmatprep.mubr.f32.mxu1 %v2552_v2 }
 0x905   :  { %v2521_v21 = vadd.f32 %v2505_v58, %v2453_v30  ;;  %p3720_p3 = por %p3719_p2, %p3718_p1 }
 0x906   :  { %v2554_v60 = vmax.f32 %v2538_v7, 0.0  ;;  %v2535_v14 = vadd.f32 %v2519_v15, %v6120_v49 }
 0x907   :  { %v2537_v36 = vadd.f32 %v2521_v21, %v6120_v49  ;;  %v6127_v49 = vld [vmem:[#allocation8_spill] sm:$0xff]  ;;  %p3721_p4 = pnand %p3720_p3, %p3714_p0 }
 0x908   :  { %2719 = vmatprep.mubr.f32.mxu0 %v2554_v60  ;;  %v2551_v9 = vmax.f32 %v2535_v14, 0.0 }
 0x909   :  { %v2553_v43 = vmax.f32 %v2537_v36, 0.0 }
 0x90a   :  { %2635 = vmatmul.mubr.f32.gmra.mrb[30].mxu1 %v2551_v9 }
 0x90b   :  { %3416 = vmatprep.mubr.msk.f32.mxu1 %vm6122_vm10, %v6121_v27  ;;  %2720 = vmatmul.mubr.f32.gmra.mrb[26].mxu0 %v2553_v43 }
 0x9c2   :  { %v3317_v53 = vpop.f32.mrb[24].mxu1 }
 0x9c3   :  { %v3318_v23 = vpop.f32.mrb[25].mxu1 }
 0x9c4   :  { %v3319_v61 = vadd.f32 %v3318_v23, %v3317_v53 }
 0x9c6   :  { %v3361_v1 = vpop.f32.mrb[20].mxu0 }
 0x9c7   :  { %v3362_v45 = vpop.f32.mrb[21].mxu0 }
 0x9c8   :  { %v3363_v8 = vadd.f32 %v3362_v45, %v3361_v1 }
 0x9ca   :  { %v2707_v0 = vadd.f32 %v3363_v8, %v3319_v61  ;;  %v3320_v59 = vpop.f32.mrb[26].mxu1 }
 0x9cb   :  { %v3321_v33 = vpop.f32.mrb[27].mxu1 }
 0x9cc   :  { %v3322_v17 = vadd.f32 %v3321_v33, %v3320_v59  ;;  %2725 = vxpose.xlu1.b32.start [1/4] (short) (narrow) %v2707_v0, 8 }
 0x9cd   :  { %v3364_v25 = vpop.f32.mrb[22].mxu0 }
 0x9ce   :  { %v3365_v47 = vpop.f32.mrb[23].mxu0 }
 0x9cf   :  { %v3366_v56 = vadd.f32 %v3365_v47, %v3364_v25 }
 0x9d1   :  { %v2712_v35 = vadd.f32 %v3366_v56, %v3322_v17 }
 0x9d3   :  { %2726 = vxpose.xlu1.b32.cont [2/4] (short) (narrow) %v2712_v35, 8 }
 0x9d4   :  { %v3323_v6 = vpop.f32.mrb[28].mxu1 }
 0x9d5   :  { %v3324_v63 = vpop.f32.mrb[29].mxu1 }
 0x9d6   :  { %v3367_v31 = vpop.f32.mrb[24].mxu0  ;;  %v3325_v57 = vadd.f32 %v3324_v63, %v3323_v6 }
 0x9d7   :  { %v3368_v26 = vpop.f32.mrb[25].mxu0 }
 0x9d8   :  { %v3369_v13 = vadd.f32 %v3368_v26, %v3367_v31 }
 0x9da   :  { %v2717_v19 = vadd.f32 %v3369_v13, %v3325_v57 }
 0x9dc   :  { %2727 = vxpose.xlu1.b32.cont [3/4] (short) (narrow) %v2717_v19, 8 }
 0x9dd   :  { %v3326_v41 = vpop.f32.mrb[30].mxu1 }
 0x9de   :  { %v3327_v54 = vpop.f32.mrb[31].mxu1  ;;  %v3370_v48 = vpop.f32.mrb[26].mxu0 }
 0x9df   :  { %v3328_v50 = vadd.f32 %v3327_v54, %v3326_v41  ;;  %v3371_v40 = vpop.f32.mrb[27].mxu0 }
 0x9e0   :  { %v3372_v10 = vadd.f32 %v3371_v40, %v3370_v48 }
 0x9e2   :  { %v2722_v55 = vadd.f32 %v3372_v10, %v3328_v50 }
 0x9e4   :  { %2728 = vxpose.xlu1.b32.end [4/4] (short) (narrow) %v2722_v55, 8 }
 0xa58   :  { %v2741_v12 = vpop.trf.xlu1 }
 0xa59   :  { %3417 = vmatmul.mubr.msk.f32.vlgmr.msra.gmra.mrb[32].mxu1 %vm6123_vm2, %v2741_v12 }
 0xb2c   :  { %v2826_v52 = vpop.f32.mrb[32].mxu1 }
 0xb2d   :  { %v2827_v28 = vadd.f32 %v3712_v32, %v2826_v52  ;;  %v3418_v11 = vpop.f32.mrb[33].mxu1 }
 0xb2f   :  { %v2830_v51 = vsel %vm6124_vm12, %v2827_v28, -inf }
 0xb30   :  { %2831 = vmax.xlane.f32.xlu0 %v2830_v51 }
 0xbbd   :  { %v2832_v62 = vpop.xlane.xlu0 %2831 }
 0xbbe   :  { %v2833_v3 = vsub.f32 %v2827_v28, %v2832_v62 }
 0xbc0   :  { %v2834_v22 = vmul.f32 1.442695, %v2833_v3 }
 0xbc2   :  { %3704 = vpow2.f32 %v2834_v22 }
 0xbcc   :  { %v3705_v42 = vpop.eup %3704 }
 0xbcd   :  { %v2836_v18 = vsel %vm6125_vm11, %v3705_v42, 0.0 }
 0xbce   :  { %2837 = vadd.xlane.f32.xlu0 %v2836_v18 }
 0xc5b   :  { %v2838_v4 = vpop.xlane.xlu0 %2837 }
 0xc5c   :  { %3706 = vlog2.f32 %v2838_v4 }
 0xc66   :  { %v3707_v44 = vpop.eup %3706 }
 0xc67   :  { %v2840_v34 = vmul.f32 0.6931472, %v3707_v44 }
 0xc69   :  { %v2841_v24 = vsub.f32 %v2833_v3, %v2840_v34 }
 0xc6b   :  { %v2842_v5 = vsub.f32 %v6126_v20, %v2841_v24 }
 0xc6d   :  { %v2843_v46 = vmul.f32 %v6127_v49, %v2842_v5 }
 0xc6f   :  { %v2844_v38 = vsel %vm6128_vm13, %v2843_v46, 0.0 }
 0xc70   :  { %2845 = vadd.xlane.f32.xlu0 %v2844_v38 }
 0xcfd   :  { %v2846_v16 = vpop.xlane.xlu0 %2845 }
 0xcfe   :  { %v2847_v29 = vsel %vm6129_vm4, %v2846_v16, 0.0 }
 0xcff   :  { %v2848_v39 = vrot.slane %v2847_v29, 4 }
 0xd01   :  { %v2849_v37 = vadd.f32 %v2848_v39, %v2847_v29 }
 0xd03   :  { %v2850_v2 = vrot.slane %v2849_v37, 2 }
 0xd05   :  { %v2851_v7 = vadd.f32 %v2850_v2, %v2849_v37 }
 0xd07   :  { %v2852_v15 = vrot.slane %v2851_v7, 1 }
 0xd09   :  { %v2853_v30 = vadd.f32 %v2852_v15, %v2851_v7 }
 0xd0b   :  { %v2854_v58 = vmul.f32 0.25, %v2853_v30 }
 0xd0d   :  { %2856 = vst.msk [vmem:[#allocation2] sm:$0x1] %vm2855_vm0, %v2854_v58 }
 0xd0e   :  { %3724 = shalt.err (!%p3721_p4)
}
 0xd0f   :  { %s3725_s21 = scalar_lea.hbm %s5539_s7, 16 }
 0xd10   :  { %p3726_p5 = scmp.ne.s32.totalorder %s5539_s7, %s3725_s21  ;;  %p3729_p6 = scmp.lt.u32.totalorder %s3725_s21, %s5539_s7 }
 0xd12   :  { %p3731_p7 = pnand %p3729_p6, %p3726_p5 }
 0xd14   :  { %3734 = shalt.err (!%p3731_p7)
}
 0xd15   :  { %2866 = dma.vmem_to_hbm [thread:$0]  %s2864_s17, 16, %s5539_s7, [#allocation3]  }
 0xd16   :  { %3735 = dma.done.wait [#allocation3], 16  }
 0xd17   :  { %3736 = vsyncadd [#allocation3], 4294967280 }
 0xd18   :  { %2870 = vsyncpa [#allocation3], 1 }

</bundles_post_ra>
